<compile_context>
chip_gen: v7x
topology: tpu7x:2x2x1
jax: 0.10.0
libtpu: 0.0.40
codegen_flags: <defaults>
</compile_context>

<pallas_src>
import math

import jax
import jax.numpy as jnp
from jax.experimental import pallas as pl
from jax.experimental.pallas import tpu as pltpu

# ---- small, module-consistent sizes (d_model plays the role of 512) ----
D_MODEL = 128
N_HEADS = 4
HEAD_DIM = D_MODEL // N_HEADS
FF_HIDDEN = 256
N_LAYERS = 2
VOCAB = 128
LN_EPS = 1e-5
ATTN_SCALE = 1.0 / math.sqrt(HEAD_DIM)
NEG_INF = -1e30  # finite "minus infinity" for masking (robust vs inf-inf)


# ----------------------------- fused kernel -------------------------------

def _decoder_kernel(x_ref, enc_ref,
                    m_wq_ref, m_bq_ref, m_wkv_ref, m_bkv_ref, m_wo_ref, m_bo_ref,
                    s_wqkv_ref, s_bqkv_ref, s_wo_ref, s_bo_ref,
                    f_w1_ref, f_b1_ref, f_w2_ref, f_b2_ref,
                    ln_g_ref, ln_b_ref, unembed_ref,
                    out_ref):
    f32 = jnp.float32
    bf16 = jnp.bfloat16

    x = x_ref[0].astype(f32)            # (Sq, D)  current-batch target activations
    mem = enc_ref[0].astype(f32)        # (Sk, D)  encoder memory
    mem_b = mem.astype(bf16)

    sq = x.shape[0]

    gamma = ln_g_ref[...].astype(f32)   # (1, D)  shared LayerNorm (as in reference)
    beta = ln_b_ref[...].astype(f32)

    # causal mask built once (hoisted out of the per-layer / per-head work)
    row = jax.lax.broadcasted_iota(jnp.int32, (sq, sq), 0)
    col = jax.lax.broadcasted_iota(jnp.int32, (sq, sq), 1)
    causal_mask = col > row

    def layer_norm(y):                  # f32 (Sq, D) -> (Sq, D)
        mu = jnp.mean(y, axis=-1, keepdims=True)
        yc = y - mu
        var = jnp.mean(yc * yc, axis=-1, keepdims=True)
        return yc * jax.lax.rsqrt(var + LN_EPS) * gamma + beta

    def heads_attention(q, k, v, mask):
        # q: (Sq, D), k/v: (S, D) f32; small unrolled loop over heads, f32 math
        outs = []
        for h in range(N_HEADS):
            lo = h * HEAD_DIM
            qh = q[:, lo:lo + HEAD_DIM]                     # (Sq, Dh)
            kh = k[:, lo:lo + HEAD_DIM]                     # (S, Dh)
            vh = v[:, lo:lo + HEAD_DIM]                     # (S, Dh)
            s = jnp.dot(qh, kh.T, preferred_element_type=f32) * ATTN_SCALE
            if mask is not None:
                s = jnp.where(mask, NEG_INF, s)
            m = jnp.max(s, axis=-1, keepdims=True)
            p = jnp.exp(s - m)
            inv = pl.reciprocal(jnp.sum(p, axis=-1, keepdims=True), approx=True)
            outs.append(jnp.dot(p * inv, vh, preferred_element_type=f32))
        return jnp.concatenate(outs, axis=-1)               # (Sq, D) f32

    for li in range(N_LAYERS):          # static unroll; weights indexed statically
        # ---------------- memory attention + residual + LN ----------------
        xb = x.astype(bf16)
        q = jnp.dot(xb, m_wq_ref[li], preferred_element_type=f32) + m_bq_ref[li]
        kv = jnp.dot(mem_b, m_wkv_ref[li], preferred_element_type=f32) + m_bkv_ref[li]
        k = kv[:, :D_MODEL]
        v = kv[:, D_MODEL:]
        att = heads_attention(q, k, v, mask=None)
        att = jnp.dot(att.astype(bf16), m_wo_ref[li],
                      preferred_element_type=f32) + m_bo_ref[li]
        x = layer_norm(x + att)

        # ------------- masked self attention + residual + LN --------------
        xb = x.astype(bf16)
        qkv = jnp.dot(xb, s_wqkv_ref[li], preferred_element_type=f32) + s_bqkv_ref[li]
        q = qkv[:, :D_MODEL]
        k = qkv[:, D_MODEL:2 * D_MODEL]
        v = qkv[:, 2 * D_MODEL:]
        att = heads_attention(q, k, v, mask=causal_mask)
        att = jnp.dot(att.astype(bf16), s_wo_ref[li],
                      preferred_element_type=f32) + s_bo_ref[li]
        x = layer_norm(x + att)

        # -------- position-wise FF (ReLU after BOTH linears, per ref) ------
        xb = x.astype(bf16)
        h1 = jnp.maximum(
            jnp.dot(xb, f_w1_ref[li], preferred_element_type=f32) + f_b1_ref[li], 0.0)
        h2 = jnp.maximum(
            jnp.dot(h1.astype(bf16), f_w2_ref[li],
                    preferred_element_type=f32) + f_b2_ref[li], 0.0)
        x = layer_norm(x + h2)

    # ----------------------- tied-embedding unembed ------------------------
    logits = jnp.dot(x.astype(bf16), unembed_ref[...], preferred_element_type=f32)
    out_ref[0] = logits.astype(out_ref.dtype)


# ------------------------------ model glue --------------------------------

_WEIGHT_KEYS = ("m_wq", "m_bq", "m_wkv", "m_bkv", "m_wo", "m_bo",
                "s_wqkv", "s_bqkv", "s_wo", "s_bo",
                "f_w1", "f_b1", "f_w2", "f_b2",
                "ln_g", "ln_b", "unembed")


def decoder_forward(params, encoded, target_ids):
    # TODO(synk): external `embedding` module not provided — tied embedding
    # lookup (gather) is plain JAX glue; unembed happens inside the kernel.
    x = params["embed"][target_ids]                     # (B, Sq, D) f32
    B, Sq, D = x.shape
    Sk = encoded.shape[1]

    weight_args = [params[k] for k in _WEIGHT_KEYS]

    def full_spec(shape):
        n = len(shape)
        return pl.BlockSpec(tuple(shape), lambda b, _n=n: (0,) * _n)

    in_specs = ([pl.BlockSpec((1, Sq, D), lambda b: (b, 0, 0)),
                 pl.BlockSpec((1, Sk, D), lambda b: (b, 0, 0))]
                + [full_spec(w.shape) for w in weight_args])

    return pl.pallas_call(
        _decoder_kernel,
        out_shape=jax.ShapeDtypeStruct((B, Sq, VOCAB), jnp.float32),
        grid=(B,),
        in_specs=in_specs,
        out_specs=pl.BlockSpec((1, Sq, VOCAB), lambda b: (b, 0, 0)),
        compiler_params=pltpu.CompilerParams(dimension_semantics=("parallel",)),
    )(x, encoded, *weight_args)


# ------------------------------ param init --------------------------------

def _linear_init(key, d_in, d_out):
    kw, kb = jax.random.split(key)
    lim = 1.0 / math.sqrt(d_in)
    w = jax.random.uniform(kw, (d_in, d_out), jnp.float32, -lim, lim)
    b = jax.random.uniform(kb, (d_out,), jnp.float32, -lim, lim)
    return w, b


def init_params(key):
    keys = jax.random.split(key, 1 + N_LAYERS)
    embed = jax.random.normal(keys[0], (VOCAB, D_MODEL), jnp.float32) * 0.02

    m_wq, m_bq, m_wkv, m_bkv, m_wo, m_bo = [], [], [], [], [], []
    s_wqkv, s_bqkv, s_wo, s_bo = [], [], [], []
    f_w1, f_b1, f_w2, f_b2 = [], [], [], []

    for li in range(N_LAYERS):
        lk = jax.random.split(keys[1 + li], 10)
        # memory attention
        wq, bq = _linear_init(lk[0], D_MODEL, D_MODEL)
        wk, bk = _linear_init(lk[1], D_MODEL, D_MODEL)
        wv, bv = _linear_init(lk[2], D_MODEL, D_MODEL)
        wo, bo = _linear_init(lk[3], D_MODEL, D_MODEL)
        m_wq.append(wq); m_bq.append(bq)
        m_wkv.append(jnp.concatenate([wk, wv], axis=1))
        m_bkv.append(jnp.concatenate([bk, bv], axis=0))
        m_wo.append(wo); m_bo.append(bo)
        # masked self attention (fused qkv)
        q2, bq2 = _linear_init(lk[4], D_MODEL, D_MODEL)
        k2, bk2 = _linear_init(lk[5], D_MODEL, D_MODEL)
        v2, bv2 = _linear_init(lk[6], D_MODEL, D_MODEL)
        o2, bo2 = _linear_init(lk[7], D_MODEL, D_MODEL)
        s_wqkv.append(jnp.concatenate([q2, k2, v2], axis=1))
        s_bqkv.append(jnp.concatenate([bq2, bk2, bv2], axis=0))
        s_wo.append(o2); s_bo.append(bo2)
        # position-wise FF
        w1, b1 = _linear_init(lk[8], D_MODEL, FF_HIDDEN)
        w2, b2 = _linear_init(lk[9], FF_HIDDEN, D_MODEL)
        f_w1.append(w1); f_b1.append(b1); f_w2.append(w2); f_b2.append(b2)

    def stack_w(ws):                       # bf16 matmul operands (f32 accumulate)
        return jnp.stack(ws).astype(jnp.bfloat16)

    def stack_b(bs):                       # biases stay f32 (post-accumulation add)
        return jnp.stack(bs)[:, None, :]   # (L, 1, N)

    return {
        "embed": embed,
        "unembed": embed.T.astype(jnp.bfloat16),     # tied E^T, built once at init
        "ln_g": jnp.ones((1, D_MODEL), jnp.float32),
        "ln_b": jnp.zeros((1, D_MODEL), jnp.float32),
        "m_wq": stack_w(m_wq), "m_bq": stack_b(m_bq),
        "m_wkv": stack_w(m_wkv), "m_bkv": stack_b(m_bkv),
        "m_wo": stack_w(m_wo), "m_bo": stack_b(m_bo),
        "s_wqkv": stack_w(s_wqkv), "s_bqkv": stack_b(s_bqkv),
        "s_wo": stack_w(s_wo), "s_bo": stack_b(s_bo),
        "f_w1": stack_w(f_w1), "f_b1": stack_b(f_b1),
        "f_w2": stack_w(f_w2), "f_b2": stack_b(f_b2),
    }


# --------------------------------- main ------------------------------------

if __name__ == "__main__":
    B, S_TGT, S_ENC = 2, 8, 16

    key = jax.random.PRNGKey(0)
    kp, ke, kt = jax.random.split(key, 3)
    params = init_params(kp)
    encoded = jax.random.normal(ke, (B, S_ENC, D_MODEL), jnp.float32)
    target = jax.random.randint(kt, (B, S_TGT), 0, VOCAB)

    logits = jax.jit(decoder_forward)(params, encoded, target)
    jax.block_until_ready(logits)
    assert logits.shape == (B, S_TGT, VOCAB)
    assert bool(jnp.all(jnp.isfinite(logits)))
    print("KERNEL_OK")
</pallas_src>

<mosaic_0001>
module attributes {stable_mosaic.version = 11 : i64} {
  func.func @_decoder_kernel(%arg0: i32, %arg1: memref<1x8x128xf32, #tpu.memory_space<vmem>>, %arg2: memref<1x16x128xf32, #tpu.memory_space<vmem>>, %arg3: memref<2x128x128xbf16, #tpu.memory_space<vmem>>, %arg4: memref<2x1x128xf32, #tpu.memory_space<vmem>>, %arg5: memref<2x128x256xbf16, #tpu.memory_space<vmem>>, %arg6: memref<2x1x256xf32, #tpu.memory_space<vmem>>, %arg7: memref<2x128x128xbf16, #tpu.memory_space<vmem>>, %arg8: memref<2x1x128xf32, #tpu.memory_space<vmem>>, %arg9: memref<2x128x384xbf16, #tpu.memory_space<vmem>>, %arg10: memref<2x1x384xf32, #tpu.memory_space<vmem>>, %arg11: memref<2x128x128xbf16, #tpu.memory_space<vmem>>, %arg12: memref<2x1x128xf32, #tpu.memory_space<vmem>>, %arg13: memref<2x128x256xbf16, #tpu.memory_space<vmem>>, %arg14: memref<2x1x256xf32, #tpu.memory_space<vmem>>, %arg15: memref<2x256x128xbf16, #tpu.memory_space<vmem>>, %arg16: memref<2x1x128xf32, #tpu.memory_space<vmem>>, %arg17: memref<1x128xf32, #tpu.memory_space<vmem>>, %arg18: memref<1x128xf32, #tpu.memory_space<vmem>>, %arg19: memref<128x128xbf16, #tpu.memory_space<vmem>>, %arg20: memref<1x8x128xf32, #tpu.memory_space<vmem>>) attributes {dimension_semantics = [#tpu.dimension_semantics<parallel>], iteration_bounds = array<i64: 2>, scalar_prefetch = 0 : i64, scratch_operands = 0 : i64, tpu.core_type = #tpu.core_type<tc>, window_params = [{transform_indices = @transform_0, window_bounds = array<i64: 1, 8, 128>}, {transform_indices = @transform_1, window_bounds = array<i64: 1, 16, 128>}, {pipeline_mode = #tpu.pipeline_mode<synchronous>, transform_indices = @transform_2, window_bounds = array<i64: 2, 128, 128>}, {pipeline_mode = #tpu.pipeline_mode<synchronous>, transform_indices = @transform_3, window_bounds = array<i64: 2, 1, 128>}, {pipeline_mode = #tpu.pipeline_mode<synchronous>, transform_indices = @transform_4, window_bounds = array<i64: 2, 128, 256>}, {pipeline_mode = #tpu.pipeline_mode<synchronous>, transform_indices = @transform_5, window_bounds = array<i64: 2, 1, 256>}, {pipeline_mode = #tpu.pipeline_mode<synchronous>, transform_indices = @transform_6, window_bounds = array<i64: 2, 128, 128>}, {pipeline_mode = #tpu.pipeline_mode<synchronous>, transform_indices = @transform_7, window_bounds = array<i64: 2, 1, 128>}, {pipeline_mode = #tpu.pipeline_mode<synchronous>, transform_indices = @transform_8, window_bounds = array<i64: 2, 128, 384>}, {pipeline_mode = #tpu.pipeline_mode<synchronous>, transform_indices = @transform_9, window_bounds = array<i64: 2, 1, 384>}, {pipeline_mode = #tpu.pipeline_mode<synchronous>, transform_indices = @transform_10, window_bounds = array<i64: 2, 128, 128>}, {pipeline_mode = #tpu.pipeline_mode<synchronous>, transform_indices = @transform_11, window_bounds = array<i64: 2, 1, 128>}, {pipeline_mode = #tpu.pipeline_mode<synchronous>, transform_indices = @transform_12, window_bounds = array<i64: 2, 128, 256>}, {pipeline_mode = #tpu.pipeline_mode<synchronous>, transform_indices = @transform_13, window_bounds = array<i64: 2, 1, 256>}, {pipeline_mode = #tpu.pipeline_mode<synchronous>, transform_indices = @transform_14, window_bounds = array<i64: 2, 256, 128>}, {pipeline_mode = #tpu.pipeline_mode<synchronous>, transform_indices = @transform_15, window_bounds = array<i64: 2, 1, 128>}, {pipeline_mode = #tpu.pipeline_mode<synchronous>, transform_indices = @transform_16, window_bounds = array<i64: 1, 128>}, {pipeline_mode = #tpu.pipeline_mode<synchronous>, transform_indices = @transform_17, window_bounds = array<i64: 1, 128>}, {pipeline_mode = #tpu.pipeline_mode<synchronous>, transform_indices = @transform_18, window_bounds = array<i64: 128, 128>}, {transform_indices = @transform_19, window_bounds = array<i64: 1, 8, 128>}]} {
    %c0 = arith.constant 0 : index
    %c0_0 = arith.constant 0 : index
    %c0_1 = arith.constant 0 : index
    %0 = vector.load %arg1[%c0, %c0_0, %c0_1] : memref<1x8x128xf32, #tpu.memory_space<vmem>>, vector<1x8x128xf32>
    %1 = vector.shape_cast %0 : vector<1x8x128xf32> to vector<8x128xf32>
    %c0_2 = arith.constant 0 : index
    %c0_3 = arith.constant 0 : index
    %c0_4 = arith.constant 0 : index
    %2 = vector.load %arg2[%c0_2, %c0_3, %c0_4] : memref<1x16x128xf32, #tpu.memory_space<vmem>>, vector<1x16x128xf32>
    %3 = vector.shape_cast %2 : vector<1x16x128xf32> to vector<16x128xf32>
    %4 = arith.truncf %3 : vector<16x128xf32> to vector<16x128xbf16>
    %c0_5 = arith.constant 0 : index
    %c0_6 = arith.constant 0 : index
    %5 = vector.load %arg17[%c0_5, %c0_6] : memref<1x128xf32, #tpu.memory_space<vmem>>, vector<1x128xf32>
    %c0_7 = arith.constant 0 : index
    %c0_8 = arith.constant 0 : index
    %6 = vector.load %arg18[%c0_7, %c0_8] : memref<1x128xf32, #tpu.memory_space<vmem>>, vector<1x128xf32>
    %7 = tpu.iota {dimensions = array<i32: 0>} : vector<8x8xi32>
    %8 = tpu.iota {dimensions = array<i32: 1>} : vector<8x8xi32>
    %9 = arith.cmpi sgt, %8, %7 : vector<8x8xi32>
    %10 = arith.truncf %1 : vector<8x128xf32> to vector<8x128xbf16>
    %c0_9 = arith.constant 0 : index
    %c0_10 = arith.constant 0 : index
    %c0_11 = arith.constant 0 : index
    %11 = vector.load %arg3[%c0_9, %c0_10, %c0_11] : memref<2x128x128xbf16, #tpu.memory_space<vmem>>, vector<1x128x128xbf16>
    %12 = vector.shape_cast %11 : vector<1x128x128xbf16> to vector<128x128xbf16>
    %cst = arith.constant dense<0.000000e+00> : vector<8x128xf32>
    %13 = tpu.matmul %10, %12, %cst {dimension_numbers = #tpu.dot_dimension_numbers<[1], [0], [0], [1], [0, 0, 1, 1], [], []>} : vector<8x128xbf16>, vector<128x128xbf16>, vector<8x128xf32> -> vector<8x128xf32>
    %c0_12 = arith.constant 0 : index
    %c0_13 = arith.constant 0 : index
    %c0_14 = arith.constant 0 : index
    %14 = vector.load %arg4[%c0_12, %c0_13, %c0_14] : memref<2x1x128xf32, #tpu.memory_space<vmem>>, vector<1x1x128xf32>
    %15 = vector.shape_cast %14 : vector<1x1x128xf32> to vector<1x128xf32>
    %16 = vector.broadcast %15 : vector<1x128xf32> to vector<8x128xf32>
    %17 = arith.addf %13, %16 : vector<8x128xf32>
    %c0_15 = arith.constant 0 : index
    %c0_16 = arith.constant 0 : index
    %c0_17 = arith.constant 0 : index
    %18 = vector.load %arg5[%c0_15, %c0_16, %c0_17] : memref<2x128x256xbf16, #tpu.memory_space<vmem>>, vector<1x128x256xbf16>
    %19 = vector.shape_cast %18 : vector<1x128x256xbf16> to vector<128x256xbf16>
    %cst_18 = arith.constant dense<0.000000e+00> : vector<16x256xf32>
    %20 = tpu.matmul %4, %19, %cst_18 {dimension_numbers = #tpu.dot_dimension_numbers<[1], [0], [0], [1], [0, 0, 1, 1], [], []>} : vector<16x128xbf16>, vector<128x256xbf16>, vector<16x256xf32> -> vector<16x256xf32>
    %c0_19 = arith.constant 0 : index
    %c0_20 = arith.constant 0 : index
    %c0_21 = arith.constant 0 : index
    %21 = vector.load %arg6[%c0_19, %c0_20, %c0_21] : memref<2x1x256xf32, #tpu.memory_space<vmem>>, vector<1x1x256xf32>
    %22 = vector.shape_cast %21 : vector<1x1x256xf32> to vector<1x256xf32>
    %23 = vector.broadcast %22 : vector<1x256xf32> to vector<16x256xf32>
    %24 = arith.addf %20, %23 : vector<16x256xf32>
    %25 = vector.extract_strided_slice %24 {offsets = [0, 0], sizes = [16, 128], strides = [1, 1]} : vector<16x256xf32> to vector<16x128xf32>
    %26 = vector.extract_strided_slice %24 {offsets = [0, 128], sizes = [16, 128], strides = [1, 1]} : vector<16x256xf32> to vector<16x128xf32>
    %27 = vector.extract_strided_slice %17 {offsets = [0, 0], sizes = [8, 32], strides = [1, 1]} : vector<8x128xf32> to vector<8x32xf32>
    %28 = vector.extract_strided_slice %25 {offsets = [0, 0], sizes = [16, 32], strides = [1, 1]} : vector<16x128xf32> to vector<16x32xf32>
    %29 = vector.extract_strided_slice %26 {offsets = [0, 0], sizes = [16, 32], strides = [1, 1]} : vector<16x128xf32> to vector<16x32xf32>
    %30 = tpu.transpose %28, [1, 0] : vector<16x32xf32> -> vector<32x16xf32>
    %cst_22 = arith.constant dense<0.000000e+00> : vector<8x16xf32>
    %31 = tpu.matmul %27, %30, %cst_22 {dimension_numbers = #tpu.dot_dimension_numbers<[1], [0], [0], [1], [0, 0, 1, 1], [], []>} : vector<8x32xf32>, vector<32x16xf32>, vector<8x16xf32> -> vector<8x16xf32>
    %cst_23 = arith.constant 0.176776692 : f32
    %32 = vector.broadcast %cst_23 : f32 to vector<8x16xf32>
    %33 = arith.mulf %31, %32 : vector<8x16xf32>
    %cst_24 = arith.constant dense<0xFF800000> : vector<8xf32>
    %34 = vector.multi_reduction <maximumf>, %33, %cst_24 [1] : vector<8x16xf32> to vector<8xf32>
    %35 = vector.shape_cast %34 : vector<8xf32> to vector<8x1xf32>
    %36 = vector.broadcast %35 : vector<8x1xf32> to vector<8x16xf32>
    %37 = arith.subf %33, %36 : vector<8x16xf32>
    %38 = math.exp %37 : vector<8x16xf32>
    %cst_25 = arith.constant dense<0.000000e+00> : vector<8xf32>
    %39 = vector.multi_reduction <add>, %38, %cst_25 [1] : vector<8x16xf32> to vector<8xf32>
    %40 = vector.shape_cast %39 : vector<8xf32> to vector<8x1xf32>
    %41 = tpu.reciprocal %40 {approx = true} : vector<8x1xf32> -> vector<8x1xf32>
    %42 = vector.broadcast %41 : vector<8x1xf32> to vector<8x16xf32>
    %43 = arith.mulf %38, %42 : vector<8x16xf32>
    %cst_26 = arith.constant dense<0.000000e+00> : vector<8x32xf32>
    %44 = tpu.matmul %43, %29, %cst_26 {dimension_numbers = #tpu.dot_dimension_numbers<[1], [0], [0], [1], [0, 0, 1, 1], [], []>} : vector<8x16xf32>, vector<16x32xf32>, vector<8x32xf32> -> vector<8x32xf32>
    %45 = vector.extract_strided_slice %17 {offsets = [0, 32], sizes = [8, 32], strides = [1, 1]} : vector<8x128xf32> to vector<8x32xf32>
    %46 = vector.extract_strided_slice %25 {offsets = [0, 32], sizes = [16, 32], strides = [1, 1]} : vector<16x128xf32> to vector<16x32xf32>
    %47 = vector.extract_strided_slice %26 {offsets = [0, 32], sizes = [16, 32], strides = [1, 1]} : vector<16x128xf32> to vector<16x32xf32>
    %48 = tpu.transpose %46, [1, 0] : vector<16x32xf32> -> vector<32x16xf32>
    %cst_27 = arith.constant dense<0.000000e+00> : vector<8x16xf32>
    %49 = tpu.matmul %45, %48, %cst_27 {dimension_numbers = #tpu.dot_dimension_numbers<[1], [0], [0], [1], [0, 0, 1, 1], [], []>} : vector<8x32xf32>, vector<32x16xf32>, vector<8x16xf32> -> vector<8x16xf32>
    %cst_28 = arith.constant 0.176776692 : f32
    %50 = vector.broadcast %cst_28 : f32 to vector<8x16xf32>
    %51 = arith.mulf %49, %50 : vector<8x16xf32>
    %cst_29 = arith.constant dense<0xFF800000> : vector<8xf32>
    %52 = vector.multi_reduction <maximumf>, %51, %cst_29 [1] : vector<8x16xf32> to vector<8xf32>
    %53 = vector.shape_cast %52 : vector<8xf32> to vector<8x1xf32>
    %54 = vector.broadcast %53 : vector<8x1xf32> to vector<8x16xf32>
    %55 = arith.subf %51, %54 : vector<8x16xf32>
    %56 = math.exp %55 : vector<8x16xf32>
    %cst_30 = arith.constant dense<0.000000e+00> : vector<8xf32>
    %57 = vector.multi_reduction <add>, %56, %cst_30 [1] : vector<8x16xf32> to vector<8xf32>
    %58 = vector.shape_cast %57 : vector<8xf32> to vector<8x1xf32>
    %59 = tpu.reciprocal %58 {approx = true} : vector<8x1xf32> -> vector<8x1xf32>
    %60 = vector.broadcast %59 : vector<8x1xf32> to vector<8x16xf32>
    %61 = arith.mulf %56, %60 : vector<8x16xf32>
    %cst_31 = arith.constant dense<0.000000e+00> : vector<8x32xf32>
    %62 = tpu.matmul %61, %47, %cst_31 {dimension_numbers = #tpu.dot_dimension_numbers<[1], [0], [0], [1], [0, 0, 1, 1], [], []>} : vector<8x16xf32>, vector<16x32xf32>, vector<8x32xf32> -> vector<8x32xf32>
    %63 = vector.extract_strided_slice %17 {offsets = [0, 64], sizes = [8, 32], strides = [1, 1]} : vector<8x128xf32> to vector<8x32xf32>
    %64 = vector.extract_strided_slice %25 {offsets = [0, 64], sizes = [16, 32], strides = [1, 1]} : vector<16x128xf32> to vector<16x32xf32>
    %65 = vector.extract_strided_slice %26 {offsets = [0, 64], sizes = [16, 32], strides = [1, 1]} : vector<16x128xf32> to vector<16x32xf32>
    %66 = tpu.transpose %64, [1, 0] : vector<16x32xf32> -> vector<32x16xf32>
    %cst_32 = arith.constant dense<0.000000e+00> : vector<8x16xf32>
    %67 = tpu.matmul %63, %66, %cst_32 {dimension_numbers = #tpu.dot_dimension_numbers<[1], [0], [0], [1], [0, 0, 1, 1], [], []>} : vector<8x32xf32>, vector<32x16xf32>, vector<8x16xf32> -> vector<8x16xf32>
    %cst_33 = arith.constant 0.176776692 : f32
    %68 = vector.broadcast %cst_33 : f32 to vector<8x16xf32>
    %69 = arith.mulf %67, %68 : vector<8x16xf32>
    %cst_34 = arith.constant dense<0xFF800000> : vector<8xf32>
    %70 = vector.multi_reduction <maximumf>, %69, %cst_34 [1] : vector<8x16xf32> to vector<8xf32>
    %71 = vector.shape_cast %70 : vector<8xf32> to vector<8x1xf32>
    %72 = vector.broadcast %71 : vector<8x1xf32> to vector<8x16xf32>
    %73 = arith.subf %69, %72 : vector<8x16xf32>
    %74 = math.exp %73 : vector<8x16xf32>
    %cst_35 = arith.constant dense<0.000000e+00> : vector<8xf32>
    %75 = vector.multi_reduction <add>, %74, %cst_35 [1] : vector<8x16xf32> to vector<8xf32>
    %76 = vector.shape_cast %75 : vector<8xf32> to vector<8x1xf32>
    %77 = tpu.reciprocal %76 {approx = true} : vector<8x1xf32> -> vector<8x1xf32>
    %78 = vector.broadcast %77 : vector<8x1xf32> to vector<8x16xf32>
    %79 = arith.mulf %74, %78 : vector<8x16xf32>
    %cst_36 = arith.constant dense<0.000000e+00> : vector<8x32xf32>
    %80 = tpu.matmul %79, %65, %cst_36 {dimension_numbers = #tpu.dot_dimension_numbers<[1], [0], [0], [1], [0, 0, 1, 1], [], []>} : vector<8x16xf32>, vector<16x32xf32>, vector<8x32xf32> -> vector<8x32xf32>
    %81 = vector.extract_strided_slice %17 {offsets = [0, 96], sizes = [8, 32], strides = [1, 1]} : vector<8x128xf32> to vector<8x32xf32>
    %82 = vector.extract_strided_slice %25 {offsets = [0, 96], sizes = [16, 32], strides = [1, 1]} : vector<16x128xf32> to vector<16x32xf32>
    %83 = vector.extract_strided_slice %26 {offsets = [0, 96], sizes = [16, 32], strides = [1, 1]} : vector<16x128xf32> to vector<16x32xf32>
    %84 = tpu.transpose %82, [1, 0] : vector<16x32xf32> -> vector<32x16xf32>
    %cst_37 = arith.constant dense<0.000000e+00> : vector<8x16xf32>
    %85 = tpu.matmul %81, %84, %cst_37 {dimension_numbers = #tpu.dot_dimension_numbers<[1], [0], [0], [1], [0, 0, 1, 1], [], []>} : vector<8x32xf32>, vector<32x16xf32>, vector<8x16xf32> -> vector<8x16xf32>
    %cst_38 = arith.constant 0.176776692 : f32
    %86 = vector.broadcast %cst_38 : f32 to vector<8x16xf32>
    %87 = arith.mulf %85, %86 : vector<8x16xf32>
    %cst_39 = arith.constant dense<0xFF800000> : vector<8xf32>
    %88 = vector.multi_reduction <maximumf>, %87, %cst_39 [1] : vector<8x16xf32> to vector<8xf32>
    %89 = vector.shape_cast %88 : vector<8xf32> to vector<8x1xf32>
    %90 = vector.broadcast %89 : vector<8x1xf32> to vector<8x16xf32>
    %91 = arith.subf %87, %90 : vector<8x16xf32>
    %92 = math.exp %91 : vector<8x16xf32>
    %cst_40 = arith.constant dense<0.000000e+00> : vector<8xf32>
    %93 = vector.multi_reduction <add>, %92, %cst_40 [1] : vector<8x16xf32> to vector<8xf32>
    %94 = vector.shape_cast %93 : vector<8xf32> to vector<8x1xf32>
    %95 = tpu.reciprocal %94 {approx = true} : vector<8x1xf32> -> vector<8x1xf32>
    %96 = vector.broadcast %95 : vector<8x1xf32> to vector<8x16xf32>
    %97 = arith.mulf %92, %96 : vector<8x16xf32>
    %cst_41 = arith.constant dense<0.000000e+00> : vector<8x32xf32>
    %98 = tpu.matmul %97, %83, %cst_41 {dimension_numbers = #tpu.dot_dimension_numbers<[1], [0], [0], [1], [0, 0, 1, 1], [], []>} : vector<8x16xf32>, vector<16x32xf32>, vector<8x32xf32> -> vector<8x32xf32>
    %99 = tpu.concatenate %44, %62, %80, %98 in 1 : vector<8x32xf32>, vector<8x32xf32>, vector<8x32xf32>, vector<8x32xf32> -> vector<8x128xf32>
    %100 = arith.truncf %99 : vector<8x128xf32> to vector<8x128xbf16>
    %c0_42 = arith.constant 0 : index
    %c0_43 = arith.constant 0 : index
    %c0_44 = arith.constant 0 : index
    %101 = vector.load %arg7[%c0_42, %c0_43, %c0_44] : memref<2x128x128xbf16, #tpu.memory_space<vmem>>, vector<1x128x128xbf16>
    %102 = vector.shape_cast %101 : vector<1x128x128xbf16> to vector<128x128xbf16>
    %cst_45 = arith.constant dense<0.000000e+00> : vector<8x128xf32>
    %103 = tpu.matmul %100, %102, %cst_45 {dimension_numbers = #tpu.dot_dimension_numbers<[1], [0], [0], [1], [0, 0, 1, 1], [], []>} : vector<8x128xbf16>, vector<128x128xbf16>, vector<8x128xf32> -> vector<8x128xf32>
    %c0_46 = arith.constant 0 : index
    %c0_47 = arith.constant 0 : index
    %c0_48 = arith.constant 0 : index
    %104 = vector.load %arg8[%c0_46, %c0_47, %c0_48] : memref<2x1x128xf32, #tpu.memory_space<vmem>>, vector<1x1x128xf32>
    %105 = vector.shape_cast %104 : vector<1x1x128xf32> to vector<1x128xf32>
    %106 = vector.broadcast %105 : vector<1x128xf32> to vector<8x128xf32>
    %107 = arith.addf %103, %106 : vector<8x128xf32>
    %108 = arith.addf %1, %107 : vector<8x128xf32>
    %cst_49 = arith.constant dense<0.000000e+00> : vector<8xf32>
    %109 = vector.multi_reduction <add>, %108, %cst_49 [1] : vector<8x128xf32> to vector<8xf32>
    %110 = vector.shape_cast %109 : vector<8xf32> to vector<8x1xf32>
    %cst_50 = arith.constant 1.280000e+02 : f32
    %111 = vector.broadcast %cst_50 : f32 to vector<8x1xf32>
    %112 = arith.divf %110, %111 : vector<8x1xf32>
    %113 = vector.broadcast %112 : vector<8x1xf32> to vector<8x128xf32>
    %114 = arith.subf %108, %113 : vector<8x128xf32>
    %115 = arith.mulf %114, %114 : vector<8x128xf32>
    %cst_51 = arith.constant dense<0.000000e+00> : vector<8xf32>
    %116 = vector.multi_reduction <add>, %115, %cst_51 [1] : vector<8x128xf32> to vector<8xf32>
    %117 = vector.shape_cast %116 : vector<8xf32> to vector<8x1xf32>
    %cst_52 = arith.constant 1.280000e+02 : f32
    %118 = vector.broadcast %cst_52 : f32 to vector<8x1xf32>
    %119 = arith.divf %117, %118 : vector<8x1xf32>
    %cst_53 = arith.constant 9.99999974E-6 : f32
    %120 = vector.broadcast %cst_53 : f32 to vector<8x1xf32>
    %121 = arith.addf %119, %120 : vector<8x1xf32>
    %122 = math.rsqrt %121 : vector<8x1xf32>
    %123 = vector.broadcast %122 : vector<8x1xf32> to vector<8x128xf32>
    %124 = arith.mulf %114, %123 : vector<8x128xf32>
    %125 = vector.broadcast %5 : vector<1x128xf32> to vector<8x128xf32>
    %126 = arith.mulf %124, %125 : vector<8x128xf32>
    %127 = vector.broadcast %6 : vector<1x128xf32> to vector<8x128xf32>
    %128 = arith.addf %126, %127 : vector<8x128xf32>
    %129 = arith.truncf %128 : vector<8x128xf32> to vector<8x128xbf16>
    %c0_54 = arith.constant 0 : index
    %c0_55 = arith.constant 0 : index
    %c0_56 = arith.constant 0 : index
    %130 = vector.load %arg9[%c0_54, %c0_55, %c0_56] : memref<2x128x384xbf16, #tpu.memory_space<vmem>>, vector<1x128x384xbf16>
    %131 = vector.shape_cast %130 : vector<1x128x384xbf16> to vector<128x384xbf16>
    %cst_57 = arith.constant dense<0.000000e+00> : vector<8x384xf32>
    %132 = tpu.matmul %129, %131, %cst_57 {dimension_numbers = #tpu.dot_dimension_numbers<[1], [0], [0], [1], [0, 0, 1, 1], [], []>} : vector<8x128xbf16>, vector<128x384xbf16>, vector<8x384xf32> -> vector<8x384xf32>
    %c0_58 = arith.constant 0 : index
    %c0_59 = arith.constant 0 : index
    %c0_60 = arith.constant 0 : index
    %133 = vector.load %arg10[%c0_58, %c0_59, %c0_60] : memref<2x1x384xf32, #tpu.memory_space<vmem>>, vector<1x1x384xf32>
    %134 = vector.shape_cast %133 : vector<1x1x384xf32> to vector<1x384xf32>
    %135 = vector.broadcast %134 : vector<1x384xf32> to vector<8x384xf32>
    %136 = arith.addf %132, %135 : vector<8x384xf32>
    %137 = vector.extract_strided_slice %136 {offsets = [0, 0], sizes = [8, 128], strides = [1, 1]} : vector<8x384xf32> to vector<8x128xf32>
    %138 = vector.extract_strided_slice %136 {offsets = [0, 128], sizes = [8, 128], strides = [1, 1]} : vector<8x384xf32> to vector<8x128xf32>
    %139 = vector.extract_strided_slice %136 {offsets = [0, 256], sizes = [8, 128], strides = [1, 1]} : vector<8x384xf32> to vector<8x128xf32>
    %140 = vector.extract_strided_slice %137 {offsets = [0, 0], sizes = [8, 32], strides = [1, 1]} : vector<8x128xf32> to vector<8x32xf32>
    %141 = vector.extract_strided_slice %138 {offsets = [0, 0], sizes = [8, 32], strides = [1, 1]} : vector<8x128xf32> to vector<8x32xf32>
    %142 = vector.extract_strided_slice %139 {offsets = [0, 0], sizes = [8, 32], strides = [1, 1]} : vector<8x128xf32> to vector<8x32xf32>
    %143 = tpu.transpose %141, [1, 0] : vector<8x32xf32> -> vector<32x8xf32>
    %cst_61 = arith.constant dense<0.000000e+00> : vector<8x8xf32>
    %144 = tpu.matmul %140, %143, %cst_61 {dimension_numbers = #tpu.dot_dimension_numbers<[1], [0], [0], [1], [0, 0, 1, 1], [], []>} : vector<8x32xf32>, vector<32x8xf32>, vector<8x8xf32> -> vector<8x8xf32>
    %cst_62 = arith.constant 0.176776692 : f32
    %145 = vector.broadcast %cst_62 : f32 to vector<8x8xf32>
    %146 = arith.mulf %144, %145 : vector<8x8xf32>
    %cst_63 = arith.constant -1.000000e+30 : f32
    %147 = vector.broadcast %cst_63 : f32 to vector<8x8xf32>
    %148 = arith.select %9, %147, %146 : vector<8x8xi1>, vector<8x8xf32>
    %cst_64 = arith.constant dense<0xFF800000> : vector<8xf32>
    %149 = vector.multi_reduction <maximumf>, %148, %cst_64 [1] : vector<8x8xf32> to vector<8xf32>
    %150 = vector.shape_cast %149 : vector<8xf32> to vector<8x1xf32>
    %151 = vector.broadcast %150 : vector<8x1xf32> to vector<8x8xf32>
    %152 = arith.subf %148, %151 : vector<8x8xf32>
    %153 = math.exp %152 : vector<8x8xf32>
    %cst_65 = arith.constant dense<0.000000e+00> : vector<8xf32>
    %154 = vector.multi_reduction <add>, %153, %cst_65 [1] : vector<8x8xf32> to vector<8xf32>
    %155 = vector.shape_cast %154 : vector<8xf32> to vector<8x1xf32>
    %156 = tpu.reciprocal %155 {approx = true} : vector<8x1xf32> -> vector<8x1xf32>
    %157 = vector.broadcast %156 : vector<8x1xf32> to vector<8x8xf32>
    %158 = arith.mulf %153, %157 : vector<8x8xf32>
    %cst_66 = arith.constant dense<0.000000e+00> : vector<8x32xf32>
    %159 = tpu.matmul %158, %142, %cst_66 {dimension_numbers = #tpu.dot_dimension_numbers<[1], [0], [0], [1], [0, 0, 1, 1], [], []>} : vector<8x8xf32>, vector<8x32xf32>, vector<8x32xf32> -> vector<8x32xf32>
    %160 = vector.extract_strided_slice %137 {offsets = [0, 32], sizes = [8, 32], strides = [1, 1]} : vector<8x128xf32> to vector<8x32xf32>
    %161 = vector.extract_strided_slice %138 {offsets = [0, 32], sizes = [8, 32], strides = [1, 1]} : vector<8x128xf32> to vector<8x32xf32>
    %162 = vector.extract_strided_slice %139 {offsets = [0, 32], sizes = [8, 32], strides = [1, 1]} : vector<8x128xf32> to vector<8x32xf32>
    %163 = tpu.transpose %161, [1, 0] : vector<8x32xf32> -> vector<32x8xf32>
    %cst_67 = arith.constant dense<0.000000e+00> : vector<8x8xf32>
    %164 = tpu.matmul %160, %163, %cst_67 {dimension_numbers = #tpu.dot_dimension_numbers<[1], [0], [0], [1], [0, 0, 1, 1], [], []>} : vector<8x32xf32>, vector<32x8xf32>, vector<8x8xf32> -> vector<8x8xf32>
    %cst_68 = arith.constant 0.176776692 : f32
    %165 = vector.broadcast %cst_68 : f32 to vector<8x8xf32>
    %166 = arith.mulf %164, %165 : vector<8x8xf32>
    %cst_69 = arith.constant -1.000000e+30 : f32
    %167 = vector.broadcast %cst_69 : f32 to vector<8x8xf32>
    %168 = arith.select %9, %167, %166 : vector<8x8xi1>, vector<8x8xf32>
    %cst_70 = arith.constant dense<0xFF800000> : vector<8xf32>
    %169 = vector.multi_reduction <maximumf>, %168, %cst_70 [1] : vector<8x8xf32> to vector<8xf32>
    %170 = vector.shape_cast %169 : vector<8xf32> to vector<8x1xf32>
    %171 = vector.broadcast %170 : vector<8x1xf32> to vector<8x8xf32>
    %172 = arith.subf %168, %171 : vector<8x8xf32>
    %173 = math.exp %172 : vector<8x8xf32>
    %cst_71 = arith.constant dense<0.000000e+00> : vector<8xf32>
    %174 = vector.multi_reduction <add>, %173, %cst_71 [1] : vector<8x8xf32> to vector<8xf32>
    %175 = vector.shape_cast %174 : vector<8xf32> to vector<8x1xf32>
    %176 = tpu.reciprocal %175 {approx = true} : vector<8x1xf32> -> vector<8x1xf32>
    %177 = vector.broadcast %176 : vector<8x1xf32> to vector<8x8xf32>
    %178 = arith.mulf %173, %177 : vector<8x8xf32>
    %cst_72 = arith.constant dense<0.000000e+00> : vector<8x32xf32>
    %179 = tpu.matmul %178, %162, %cst_72 {dimension_numbers = #tpu.dot_dimension_numbers<[1], [0], [0], [1], [0, 0, 1, 1], [], []>} : vector<8x8xf32>, vector<8x32xf32>, vector<8x32xf32> -> vector<8x32xf32>
    %180 = vector.extract_strided_slice %137 {offsets = [0, 64], sizes = [8, 32], strides = [1, 1]} : vector<8x128xf32> to vector<8x32xf32>
    %181 = vector.extract_strided_slice %138 {offsets = [0, 64], sizes = [8, 32], strides = [1, 1]} : vector<8x128xf32> to vector<8x32xf32>
    %182 = vector.extract_strided_slice %139 {offsets = [0, 64], sizes = [8, 32], strides = [1, 1]} : vector<8x128xf32> to vector<8x32xf32>
    %183 = tpu.transpose %181, [1, 0] : vector<8x32xf32> -> vector<32x8xf32>
    %cst_73 = arith.constant dense<0.000000e+00> : vector<8x8xf32>
    %184 = tpu.matmul %180, %183, %cst_73 {dimension_numbers = #tpu.dot_dimension_numbers<[1], [0], [0], [1], [0, 0, 1, 1], [], []>} : vector<8x32xf32>, vector<32x8xf32>, vector<8x8xf32> -> vector<8x8xf32>
    %cst_74 = arith.constant 0.176776692 : f32
    %185 = vector.broadcast %cst_74 : f32 to vector<8x8xf32>
    %186 = arith.mulf %184, %185 : vector<8x8xf32>
    %cst_75 = arith.constant -1.000000e+30 : f32
    %187 = vector.broadcast %cst_75 : f32 to vector<8x8xf32>
    %188 = arith.select %9, %187, %186 : vector<8x8xi1>, vector<8x8xf32>
    %cst_76 = arith.constant dense<0xFF800000> : vector<8xf32>
    %189 = vector.multi_reduction <maximumf>, %188, %cst_76 [1] : vector<8x8xf32> to vector<8xf32>
    %190 = vector.shape_cast %189 : vector<8xf32> to vector<8x1xf32>
    %191 = vector.broadcast %190 : vector<8x1xf32> to vector<8x8xf32>
    %192 = arith.subf %188, %191 : vector<8x8xf32>
    %193 = math.exp %192 : vector<8x8xf32>
    %cst_77 = arith.constant dense<0.000000e+00> : vector<8xf32>
    %194 = vector.multi_reduction <add>, %193, %cst_77 [1] : vector<8x8xf32> to vector<8xf32>
    %195 = vector.shape_cast %194 : vector<8xf32> to vector<8x1xf32>
    %196 = tpu.reciprocal %195 {approx = true} : vector<8x1xf32> -> vector<8x1xf32>
    %197 = vector.broadcast %196 : vector<8x1xf32> to vector<8x8xf32>
    %198 = arith.mulf %193, %197 : vector<8x8xf32>
    %cst_78 = arith.constant dense<0.000000e+00> : vector<8x32xf32>
    %199 = tpu.matmul %198, %182, %cst_78 {dimension_numbers = #tpu.dot_dimension_numbers<[1], [0], [0], [1], [0, 0, 1, 1], [], []>} : vector<8x8xf32>, vector<8x32xf32>, vector<8x32xf32> -> vector<8x32xf32>
    %200 = vector.extract_strided_slice %137 {offsets = [0, 96], sizes = [8, 32], strides = [1, 1]} : vector<8x128xf32> to vector<8x32xf32>
    %201 = vector.extract_strided_slice %138 {offsets = [0, 96], sizes = [8, 32], strides = [1, 1]} : vector<8x128xf32> to vector<8x32xf32>
    %202 = vector.extract_strided_slice %139 {offsets = [0, 96], sizes = [8, 32], strides = [1, 1]} : vector<8x128xf32> to vector<8x32xf32>
    %203 = tpu.transpose %201, [1, 0] : vector<8x32xf32> -> vector<32x8xf32>
    %cst_79 = arith.constant dense<0.000000e+00> : vector<8x8xf32>
    %204 = tpu.matmul %200, %203, %cst_79 {dimension_numbers = #tpu.dot_dimension_numbers<[1], [0], [0], [1], [0, 0, 1, 1], [], []>} : vector<8x32xf32>, vector<32x8xf32>, vector<8x8xf32> -> vector<8x8xf32>
    %cst_80 = arith.constant 0.176776692 : f32
    %205 = vector.broadcast %cst_80 : f32 to vector<8x8xf32>
    %206 = arith.mulf %204, %205 : vector<8x8xf32>
    %cst_81 = arith.constant -1.000000e+30 : f32
    %207 = vector.broadcast %cst_81 : f32 to vector<8x8xf32>
    %208 = arith.select %9, %207, %206 : vector<8x8xi1>, vector<8x8xf32>
    %cst_82 = arith.constant dense<0xFF800000> : vector<8xf32>
    %209 = vector.multi_reduction <maximumf>, %208, %cst_82 [1] : vector<8x8xf32> to vector<8xf32>
    %210 = vector.shape_cast %209 : vector<8xf32> to vector<8x1xf32>
    %211 = vector.broadcast %210 : vector<8x1xf32> to vector<8x8xf32>
    %212 = arith.subf %208, %211 : vector<8x8xf32>
    %213 = math.exp %212 : vector<8x8xf32>
    %cst_83 = arith.constant dense<0.000000e+00> : vector<8xf32>
    %214 = vector.multi_reduction <add>, %213, %cst_83 [1] : vector<8x8xf32> to vector<8xf32>
    %215 = vector.shape_cast %214 : vector<8xf32> to vector<8x1xf32>
    %216 = tpu.reciprocal %215 {approx = true} : vector<8x1xf32> -> vector<8x1xf32>
    %217 = vector.broadcast %216 : vector<8x1xf32> to vector<8x8xf32>
    %218 = arith.mulf %213, %217 : vector<8x8xf32>
    %cst_84 = arith.constant dense<0.000000e+00> : vector<8x32xf32>
    %219 = tpu.matmul %218, %202, %cst_84 {dimension_numbers = #tpu.dot_dimension_numbers<[1], [0], [0], [1], [0, 0, 1, 1], [], []>} : vector<8x8xf32>, vector<8x32xf32>, vector<8x32xf32> -> vector<8x32xf32>
    %220 = tpu.concatenate %159, %179, %199, %219 in 1 : vector<8x32xf32>, vector<8x32xf32>, vector<8x32xf32>, vector<8x32xf32> -> vector<8x128xf32>
    %221 = arith.truncf %220 : vector<8x128xf32> to vector<8x128xbf16>
    %c0_85 = arith.constant 0 : index
    %c0_86 = arith.constant 0 : index
    %c0_87 = arith.constant 0 : index
    %222 = vector.load %arg11[%c0_85, %c0_86, %c0_87] : memref<2x128x128xbf16, #tpu.memory_space<vmem>>, vector<1x128x128xbf16>
    %223 = vector.shape_cast %222 : vector<1x128x128xbf16> to vector<128x128xbf16>
    %cst_88 = arith.constant dense<0.000000e+00> : vector<8x128xf32>
    %224 = tpu.matmul %221, %223, %cst_88 {dimension_numbers = #tpu.dot_dimension_numbers<[1], [0], [0], [1], [0, 0, 1, 1], [], []>} : vector<8x128xbf16>, vector<128x128xbf16>, vector<8x128xf32> -> vector<8x128xf32>
    %c0_89 = arith.constant 0 : index
    %c0_90 = arith.constant 0 : index
    %c0_91 = arith.constant 0 : index
    %225 = vector.load %arg12[%c0_89, %c0_90, %c0_91] : memref<2x1x128xf32, #tpu.memory_space<vmem>>, vector<1x1x128xf32>
    %226 = vector.shape_cast %225 : vector<1x1x128xf32> to vector<1x128xf32>
    %227 = vector.broadcast %226 : vector<1x128xf32> to vector<8x128xf32>
    %228 = arith.addf %224, %227 : vector<8x128xf32>
    %229 = arith.addf %128, %228 : vector<8x128xf32>
    %cst_92 = arith.constant dense<0.000000e+00> : vector<8xf32>
    %230 = vector.multi_reduction <add>, %229, %cst_92 [1] : vector<8x128xf32> to vector<8xf32>
    %231 = vector.shape_cast %230 : vector<8xf32> to vector<8x1xf32>
    %cst_93 = arith.constant 1.280000e+02 : f32
    %232 = vector.broadcast %cst_93 : f32 to vector<8x1xf32>
    %233 = arith.divf %231, %232 : vector<8x1xf32>
    %234 = vector.broadcast %233 : vector<8x1xf32> to vector<8x128xf32>
    %235 = arith.subf %229, %234 : vector<8x128xf32>
    %236 = arith.mulf %235, %235 : vector<8x128xf32>
    %cst_94 = arith.constant dense<0.000000e+00> : vector<8xf32>
    %237 = vector.multi_reduction <add>, %236, %cst_94 [1] : vector<8x128xf32> to vector<8xf32>
    %238 = vector.shape_cast %237 : vector<8xf32> to vector<8x1xf32>
    %cst_95 = arith.constant 1.280000e+02 : f32
    %239 = vector.broadcast %cst_95 : f32 to vector<8x1xf32>
    %240 = arith.divf %238, %239 : vector<8x1xf32>
    %cst_96 = arith.constant 9.99999974E-6 : f32
    %241 = vector.broadcast %cst_96 : f32 to vector<8x1xf32>
    %242 = arith.addf %240, %241 : vector<8x1xf32>
    %243 = math.rsqrt %242 : vector<8x1xf32>
    %244 = vector.broadcast %243 : vector<8x1xf32> to vector<8x128xf32>
    %245 = arith.mulf %235, %244 : vector<8x128xf32>
    %246 = vector.broadcast %5 : vector<1x128xf32> to vector<8x128xf32>
    %247 = arith.mulf %245, %246 : vector<8x128xf32>
    %248 = vector.broadcast %6 : vector<1x128xf32> to vector<8x128xf32>
    %249 = arith.addf %247, %248 : vector<8x128xf32>
    %250 = arith.truncf %249 : vector<8x128xf32> to vector<8x128xbf16>
    %c0_97 = arith.constant 0 : index
    %c0_98 = arith.constant 0 : index
    %c0_99 = arith.constant 0 : index
    %251 = vector.load %arg13[%c0_97, %c0_98, %c0_99] : memref<2x128x256xbf16, #tpu.memory_space<vmem>>, vector<1x128x256xbf16>
    %252 = vector.shape_cast %251 : vector<1x128x256xbf16> to vector<128x256xbf16>
    %cst_100 = arith.constant dense<0.000000e+00> : vector<8x256xf32>
    %253 = tpu.matmul %250, %252, %cst_100 {dimension_numbers = #tpu.dot_dimension_numbers<[1], [0], [0], [1], [0, 0, 1, 1], [], []>} : vector<8x128xbf16>, vector<128x256xbf16>, vector<8x256xf32> -> vector<8x256xf32>
    %c0_101 = arith.constant 0 : index
    %c0_102 = arith.constant 0 : index
    %c0_103 = arith.constant 0 : index
    %254 = vector.load %arg14[%c0_101, %c0_102, %c0_103] : memref<2x1x256xf32, #tpu.memory_space<vmem>>, vector<1x1x256xf32>
    %255 = vector.shape_cast %254 : vector<1x1x256xf32> to vector<1x256xf32>
    %256 = vector.broadcast %255 : vector<1x256xf32> to vector<8x256xf32>
    %257 = arith.addf %253, %256 : vector<8x256xf32>
    %cst_104 = arith.constant 0.000000e+00 : f32
    %258 = vector.broadcast %cst_104 : f32 to vector<8x256xf32>
    %259 = arith.maximumf %257, %258 : vector<8x256xf32>
    %260 = arith.truncf %259 : vector<8x256xf32> to vector<8x256xbf16>
    %c0_105 = arith.constant 0 : index
    %c0_106 = arith.constant 0 : index
    %c0_107 = arith.constant 0 : index
    %261 = vector.load %arg15[%c0_105, %c0_106, %c0_107] : memref<2x256x128xbf16, #tpu.memory_space<vmem>>, vector<1x256x128xbf16>
    %262 = vector.shape_cast %261 : vector<1x256x128xbf16> to vector<256x128xbf16>
    %cst_108 = arith.constant dense<0.000000e+00> : vector<8x128xf32>
    %263 = tpu.matmul %260, %262, %cst_108 {dimension_numbers = #tpu.dot_dimension_numbers<[1], [0], [0], [1], [0, 0, 1, 1], [], []>} : vector<8x256xbf16>, vector<256x128xbf16>, vector<8x128xf32> -> vector<8x128xf32>
    %c0_109 = arith.constant 0 : index
    %c0_110 = arith.constant 0 : index
    %c0_111 = arith.constant 0 : index
    %264 = vector.load %arg16[%c0_109, %c0_110, %c0_111] : memref<2x1x128xf32, #tpu.memory_space<vmem>>, vector<1x1x128xf32>
    %265 = vector.shape_cast %264 : vector<1x1x128xf32> to vector<1x128xf32>
    %266 = vector.broadcast %265 : vector<1x128xf32> to vector<8x128xf32>
    %267 = arith.addf %263, %266 : vector<8x128xf32>
    %cst_112 = arith.constant 0.000000e+00 : f32
    %268 = vector.broadcast %cst_112 : f32 to vector<8x128xf32>
    %269 = arith.maximumf %267, %268 : vector<8x128xf32>
    %270 = arith.addf %249, %269 : vector<8x128xf32>
    %cst_113 = arith.constant dense<0.000000e+00> : vector<8xf32>
    %271 = vector.multi_reduction <add>, %270, %cst_113 [1] : vector<8x128xf32> to vector<8xf32>
    %272 = vector.shape_cast %271 : vector<8xf32> to vector<8x1xf32>
    %cst_114 = arith.constant 1.280000e+02 : f32
    %273 = vector.broadcast %cst_114 : f32 to vector<8x1xf32>
    %274 = arith.divf %272, %273 : vector<8x1xf32>
    %275 = vector.broadcast %274 : vector<8x1xf32> to vector<8x128xf32>
    %276 = arith.subf %270, %275 : vector<8x128xf32>
    %277 = arith.mulf %276, %276 : vector<8x128xf32>
    %cst_115 = arith.constant dense<0.000000e+00> : vector<8xf32>
    %278 = vector.multi_reduction <add>, %277, %cst_115 [1] : vector<8x128xf32> to vector<8xf32>
    %279 = vector.shape_cast %278 : vector<8xf32> to vector<8x1xf32>
    %cst_116 = arith.constant 1.280000e+02 : f32
    %280 = vector.broadcast %cst_116 : f32 to vector<8x1xf32>
    %281 = arith.divf %279, %280 : vector<8x1xf32>
    %cst_117 = arith.constant 9.99999974E-6 : f32
    %282 = vector.broadcast %cst_117 : f32 to vector<8x1xf32>
    %283 = arith.addf %281, %282 : vector<8x1xf32>
    %284 = math.rsqrt %283 : vector<8x1xf32>
    %285 = vector.broadcast %284 : vector<8x1xf32> to vector<8x128xf32>
    %286 = arith.mulf %276, %285 : vector<8x128xf32>
    %287 = vector.broadcast %5 : vector<1x128xf32> to vector<8x128xf32>
    %288 = arith.mulf %286, %287 : vector<8x128xf32>
    %289 = vector.broadcast %6 : vector<1x128xf32> to vector<8x128xf32>
    %290 = arith.addf %288, %289 : vector<8x128xf32>
    %291 = arith.truncf %290 : vector<8x128xf32> to vector<8x128xbf16>
    %c1 = arith.constant 1 : index
    %c0_118 = arith.constant 0 : index
    %c0_119 = arith.constant 0 : index
    %292 = vector.load %arg3[%c1, %c0_118, %c0_119] : memref<2x128x128xbf16, #tpu.memory_space<vmem>>, vector<1x128x128xbf16>
    %293 = vector.shape_cast %292 : vector<1x128x128xbf16> to vector<128x128xbf16>
    %cst_120 = arith.constant dense<0.000000e+00> : vector<8x128xf32>
    %294 = tpu.matmul %291, %293, %cst_120 {dimension_numbers = #tpu.dot_dimension_numbers<[1], [0], [0], [1], [0, 0, 1, 1], [], []>} : vector<8x128xbf16>, vector<128x128xbf16>, vector<8x128xf32> -> vector<8x128xf32>
    %c1_121 = arith.constant 1 : index
    %c0_122 = arith.constant 0 : index
    %c0_123 = arith.constant 0 : index
    %295 = vector.load %arg4[%c1_121, %c0_122, %c0_123] : memref<2x1x128xf32, #tpu.memory_space<vmem>>, vector<1x1x128xf32>
    %296 = vector.shape_cast %295 : vector<1x1x128xf32> to vector<1x128xf32>
    %297 = vector.broadcast %296 : vector<1x128xf32> to vector<8x128xf32>
    %298 = arith.addf %294, %297 : vector<8x128xf32>
    %c1_124 = arith.constant 1 : index
    %c0_125 = arith.constant 0 : index
    %c0_126 = arith.constant 0 : index
    %299 = vector.load %arg5[%c1_124, %c0_125, %c0_126] : memref<2x128x256xbf16, #tpu.memory_space<vmem>>, vector<1x128x256xbf16>
    %300 = vector.shape_cast %299 : vector<1x128x256xbf16> to vector<128x256xbf16>
    %cst_127 = arith.constant dense<0.000000e+00> : vector<16x256xf32>
    %301 = tpu.matmul %4, %300, %cst_127 {dimension_numbers = #tpu.dot_dimension_numbers<[1], [0], [0], [1], [0, 0, 1, 1], [], []>} : vector<16x128xbf16>, vector<128x256xbf16>, vector<16x256xf32> -> vector<16x256xf32>
    %c1_128 = arith.constant 1 : index
    %c0_129 = arith.constant 0 : index
    %c0_130 = arith.constant 0 : index
    %302 = vector.load %arg6[%c1_128, %c0_129, %c0_130] : memref<2x1x256xf32, #tpu.memory_space<vmem>>, vector<1x1x256xf32>
    %303 = vector.shape_cast %302 : vector<1x1x256xf32> to vector<1x256xf32>
    %304 = vector.broadcast %303 : vector<1x256xf32> to vector<16x256xf32>
    %305 = arith.addf %301, %304 : vector<16x256xf32>
    %306 = vector.extract_strided_slice %305 {offsets = [0, 0], sizes = [16, 128], strides = [1, 1]} : vector<16x256xf32> to vector<16x128xf32>
    %307 = vector.extract_strided_slice %305 {offsets = [0, 128], sizes = [16, 128], strides = [1, 1]} : vector<16x256xf32> to vector<16x128xf32>
    %308 = vector.extract_strided_slice %298 {offsets = [0, 0], sizes = [8, 32], strides = [1, 1]} : vector<8x128xf32> to vector<8x32xf32>
    %309 = vector.extract_strided_slice %306 {offsets = [0, 0], sizes = [16, 32], strides = [1, 1]} : vector<16x128xf32> to vector<16x32xf32>
    %310 = vector.extract_strided_slice %307 {offsets = [0, 0], sizes = [16, 32], strides = [1, 1]} : vector<16x128xf32> to vector<16x32xf32>
    %311 = tpu.transpose %309, [1, 0] : vector<16x32xf32> -> vector<32x16xf32>
    %cst_131 = arith.constant dense<0.000000e+00> : vector<8x16xf32>
    %312 = tpu.matmul %308, %311, %cst_131 {dimension_numbers = #tpu.dot_dimension_numbers<[1], [0], [0], [1], [0, 0, 1, 1], [], []>} : vector<8x32xf32>, vector<32x16xf32>, vector<8x16xf32> -> vector<8x16xf32>
    %cst_132 = arith.constant 0.176776692 : f32
    %313 = vector.broadcast %cst_132 : f32 to vector<8x16xf32>
    %314 = arith.mulf %312, %313 : vector<8x16xf32>
    %cst_133 = arith.constant dense<0xFF800000> : vector<8xf32>
    %315 = vector.multi_reduction <maximumf>, %314, %cst_133 [1] : vector<8x16xf32> to vector<8xf32>
    %316 = vector.shape_cast %315 : vector<8xf32> to vector<8x1xf32>
    %317 = vector.broadcast %316 : vector<8x1xf32> to vector<8x16xf32>
    %318 = arith.subf %314, %317 : vector<8x16xf32>
    %319 = math.exp %318 : vector<8x16xf32>
    %cst_134 = arith.constant dense<0.000000e+00> : vector<8xf32>
    %320 = vector.multi_reduction <add>, %319, %cst_134 [1] : vector<8x16xf32> to vector<8xf32>
    %321 = vector.shape_cast %320 : vector<8xf32> to vector<8x1xf32>
    %322 = tpu.reciprocal %321 {approx = true} : vector<8x1xf32> -> vector<8x1xf32>
    %323 = vector.broadcast %322 : vector<8x1xf32> to vector<8x16xf32>
    %324 = arith.mulf %319, %323 : vector<8x16xf32>
    %cst_135 = arith.constant dense<0.000000e+00> : vector<8x32xf32>
    %325 = tpu.matmul %324, %310, %cst_135 {dimension_numbers = #tpu.dot_dimension_numbers<[1], [0], [0], [1], [0, 0, 1, 1], [], []>} : vector<8x16xf32>, vector<16x32xf32>, vector<8x32xf32> -> vector<8x32xf32>
    %326 = vector.extract_strided_slice %298 {offsets = [0, 32], sizes = [8, 32], strides = [1, 1]} : vector<8x128xf32> to vector<8x32xf32>
    %327 = vector.extract_strided_slice %306 {offsets = [0, 32], sizes = [16, 32], strides = [1, 1]} : vector<16x128xf32> to vector<16x32xf32>
    %328 = vector.extract_strided_slice %307 {offsets = [0, 32], sizes = [16, 32], strides = [1, 1]} : vector<16x128xf32> to vector<16x32xf32>
    %329 = tpu.transpose %327, [1, 0] : vector<16x32xf32> -> vector<32x16xf32>
    %cst_136 = arith.constant dense<0.000000e+00> : vector<8x16xf32>
    %330 = tpu.matmul %326, %329, %cst_136 {dimension_numbers = #tpu.dot_dimension_numbers<[1], [0], [0], [1], [0, 0, 1, 1], [], []>} : vector<8x32xf32>, vector<32x16xf32>, vector<8x16xf32> -> vector<8x16xf32>
    %cst_137 = arith.constant 0.176776692 : f32
    %331 = vector.broadcast %cst_137 : f32 to vector<8x16xf32>
    %332 = arith.mulf %330, %331 : vector<8x16xf32>
    %cst_138 = arith.constant dense<0xFF800000> : vector<8xf32>
    %333 = vector.multi_reduction <maximumf>, %332, %cst_138 [1] : vector<8x16xf32> to vector<8xf32>
    %334 = vector.shape_cast %333 : vector<8xf32> to vector<8x1xf32>
    %335 = vector.broadcast %334 : vector<8x1xf32> to vector<8x16xf32>
    %336 = arith.subf %332, %335 : vector<8x16xf32>
    %337 = math.exp %336 : vector<8x16xf32>
    %cst_139 = arith.constant dense<0.000000e+00> : vector<8xf32>
    %338 = vector.multi_reduction <add>, %337, %cst_139 [1] : vector<8x16xf32> to vector<8xf32>
    %339 = vector.shape_cast %338 : vector<8xf32> to vector<8x1xf32>
    %340 = tpu.reciprocal %339 {approx = true} : vector<8x1xf32> -> vector<8x1xf32>
    %341 = vector.broadcast %340 : vector<8x1xf32> to vector<8x16xf32>
    %342 = arith.mulf %337, %341 : vector<8x16xf32>
    %cst_140 = arith.constant dense<0.000000e+00> : vector<8x32xf32>
    %343 = tpu.matmul %342, %328, %cst_140 {dimension_numbers = #tpu.dot_dimension_numbers<[1], [0], [0], [1], [0, 0, 1, 1], [], []>} : vector<8x16xf32>, vector<16x32xf32>, vector<8x32xf32> -> vector<8x32xf32>
    %344 = vector.extract_strided_slice %298 {offsets = [0, 64], sizes = [8, 32], strides = [1, 1]} : vector<8x128xf32> to vector<8x32xf32>
    %345 = vector.extract_strided_slice %306 {offsets = [0, 64], sizes = [16, 32], strides = [1, 1]} : vector<16x128xf32> to vector<16x32xf32>
    %346 = vector.extract_strided_slice %307 {offsets = [0, 64], sizes = [16, 32], strides = [1, 1]} : vector<16x128xf32> to vector<16x32xf32>
    %347 = tpu.transpose %345, [1, 0] : vector<16x32xf32> -> vector<32x16xf32>
    %cst_141 = arith.constant dense<0.000000e+00> : vector<8x16xf32>
    %348 = tpu.matmul %344, %347, %cst_141 {dimension_numbers = #tpu.dot_dimension_numbers<[1], [0], [0], [1], [0, 0, 1, 1], [], []>} : vector<8x32xf32>, vector<32x16xf32>, vector<8x16xf32> -> vector<8x16xf32>
    %cst_142 = arith.constant 0.176776692 : f32
    %349 = vector.broadcast %cst_142 : f32 to vector<8x16xf32>
    %350 = arith.mulf %348, %349 : vector<8x16xf32>
    %cst_143 = arith.constant dense<0xFF800000> : vector<8xf32>
    %351 = vector.multi_reduction <maximumf>, %350, %cst_143 [1] : vector<8x16xf32> to vector<8xf32>
    %352 = vector.shape_cast %351 : vector<8xf32> to vector<8x1xf32>
    %353 = vector.broadcast %352 : vector<8x1xf32> to vector<8x16xf32>
    %354 = arith.subf %350, %353 : vector<8x16xf32>
    %355 = math.exp %354 : vector<8x16xf32>
    %cst_144 = arith.constant dense<0.000000e+00> : vector<8xf32>
    %356 = vector.multi_reduction <add>, %355, %cst_144 [1] : vector<8x16xf32> to vector<8xf32>
    %357 = vector.shape_cast %356 : vector<8xf32> to vector<8x1xf32>
    %358 = tpu.reciprocal %357 {approx = true} : vector<8x1xf32> -> vector<8x1xf32>
    %359 = vector.broadcast %358 : vector<8x1xf32> to vector<8x16xf32>
    %360 = arith.mulf %355, %359 : vector<8x16xf32>
    %cst_145 = arith.constant dense<0.000000e+00> : vector<8x32xf32>
    %361 = tpu.matmul %360, %346, %cst_145 {dimension_numbers = #tpu.dot_dimension_numbers<[1], [0], [0], [1], [0, 0, 1, 1], [], []>} : vector<8x16xf32>, vector<16x32xf32>, vector<8x32xf32> -> vector<8x32xf32>
    %362 = vector.extract_strided_slice %298 {offsets = [0, 96], sizes = [8, 32], strides = [1, 1]} : vector<8x128xf32> to vector<8x32xf32>
    %363 = vector.extract_strided_slice %306 {offsets = [0, 96], sizes = [16, 32], strides = [1, 1]} : vector<16x128xf32> to vector<16x32xf32>
    %364 = vector.extract_strided_slice %307 {offsets = [0, 96], sizes = [16, 32], strides = [1, 1]} : vector<16x128xf32> to vector<16x32xf32>
    %365 = tpu.transpose %363, [1, 0] : vector<16x32xf32> -> vector<32x16xf32>
    %cst_146 = arith.constant dense<0.000000e+00> : vector<8x16xf32>
    %366 = tpu.matmul %362, %365, %cst_146 {dimension_numbers = #tpu.dot_dimension_numbers<[1], [0], [0], [1], [0, 0, 1, 1], [], []>} : vector<8x32xf32>, vector<32x16xf32>, vector<8x16xf32> -> vector<8x16xf32>
    %cst_147 = arith.constant 0.176776692 : f32
    %367 = vector.broadcast %cst_147 : f32 to vector<8x16xf32>
    %368 = arith.mulf %366, %367 : vector<8x16xf32>
    %cst_148 = arith.constant dense<0xFF800000> : vector<8xf32>
    %369 = vector.multi_reduction <maximumf>, %368, %cst_148 [1] : vector<8x16xf32> to vector<8xf32>
    %370 = vector.shape_cast %369 : vector<8xf32> to vector<8x1xf32>
    %371 = vector.broadcast %370 : vector<8x1xf32> to vector<8x16xf32>
    %372 = arith.subf %368, %371 : vector<8x16xf32>
    %373 = math.exp %372 : vector<8x16xf32>
    %cst_149 = arith.constant dense<0.000000e+00> : vector<8xf32>
    %374 = vector.multi_reduction <add>, %373, %cst_149 [1] : vector<8x16xf32> to vector<8xf32>
    %375 = vector.shape_cast %374 : vector<8xf32> to vector<8x1xf32>
    %376 = tpu.reciprocal %375 {approx = true} : vector<8x1xf32> -> vector<8x1xf32>
    %377 = vector.broadcast %376 : vector<8x1xf32> to vector<8x16xf32>
    %378 = arith.mulf %373, %377 : vector<8x16xf32>
    %cst_150 = arith.constant dense<0.000000e+00> : vector<8x32xf32>
    %379 = tpu.matmul %378, %364, %cst_150 {dimension_numbers = #tpu.dot_dimension_numbers<[1], [0], [0], [1], [0, 0, 1, 1], [], []>} : vector<8x16xf32>, vector<16x32xf32>, vector<8x32xf32> -> vector<8x32xf32>
    %380 = tpu.concatenate %325, %343, %361, %379 in 1 : vector<8x32xf32>, vector<8x32xf32>, vector<8x32xf32>, vector<8x32xf32> -> vector<8x128xf32>
    %381 = arith.truncf %380 : vector<8x128xf32> to vector<8x128xbf16>
    %c1_151 = arith.constant 1 : index
    %c0_152 = arith.constant 0 : index
    %c0_153 = arith.constant 0 : index
    %382 = vector.load %arg7[%c1_151, %c0_152, %c0_153] : memref<2x128x128xbf16, #tpu.memory_space<vmem>>, vector<1x128x128xbf16>
    %383 = vector.shape_cast %382 : vector<1x128x128xbf16> to vector<128x128xbf16>
    %cst_154 = arith.constant dense<0.000000e+00> : vector<8x128xf32>
    %384 = tpu.matmul %381, %383, %cst_154 {dimension_numbers = #tpu.dot_dimension_numbers<[1], [0], [0], [1], [0, 0, 1, 1], [], []>} : vector<8x128xbf16>, vector<128x128xbf16>, vector<8x128xf32> -> vector<8x128xf32>
    %c1_155 = arith.constant 1 : index
    %c0_156 = arith.constant 0 : index
    %c0_157 = arith.constant 0 : index
    %385 = vector.load %arg8[%c1_155, %c0_156, %c0_157] : memref<2x1x128xf32, #tpu.memory_space<vmem>>, vector<1x1x128xf32>
    %386 = vector.shape_cast %385 : vector<1x1x128xf32> to vector<1x128xf32>
    %387 = vector.broadcast %386 : vector<1x128xf32> to vector<8x128xf32>
    %388 = arith.addf %384, %387 : vector<8x128xf32>
    %389 = arith.addf %290, %388 : vector<8x128xf32>
    %cst_158 = arith.constant dense<0.000000e+00> : vector<8xf32>
    %390 = vector.multi_reduction <add>, %389, %cst_158 [1] : vector<8x128xf32> to vector<8xf32>
    %391 = vector.shape_cast %390 : vector<8xf32> to vector<8x1xf32>
    %cst_159 = arith.constant 1.280000e+02 : f32
    %392 = vector.broadcast %cst_159 : f32 to vector<8x1xf32>
    %393 = arith.divf %391, %392 : vector<8x1xf32>
    %394 = vector.broadcast %393 : vector<8x1xf32> to vector<8x128xf32>
    %395 = arith.subf %389, %394 : vector<8x128xf32>
    %396 = arith.mulf %395, %395 : vector<8x128xf32>
    %cst_160 = arith.constant dense<0.000000e+00> : vector<8xf32>
    %397 = vector.multi_reduction <add>, %396, %cst_160 [1] : vector<8x128xf32> to vector<8xf32>
    %398 = vector.shape_cast %397 : vector<8xf32> to vector<8x1xf32>
    %cst_161 = arith.constant 1.280000e+02 : f32
    %399 = vector.broadcast %cst_161 : f32 to vector<8x1xf32>
    %400 = arith.divf %398, %399 : vector<8x1xf32>
    %cst_162 = arith.constant 9.99999974E-6 : f32
    %401 = vector.broadcast %cst_162 : f32 to vector<8x1xf32>
    %402 = arith.addf %400, %401 : vector<8x1xf32>
    %403 = math.rsqrt %402 : vector<8x1xf32>
    %404 = vector.broadcast %403 : vector<8x1xf32> to vector<8x128xf32>
    %405 = arith.mulf %395, %404 : vector<8x128xf32>
    %406 = vector.broadcast %5 : vector<1x128xf32> to vector<8x128xf32>
    %407 = arith.mulf %405, %406 : vector<8x128xf32>
    %408 = vector.broadcast %6 : vector<1x128xf32> to vector<8x128xf32>
    %409 = arith.addf %407, %408 : vector<8x128xf32>
    %410 = arith.truncf %409 : vector<8x128xf32> to vector<8x128xbf16>
    %c1_163 = arith.constant 1 : index
    %c0_164 = arith.constant 0 : index
    %c0_165 = arith.constant 0 : index
    %411 = vector.load %arg9[%c1_163, %c0_164, %c0_165] : memref<2x128x384xbf16, #tpu.memory_space<vmem>>, vector<1x128x384xbf16>
    %412 = vector.shape_cast %411 : vector<1x128x384xbf16> to vector<128x384xbf16>
    %cst_166 = arith.constant dense<0.000000e+00> : vector<8x384xf32>
    %413 = tpu.matmul %410, %412, %cst_166 {dimension_numbers = #tpu.dot_dimension_numbers<[1], [0], [0], [1], [0, 0, 1, 1], [], []>} : vector<8x128xbf16>, vector<128x384xbf16>, vector<8x384xf32> -> vector<8x384xf32>
    %c1_167 = arith.constant 1 : index
    %c0_168 = arith.constant 0 : index
    %c0_169 = arith.constant 0 : index
    %414 = vector.load %arg10[%c1_167, %c0_168, %c0_169] : memref<2x1x384xf32, #tpu.memory_space<vmem>>, vector<1x1x384xf32>
    %415 = vector.shape_cast %414 : vector<1x1x384xf32> to vector<1x384xf32>
    %416 = vector.broadcast %415 : vector<1x384xf32> to vector<8x384xf32>
    %417 = arith.addf %413, %416 : vector<8x384xf32>
    %418 = vector.extract_strided_slice %417 {offsets = [0, 0], sizes = [8, 128], strides = [1, 1]} : vector<8x384xf32> to vector<8x128xf32>
    %419 = vector.extract_strided_slice %417 {offsets = [0, 128], sizes = [8, 128], strides = [1, 1]} : vector<8x384xf32> to vector<8x128xf32>
    %420 = vector.extract_strided_slice %417 {offsets = [0, 256], sizes = [8, 128], strides = [1, 1]} : vector<8x384xf32> to vector<8x128xf32>
    %421 = vector.extract_strided_slice %418 {offsets = [0, 0], sizes = [8, 32], strides = [1, 1]} : vector<8x128xf32> to vector<8x32xf32>
    %422 = vector.extract_strided_slice %419 {offsets = [0, 0], sizes = [8, 32], strides = [1, 1]} : vector<8x128xf32> to vector<8x32xf32>
    %423 = vector.extract_strided_slice %420 {offsets = [0, 0], sizes = [8, 32], strides = [1, 1]} : vector<8x128xf32> to vector<8x32xf32>
    %424 = tpu.transpose %422, [1, 0] : vector<8x32xf32> -> vector<32x8xf32>
    %cst_170 = arith.constant dense<0.000000e+00> : vector<8x8xf32>
    %425 = tpu.matmul %421, %424, %cst_170 {dimension_numbers = #tpu.dot_dimension_numbers<[1], [0], [0], [1], [0, 0, 1, 1], [], []>} : vector<8x32xf32>, vector<32x8xf32>, vector<8x8xf32> -> vector<8x8xf32>
    %cst_171 = arith.constant 0.176776692 : f32
    %426 = vector.broadcast %cst_171 : f32 to vector<8x8xf32>
    %427 = arith.mulf %425, %426 : vector<8x8xf32>
    %cst_172 = arith.constant -1.000000e+30 : f32
    %428 = vector.broadcast %cst_172 : f32 to vector<8x8xf32>
    %429 = arith.select %9, %428, %427 : vector<8x8xi1>, vector<8x8xf32>
    %cst_173 = arith.constant dense<0xFF800000> : vector<8xf32>
    %430 = vector.multi_reduction <maximumf>, %429, %cst_173 [1] : vector<8x8xf32> to vector<8xf32>
    %431 = vector.shape_cast %430 : vector<8xf32> to vector<8x1xf32>
    %432 = vector.broadcast %431 : vector<8x1xf32> to vector<8x8xf32>
    %433 = arith.subf %429, %432 : vector<8x8xf32>
    %434 = math.exp %433 : vector<8x8xf32>
    %cst_174 = arith.constant dense<0.000000e+00> : vector<8xf32>
    %435 = vector.multi_reduction <add>, %434, %cst_174 [1] : vector<8x8xf32> to vector<8xf32>
    %436 = vector.shape_cast %435 : vector<8xf32> to vector<8x1xf32>
    %437 = tpu.reciprocal %436 {approx = true} : vector<8x1xf32> -> vector<8x1xf32>
    %438 = vector.broadcast %437 : vector<8x1xf32> to vector<8x8xf32>
    %439 = arith.mulf %434, %438 : vector<8x8xf32>
    %cst_175 = arith.constant dense<0.000000e+00> : vector<8x32xf32>
    %440 = tpu.matmul %439, %423, %cst_175 {dimension_numbers = #tpu.dot_dimension_numbers<[1], [0], [0], [1], [0, 0, 1, 1], [], []>} : vector<8x8xf32>, vector<8x32xf32>, vector<8x32xf32> -> vector<8x32xf32>
    %441 = vector.extract_strided_slice %418 {offsets = [0, 32], sizes = [8, 32], strides = [1, 1]} : vector<8x128xf32> to vector<8x32xf32>
    %442 = vector.extract_strided_slice %419 {offsets = [0, 32], sizes = [8, 32], strides = [1, 1]} : vector<8x128xf32> to vector<8x32xf32>
    %443 = vector.extract_strided_slice %420 {offsets = [0, 32], sizes = [8, 32], strides = [1, 1]} : vector<8x128xf32> to vector<8x32xf32>
    %444 = tpu.transpose %442, [1, 0] : vector<8x32xf32> -> vector<32x8xf32>
    %cst_176 = arith.constant dense<0.000000e+00> : vector<8x8xf32>
    %445 = tpu.matmul %441, %444, %cst_176 {dimension_numbers = #tpu.dot_dimension_numbers<[1], [0], [0], [1], [0, 0, 1, 1], [], []>} : vector<8x32xf32>, vector<32x8xf32>, vector<8x8xf32> -> vector<8x8xf32>
    %cst_177 = arith.constant 0.176776692 : f32
    %446 = vector.broadcast %cst_177 : f32 to vector<8x8xf32>
    %447 = arith.mulf %445, %446 : vector<8x8xf32>
    %cst_178 = arith.constant -1.000000e+30 : f32
    %448 = vector.broadcast %cst_178 : f32 to vector<8x8xf32>
    %449 = arith.select %9, %448, %447 : vector<8x8xi1>, vector<8x8xf32>
    %cst_179 = arith.constant dense<0xFF800000> : vector<8xf32>
    %450 = vector.multi_reduction <maximumf>, %449, %cst_179 [1] : vector<8x8xf32> to vector<8xf32>
    %451 = vector.shape_cast %450 : vector<8xf32> to vector<8x1xf32>
    %452 = vector.broadcast %451 : vector<8x1xf32> to vector<8x8xf32>
    %453 = arith.subf %449, %452 : vector<8x8xf32>
    %454 = math.exp %453 : vector<8x8xf32>
    %cst_180 = arith.constant dense<0.000000e+00> : vector<8xf32>
    %455 = vector.multi_reduction <add>, %454, %cst_180 [1] : vector<8x8xf32> to vector<8xf32>
    %456 = vector.shape_cast %455 : vector<8xf32> to vector<8x1xf32>
    %457 = tpu.reciprocal %456 {approx = true} : vector<8x1xf32> -> vector<8x1xf32>
    %458 = vector.broadcast %457 : vector<8x1xf32> to vector<8x8xf32>
    %459 = arith.mulf %454, %458 : vector<8x8xf32>
    %cst_181 = arith.constant dense<0.000000e+00> : vector<8x32xf32>
    %460 = tpu.matmul %459, %443, %cst_181 {dimension_numbers = #tpu.dot_dimension_numbers<[1], [0], [0], [1], [0, 0, 1, 1], [], []>} : vector<8x8xf32>, vector<8x32xf32>, vector<8x32xf32> -> vector<8x32xf32>
    %461 = vector.extract_strided_slice %418 {offsets = [0, 64], sizes = [8, 32], strides = [1, 1]} : vector<8x128xf32> to vector<8x32xf32>
    %462 = vector.extract_strided_slice %419 {offsets = [0, 64], sizes = [8, 32], strides = [1, 1]} : vector<8x128xf32> to vector<8x32xf32>
    %463 = vector.extract_strided_slice %420 {offsets = [0, 64], sizes = [8, 32], strides = [1, 1]} : vector<8x128xf32> to vector<8x32xf32>
    %464 = tpu.transpose %462, [1, 0] : vector<8x32xf32> -> vector<32x8xf32>
    %cst_182 = arith.constant dense<0.000000e+00> : vector<8x8xf32>
    %465 = tpu.matmul %461, %464, %cst_182 {dimension_numbers = #tpu.dot_dimension_numbers<[1], [0], [0], [1], [0, 0, 1, 1], [], []>} : vector<8x32xf32>, vector<32x8xf32>, vector<8x8xf32> -> vector<8x8xf32>
    %cst_183 = arith.constant 0.176776692 : f32
    %466 = vector.broadcast %cst_183 : f32 to vector<8x8xf32>
    %467 = arith.mulf %465, %466 : vector<8x8xf32>
    %cst_184 = arith.constant -1.000000e+30 : f32
    %468 = vector.broadcast %cst_184 : f32 to vector<8x8xf32>
    %469 = arith.select %9, %468, %467 : vector<8x8xi1>, vector<8x8xf32>
    %cst_185 = arith.constant dense<0xFF800000> : vector<8xf32>
    %470 = vector.multi_reduction <maximumf>, %469, %cst_185 [1] : vector<8x8xf32> to vector<8xf32>
    %471 = vector.shape_cast %470 : vector<8xf32> to vector<8x1xf32>
    %472 = vector.broadcast %471 : vector<8x1xf32> to vector<8x8xf32>
    %473 = arith.subf %469, %472 : vector<8x8xf32>
    %474 = math.exp %473 : vector<8x8xf32>
    %cst_186 = arith.constant dense<0.000000e+00> : vector<8xf32>
    %475 = vector.multi_reduction <add>, %474, %cst_186 [1] : vector<8x8xf32> to vector<8xf32>
    %476 = vector.shape_cast %475 : vector<8xf32> to vector<8x1xf32>
    %477 = tpu.reciprocal %476 {approx = true} : vector<8x1xf32> -> vector<8x1xf32>
    %478 = vector.broadcast %477 : vector<8x1xf32> to vector<8x8xf32>
    %479 = arith.mulf %474, %478 : vector<8x8xf32>
    %cst_187 = arith.constant dense<0.000000e+00> : vector<8x32xf32>
    %480 = tpu.matmul %479, %463, %cst_187 {dimension_numbers = #tpu.dot_dimension_numbers<[1], [0], [0], [1], [0, 0, 1, 1], [], []>} : vector<8x8xf32>, vector<8x32xf32>, vector<8x32xf32> -> vector<8x32xf32>
    %481 = vector.extract_strided_slice %418 {offsets = [0, 96], sizes = [8, 32], strides = [1, 1]} : vector<8x128xf32> to vector<8x32xf32>
    %482 = vector.extract_strided_slice %419 {offsets = [0, 96], sizes = [8, 32], strides = [1, 1]} : vector<8x128xf32> to vector<8x32xf32>
    %483 = vector.extract_strided_slice %420 {offsets = [0, 96], sizes = [8, 32], strides = [1, 1]} : vector<8x128xf32> to vector<8x32xf32>
    %484 = tpu.transpose %482, [1, 0] : vector<8x32xf32> -> vector<32x8xf32>
    %cst_188 = arith.constant dense<0.000000e+00> : vector<8x8xf32>
    %485 = tpu.matmul %481, %484, %cst_188 {dimension_numbers = #tpu.dot_dimension_numbers<[1], [0], [0], [1], [0, 0, 1, 1], [], []>} : vector<8x32xf32>, vector<32x8xf32>, vector<8x8xf32> -> vector<8x8xf32>
    %cst_189 = arith.constant 0.176776692 : f32
    %486 = vector.broadcast %cst_189 : f32 to vector<8x8xf32>
    %487 = arith.mulf %485, %486 : vector<8x8xf32>
    %cst_190 = arith.constant -1.000000e+30 : f32
    %488 = vector.broadcast %cst_190 : f32 to vector<8x8xf32>
    %489 = arith.select %9, %488, %487 : vector<8x8xi1>, vector<8x8xf32>
    %cst_191 = arith.constant dense<0xFF800000> : vector<8xf32>
    %490 = vector.multi_reduction <maximumf>, %489, %cst_191 [1] : vector<8x8xf32> to vector<8xf32>
    %491 = vector.shape_cast %490 : vector<8xf32> to vector<8x1xf32>
    %492 = vector.broadcast %491 : vector<8x1xf32> to vector<8x8xf32>
    %493 = arith.subf %489, %492 : vector<8x8xf32>
    %494 = math.exp %493 : vector<8x8xf32>
    %cst_192 = arith.constant dense<0.000000e+00> : vector<8xf32>
    %495 = vector.multi_reduction <add>, %494, %cst_192 [1] : vector<8x8xf32> to vector<8xf32>
    %496 = vector.shape_cast %495 : vector<8xf32> to vector<8x1xf32>
    %497 = tpu.reciprocal %496 {approx = true} : vector<8x1xf32> -> vector<8x1xf32>
    %498 = vector.broadcast %497 : vector<8x1xf32> to vector<8x8xf32>
    %499 = arith.mulf %494, %498 : vector<8x8xf32>
    %cst_193 = arith.constant dense<0.000000e+00> : vector<8x32xf32>
    %500 = tpu.matmul %499, %483, %cst_193 {dimension_numbers = #tpu.dot_dimension_numbers<[1], [0], [0], [1], [0, 0, 1, 1], [], []>} : vector<8x8xf32>, vector<8x32xf32>, vector<8x32xf32> -> vector<8x32xf32>
    %501 = tpu.concatenate %440, %460, %480, %500 in 1 : vector<8x32xf32>, vector<8x32xf32>, vector<8x32xf32>, vector<8x32xf32> -> vector<8x128xf32>
    %502 = arith.truncf %501 : vector<8x128xf32> to vector<8x128xbf16>
    %c1_194 = arith.constant 1 : index
    %c0_195 = arith.constant 0 : index
    %c0_196 = arith.constant 0 : index
    %503 = vector.load %arg11[%c1_194, %c0_195, %c0_196] : memref<2x128x128xbf16, #tpu.memory_space<vmem>>, vector<1x128x128xbf16>
    %504 = vector.shape_cast %503 : vector<1x128x128xbf16> to vector<128x128xbf16>
    %cst_197 = arith.constant dense<0.000000e+00> : vector<8x128xf32>
    %505 = tpu.matmul %502, %504, %cst_197 {dimension_numbers = #tpu.dot_dimension_numbers<[1], [0], [0], [1], [0, 0, 1, 1], [], []>} : vector<8x128xbf16>, vector<128x128xbf16>, vector<8x128xf32> -> vector<8x128xf32>
    %c1_198 = arith.constant 1 : index
    %c0_199 = arith.constant 0 : index
    %c0_200 = arith.constant 0 : index
    %506 = vector.load %arg12[%c1_198, %c0_199, %c0_200] : memref<2x1x128xf32, #tpu.memory_space<vmem>>, vector<1x1x128xf32>
    %507 = vector.shape_cast %506 : vector<1x1x128xf32> to vector<1x128xf32>
    %508 = vector.broadcast %507 : vector<1x128xf32> to vector<8x128xf32>
    %509 = arith.addf %505, %508 : vector<8x128xf32>
    %510 = arith.addf %409, %509 : vector<8x128xf32>
    %cst_201 = arith.constant dense<0.000000e+00> : vector<8xf32>
    %511 = vector.multi_reduction <add>, %510, %cst_201 [1] : vector<8x128xf32> to vector<8xf32>
    %512 = vector.shape_cast %511 : vector<8xf32> to vector<8x1xf32>
    %cst_202 = arith.constant 1.280000e+02 : f32
    %513 = vector.broadcast %cst_202 : f32 to vector<8x1xf32>
    %514 = arith.divf %512, %513 : vector<8x1xf32>
    %515 = vector.broadcast %514 : vector<8x1xf32> to vector<8x128xf32>
    %516 = arith.subf %510, %515 : vector<8x128xf32>
    %517 = arith.mulf %516, %516 : vector<8x128xf32>
    %cst_203 = arith.constant dense<0.000000e+00> : vector<8xf32>
    %518 = vector.multi_reduction <add>, %517, %cst_203 [1] : vector<8x128xf32> to vector<8xf32>
    %519 = vector.shape_cast %518 : vector<8xf32> to vector<8x1xf32>
    %cst_204 = arith.constant 1.280000e+02 : f32
    %520 = vector.broadcast %cst_204 : f32 to vector<8x1xf32>
    %521 = arith.divf %519, %520 : vector<8x1xf32>
    %cst_205 = arith.constant 9.99999974E-6 : f32
    %522 = vector.broadcast %cst_205 : f32 to vector<8x1xf32>
    %523 = arith.addf %521, %522 : vector<8x1xf32>
    %524 = math.rsqrt %523 : vector<8x1xf32>
    %525 = vector.broadcast %524 : vector<8x1xf32> to vector<8x128xf32>
    %526 = arith.mulf %516, %525 : vector<8x128xf32>
    %527 = vector.broadcast %5 : vector<1x128xf32> to vector<8x128xf32>
    %528 = arith.mulf %526, %527 : vector<8x128xf32>
    %529 = vector.broadcast %6 : vector<1x128xf32> to vector<8x128xf32>
    %530 = arith.addf %528, %529 : vector<8x128xf32>
    %531 = arith.truncf %530 : vector<8x128xf32> to vector<8x128xbf16>
    %c1_206 = arith.constant 1 : index
    %c0_207 = arith.constant 0 : index
    %c0_208 = arith.constant 0 : index
    %532 = vector.load %arg13[%c1_206, %c0_207, %c0_208] : memref<2x128x256xbf16, #tpu.memory_space<vmem>>, vector<1x128x256xbf16>
    %533 = vector.shape_cast %532 : vector<1x128x256xbf16> to vector<128x256xbf16>
    %cst_209 = arith.constant dense<0.000000e+00> : vector<8x256xf32>
    %534 = tpu.matmul %531, %533, %cst_209 {dimension_numbers = #tpu.dot_dimension_numbers<[1], [0], [0], [1], [0, 0, 1, 1], [], []>} : vector<8x128xbf16>, vector<128x256xbf16>, vector<8x256xf32> -> vector<8x256xf32>
    %c1_210 = arith.constant 1 : index
    %c0_211 = arith.constant 0 : index
    %c0_212 = arith.constant 0 : index
    %535 = vector.load %arg14[%c1_210, %c0_211, %c0_212] : memref<2x1x256xf32, #tpu.memory_space<vmem>>, vector<1x1x256xf32>
    %536 = vector.shape_cast %535 : vector<1x1x256xf32> to vector<1x256xf32>
    %537 = vector.broadcast %536 : vector<1x256xf32> to vector<8x256xf32>
    %538 = arith.addf %534, %537 : vector<8x256xf32>
    %cst_213 = arith.constant 0.000000e+00 : f32
    %539 = vector.broadcast %cst_213 : f32 to vector<8x256xf32>
    %540 = arith.maximumf %538, %539 : vector<8x256xf32>
    %541 = arith.truncf %540 : vector<8x256xf32> to vector<8x256xbf16>
    %c1_214 = arith.constant 1 : index
    %c0_215 = arith.constant 0 : index
    %c0_216 = arith.constant 0 : index
    %542 = vector.load %arg15[%c1_214, %c0_215, %c0_216] : memref<2x256x128xbf16, #tpu.memory_space<vmem>>, vector<1x256x128xbf16>
    %543 = vector.shape_cast %542 : vector<1x256x128xbf16> to vector<256x128xbf16>
    %cst_217 = arith.constant dense<0.000000e+00> : vector<8x128xf32>
    %544 = tpu.matmul %541, %543, %cst_217 {dimension_numbers = #tpu.dot_dimension_numbers<[1], [0], [0], [1], [0, 0, 1, 1], [], []>} : vector<8x256xbf16>, vector<256x128xbf16>, vector<8x128xf32> -> vector<8x128xf32>
    %c1_218 = arith.constant 1 : index
    %c0_219 = arith.constant 0 : index
    %c0_220 = arith.constant 0 : index
    %545 = vector.load %arg16[%c1_218, %c0_219, %c0_220] : memref<2x1x128xf32, #tpu.memory_space<vmem>>, vector<1x1x128xf32>
    %546 = vector.shape_cast %545 : vector<1x1x128xf32> to vector<1x128xf32>
    %547 = vector.broadcast %546 : vector<1x128xf32> to vector<8x128xf32>
    %548 = arith.addf %544, %547 : vector<8x128xf32>
    %cst_221 = arith.constant 0.000000e+00 : f32
    %549 = vector.broadcast %cst_221 : f32 to vector<8x128xf32>
    %550 = arith.maximumf %548, %549 : vector<8x128xf32>
    %551 = arith.addf %530, %550 : vector<8x128xf32>
    %cst_222 = arith.constant dense<0.000000e+00> : vector<8xf32>
    %552 = vector.multi_reduction <add>, %551, %cst_222 [1] : vector<8x128xf32> to vector<8xf32>
    %553 = vector.shape_cast %552 : vector<8xf32> to vector<8x1xf32>
    %cst_223 = arith.constant 1.280000e+02 : f32
    %554 = vector.broadcast %cst_223 : f32 to vector<8x1xf32>
    %555 = arith.divf %553, %554 : vector<8x1xf32>
    %556 = vector.broadcast %555 : vector<8x1xf32> to vector<8x128xf32>
    %557 = arith.subf %551, %556 : vector<8x128xf32>
    %558 = arith.mulf %557, %557 : vector<8x128xf32>
    %cst_224 = arith.constant dense<0.000000e+00> : vector<8xf32>
    %559 = vector.multi_reduction <add>, %558, %cst_224 [1] : vector<8x128xf32> to vector<8xf32>
    %560 = vector.shape_cast %559 : vector<8xf32> to vector<8x1xf32>
    %cst_225 = arith.constant 1.280000e+02 : f32
    %561 = vector.broadcast %cst_225 : f32 to vector<8x1xf32>
    %562 = arith.divf %560, %561 : vector<8x1xf32>
    %cst_226 = arith.constant 9.99999974E-6 : f32
    %563 = vector.broadcast %cst_226 : f32 to vector<8x1xf32>
    %564 = arith.addf %562, %563 : vector<8x1xf32>
    %565 = math.rsqrt %564 : vector<8x1xf32>
    %566 = vector.broadcast %565 : vector<8x1xf32> to vector<8x128xf32>
    %567 = arith.mulf %557, %566 : vector<8x128xf32>
    %568 = vector.broadcast %5 : vector<1x128xf32> to vector<8x128xf32>
    %569 = arith.mulf %567, %568 : vector<8x128xf32>
    %570 = vector.broadcast %6 : vector<1x128xf32> to vector<8x128xf32>
    %571 = arith.addf %569, %570 : vector<8x128xf32>
    %572 = arith.truncf %571 : vector<8x128xf32> to vector<8x128xbf16>
    %c0_227 = arith.constant 0 : index
    %c0_228 = arith.constant 0 : index
    %573 = vector.load %arg19[%c0_227, %c0_228] : memref<128x128xbf16, #tpu.memory_space<vmem>>, vector<128x128xbf16>
    %cst_229 = arith.constant dense<0.000000e+00> : vector<8x128xf32>
    %574 = tpu.matmul %572, %573, %cst_229 {dimension_numbers = #tpu.dot_dimension_numbers<[1], [0], [0], [1], [0, 0, 1, 1], [], []>} : vector<8x128xbf16>, vector<128x128xbf16>, vector<8x128xf32> -> vector<8x128xf32>
    %c0_230 = arith.constant 0 : index
    %c0_231 = arith.constant 0 : index
    %c0_232 = arith.constant 0 : index
    %575 = vector.load %arg20[%c0_230, %c0_231, %c0_232] : memref<1x8x128xf32, #tpu.memory_space<vmem>>, vector<1x8x128xf32>
    %576 = vector.shape_cast %575 : vector<1x8x128xf32> to vector<8x128xf32>
    %577 = vector.shape_cast %574 : vector<8x128xf32> to vector<1x8x128xf32>
    tpu.vector_store %arg20[%c0_230, %c0_231, %c0_232], %577 {strides = array<i32>} : memref<1x8x128xf32, #tpu.memory_space<vmem>>, vector<1x8x128xf32>,
    return
  }
  func.func @transform_0(%arg0: i32) -> (i32, i32, i32) {
    %c0_i32 = arith.constant 0 : i32
    %c0_i32_0 = arith.constant 0 : i32
    %c0_i32_1 = arith.constant 0 : i32
    return %arg0, %c0_i32, %c0_i32_0 : i32, i32, i32
  }
  func.func @transform_1(%arg0: i32) -> (i32, i32, i32) {
    %c0_i32 = arith.constant 0 : i32
    %c0_i32_0 = arith.constant 0 : i32
    %c0_i32_1 = arith.constant 0 : i32
    return %arg0, %c0_i32, %c0_i32_0 : i32, i32, i32
  }
  func.func @transform_2(%arg0: i32) -> (i32, i32, i32) {
    %c0_i32 = arith.constant 0 : i32
    %c0_i32_0 = arith.constant 0 : i32
    %c0_i32_1 = arith.constant 0 : i32
    %c0_i32_2 = arith.constant 0 : i32
    return %c0_i32, %c0_i32_0, %c0_i32_1 : i32, i32, i32
  }
  func.func @transform_3(%arg0: i32) -> (i32, i32, i32) {
    %c0_i32 = arith.constant 0 : i32
    %c0_i32_0 = arith.constant 0 : i32
    %c0_i32_1 = arith.constant 0 : i32
    %c0_i32_2 = arith.constant 0 : i32
    return %c0_i32, %c0_i32_0, %c0_i32_1 : i32, i32, i32
  }
  func.func @transform_4(%arg0: i32) -> (i32, i32, i32) {
    %c0_i32 = arith.constant 0 : i32
    %c0_i32_0 = arith.constant 0 : i32
    %c0_i32_1 = arith.constant 0 : i32
    %c0_i32_2 = arith.constant 0 : i32
    return %c0_i32, %c0_i32_0, %c0_i32_1 : i32, i32, i32
  }
  func.func @transform_5(%arg0: i32) -> (i32, i32, i32) {
    %c0_i32 = arith.constant 0 : i32
    %c0_i32_0 = arith.constant 0 : i32
    %c0_i32_1 = arith.constant 0 : i32
    %c0_i32_2 = arith.constant 0 : i32
    return %c0_i32, %c0_i32_0, %c0_i32_1 : i32, i32, i32
  }
  func.func @transform_6(%arg0: i32) -> (i32, i32, i32) {
    %c0_i32 = arith.constant 0 : i32
    %c0_i32_0 = arith.constant 0 : i32
    %c0_i32_1 = arith.constant 0 : i32
    %c0_i32_2 = arith.constant 0 : i32
    return %c0_i32, %c0_i32_0, %c0_i32_1 : i32, i32, i32
  }
  func.func @transform_7(%arg0: i32) -> (i32, i32, i32) {
    %c0_i32 = arith.constant 0 : i32
    %c0_i32_0 = arith.constant 0 : i32
    %c0_i32_1 = arith.constant 0 : i32
    %c0_i32_2 = arith.constant 0 : i32
    return %c0_i32, %c0_i32_0, %c0_i32_1 : i32, i32, i32
  }
  func.func @transform_8(%arg0: i32) -> (i32, i32, i32) {
    %c0_i32 = arith.constant 0 : i32
    %c0_i32_0 = arith.constant 0 : i32
    %c0_i32_1 = arith.constant 0 : i32
    %c0_i32_2 = arith.constant 0 : i32
    return %c0_i32, %c0_i32_0, %c0_i32_1 : i32, i32, i32
  }
  func.func @transform_9(%arg0: i32) -> (i32, i32, i32) {
    %c0_i32 = arith.constant 0 : i32
    %c0_i32_0 = arith.constant 0 : i32
    %c0_i32_1 = arith.constant 0 : i32
    %c0_i32_2 = arith.constant 0 : i32
    return %c0_i32, %c0_i32_0, %c0_i32_1 : i32, i32, i32
  }
  func.func @transform_10(%arg0: i32) -> (i32, i32, i32) {
    %c0_i32 = arith.constant 0 : i32
    %c0_i32_0 = arith.constant 0 : i32
    %c0_i32_1 = arith.constant 0 : i32
    %c0_i32_2 = arith.constant 0 : i32
    return %c0_i32, %c0_i32_0, %c0_i32_1 : i32, i32, i32
  }
  func.func @transform_11(%arg0: i32) -> (i32, i32, i32) {
    %c0_i32 = arith.constant 0 : i32
    %c0_i32_0 = arith.constant 0 : i32
    %c0_i32_1 = arith.constant 0 : i32
    %c0_i32_2 = arith.constant 0 : i32
    return %c0_i32, %c0_i32_0, %c0_i32_1 : i32, i32, i32
  }
  func.func @transform_12(%arg0: i32) -> (i32, i32, i32) {
    %c0_i32 = arith.constant 0 : i32
    %c0_i32_0 = arith.constant 0 : i32
    %c0_i32_1 = arith.constant 0 : i32
    %c0_i32_2 = arith.constant 0 : i32
    return %c0_i32, %c0_i32_0, %c0_i32_1 : i32, i32, i32
  }
  func.func @transform_13(%arg0: i32) -> (i32, i32, i32) {
    %c0_i32 = arith.constant 0 : i32
    %c0_i32_0 = arith.constant 0 : i32
    %c0_i32_1 = arith.constant 0 : i32
    %c0_i32_2 = arith.constant 0 : i32
    return %c0_i32, %c0_i32_0, %c0_i32_1 : i32, i32, i32
  }
  func.func @transform_14(%arg0: i32) -> (i32, i32, i32) {
    %c0_i32 = arith.constant 0 : i32
    %c0_i32_0 = arith.constant 0 : i32
    %c0_i32_1 = arith.constant 0 : i32
    %c0_i32_2 = arith.constant 0 : i32
    return %c0_i32, %c0_i32_0, %c0_i32_1 : i32, i32, i32
  }
  func.func @transform_15(%arg0: i32) -> (i32, i32, i32) {
    %c0_i32 = arith.constant 0 : i32
    %c0_i32_0 = arith.constant 0 : i32
    %c0_i32_1 = arith.constant 0 : i32
    %c0_i32_2 = arith.constant 0 : i32
    return %c0_i32, %c0_i32_0, %c0_i32_1 : i32, i32, i32
  }
  func.func @transform_16(%arg0: i32) -> (i32, i32) {
    %c0_i32 = arith.constant 0 : i32
    %c0_i32_0 = arith.constant 0 : i32
    %c0_i32_1 = arith.constant 0 : i32
    return %c0_i32, %c0_i32_0 : i32, i32
  }
  func.func @transform_17(%arg0: i32) -> (i32, i32) {
    %c0_i32 = arith.constant 0 : i32
    %c0_i32_0 = arith.constant 0 : i32
    %c0_i32_1 = arith.constant 0 : i32
    return %c0_i32, %c0_i32_0 : i32, i32
  }
  func.func @transform_18(%arg0: i32) -> (i32, i32) {
    %c0_i32 = arith.constant 0 : i32
    %c0_i32_0 = arith.constant 0 : i32
    %c0_i32_1 = arith.constant 0 : i32
    return %c0_i32, %c0_i32_0 : i32, i32
  }
  func.func @transform_19(%arg0: i32) -> (i32, i32, i32) {
    %c0_i32 = arith.constant 0 : i32
    %c0_i32_0 = arith.constant 0 : i32
    %c0_i32_1 = arith.constant 0 : i32
    return %arg0, %c0_i32, %c0_i32_0 : i32, i32, i32
  }
}

</mosaic_0001>

<bundles_post_ra>
// kernel: decoder_forward.1
= control target key start
LH: loop header
LB: loop body
LE: loop exit
PB: predicated region body
PF: predicated region fallthrough
CT: control target
= control target key end

     0   :  { %s9292_s0 = inlined_call_operand.vmem [shape: f32[2,8,128], index: 0, kind: input, shape index: {}]   ;;  %s9293_s1 = inlined_call_operand.vmem [shape: f32[2,16,128], index: 1, kind: input, shape index: {}]   ;;  %s9294_s2 = inlined_call_operand.vmem [shape: bf16[2,128,128], index: 2, kind: input, shape index: {}]   ;;  %s9295_s3 = inlined_call_operand.vmem [shape: f32[2,1,128], index: 3, kind: input, shape index: {}]   ;;  %s9296_s4 = inlined_call_operand.hbm [shape: bf16[2,128,256], index: 4, kind: input, shape index: {}]   ;;  %s9297_s5 = inlined_call_operand.hbm [shape: f32[2,1,256], index: 5, kind: input, shape index: {}]   ;;  %s9298_s6 = inlined_call_operand.hbm [shape: bf16[2,128,128], index: 6, kind: input, shape index: {}]   ;;  %s9299_s7 = inlined_call_operand.hbm [shape: f32[2,1,128], index: 7, kind: input, shape index: {}]   ;;  %s9300_s8 = inlined_call_operand.hbm [shape: bf16[2,128,384], index: 8, kind: input, shape index: {}]   ;;  %s9301_s9 = inlined_call_operand.hbm [shape: f32[2,1,384], index: 9, kind: input, shape index: {}]   ;;  %s9302_s10 = inlined_call_operand.hbm [shape: bf16[2,128,128], index: 10, kind: input, shape index: {}]   ;;  %s9303_s11 = inlined_call_operand.hbm [shape: f32[2,1,128], index: 11, kind: input, shape index: {}]   ;;  %s9304_s12 = inlined_call_operand.hbm [shape: bf16[2,128,256], index: 12, kind: input, shape index: {}]   ;;  %s9305_s13 = inlined_call_operand.hbm [shape: f32[2,1,256], index: 13, kind: input, shape index: {}]   ;;  %s9306_s14 = inlined_call_operand.hbm [shape: bf16[2,256,128], index: 14, kind: input, shape index: {}]   ;;  %s9307_s15 = inlined_call_operand.hbm [shape: f32[2,1,128], index: 15, kind: input, shape index: {}]   ;;  %s9308_s16 = inlined_call_operand.vmem [shape: f32[1,128], index: 16, kind: input, shape index: {}]   ;;  %s9309_s17 = inlined_call_operand.hbm [shape: f32[1,128], index: 17, kind: input, shape index: {}]   ;;  %s9310_s18 = inlined_call_operand.vmem [shape: bf16[128,128], index: 18, kind: input, shape index: {}]   ;;  %s9311_s19 = inlined_call_operand.hbm [shape: f32[2,8,128], index: 19, kind: output, shape index: {}]  }
   0x1   :  { %9339 = sst [smem:[#allocation40_spill]] %s9292_s0 }
   0x2   :  { %9340 = sst [smem:[#allocation41_spill]] %s9293_s1 }
   0x3   :  { %9341 = sst [smem:[#allocation42_spill]] %s9294_s2 }
   0x4   :  { %9342 = sst [smem:[#allocation43_spill]] %s9295_s3 }
   0x5   :  { %9343 = sst [smem:[#allocation44_spill]] %s9297_s5 }
   0x6   :  { %9344 = sst [smem:[#allocation45_spill]] %s9299_s7 }
   0x7   :  { %9345 = sst [smem:[#allocation46_spill]] %s9301_s9 }
   0x8   :  { %9346 = sst [smem:[#allocation47_spill]] %s9308_s16 }
   0x9   :  { %9347 = sst [smem:[#allocation48_spill]] %s9310_s18 }
   0xa   :  { %9348 = sst [smem:[#allocation49_spill]] %s9311_s19 }
   0xb   :  { %24 = vsyncpa [#allocation3], 0 }
   0xc   :  { %25 = vsyncpa [#allocation6], 0 }
   0xd   :  { %26 = vsyncpa [#allocation9], 0 }
   0xe   :  { %27 = vsyncpa [#allocation12], 0 }
   0xf   :  { %28 = vsyncpa [#allocation15], 0 }
  0x10   :  { %29 = vsyncpa [#allocation18], 0 }
  0x11   :  { %30 = vsyncpa [#allocation21], 0 }
  0x12   :  { %31 = vsyncpa [#allocation4], 0 }
  0x13   :  { %33 = vsyncpa [#allocation4 + $0x1], 0  ;;  %s8279_s0 = smov 0   ;;  %s8281_s30 = smov 0  }
  0x14   :  { %s8283_s20 = smov 0   ;;  %s8285_s21 = smov 0  }
  0x15 LB: > { %9349 = sst [smem:[#allocation32_spill]] %s8132_s0  ;;  %s8300_s1 = sadd.s32 4294967295, %s8144_s21   ;;  %s8144_s21 = sphi %s8285_s21, %s9405_s21   ;;  %s8140_s20 = sphi %s8283_s20, %s9408_s20   ;;  %s8136_s30 = sphi %s8281_s30, %s9407_s30   ;;  %s8132_s0 = sphi %s8279_s0, %s9406_s0  }
  0x16   : > { %9350 = sst [smem:[#allocation33_spill]] %s8136_s30  ;;  %s6160_s22 = sadd.s32 4294967294, %s8144_s21  }
  0x17   : > { %9351 = sst [smem:[#allocation34_spill]] %s8140_s20  ;;  %s8304_s2 = sadd.s32 1, %s8144_s21  }
  0x18   : > { %9352 = sst [smem:[#allocation35_spill]] %s8144_s21  ;;  %s455_s23 = sadd.s32 1, %s8140_s20 }
  0x19   : > { %9353 = sst [smem:[#allocation36_spill]] %s8304_s2  ;;  %s452_s24 = ssub.s32 %s8144_s21, %s8304_s2 }
  0x1a   : > { %p465_p0 = scmp.ne.s32.totalorder %s8140_s20, %s8136_s30  ;;  %p453_p1 = scmp.eq.s32.totalorder %s452_s24, 0 }
  0x1b   : > { %p466_p2 = scmp.eq.s32.totalorder %s8300_s1, 1  ;;  %p471_p3 = scmp.ne.s32.totalorder %s8136_s30, %s8132_s0 }
  0x1c   : > { %p472_p4 = scmp.eq.s32.totalorder %s6160_s22, 1  ;;  %p6161_p7 = scmp.ge.s32.totalorder %s8144_s21, 1 }
  0x1d   : > { %s8315_s25 = scalar_select %p453_p1, %s8140_s20, %s455_s23  }
  0x1e   : > { %p8317_p5 = por %p466_p2, %p465_p0  ;;  %p8321_p6 = por %p472_p4, %p471_p3 }
  0x1f   : > { %9354 = sst [smem:[#allocation37_spill]] %s8315_s25  ;;  %p479_p8 = scmp.lt.s32.totalorder %s8144_s21, 3 }
  0x20   : > { %s9355_s3 = scalar_select %p8317_p5, 1, 0 }
  0x21   : > { %s9357_s26 = scalar_select %p8321_p6, 1, 0 }
  0x22   : > { %9356 = sst [smem:[#allocation38_spill]] %s9355_s3  ;;  %p9320_p9 = scmp.eq.s32.totalorder %s8300_s1, 0 }
  0x23   : > { %9358 = sst [smem:[#allocation39_spill]] %s9357_s26  ;;  %p8328_p10 = pnand %p6161_p7, %p479_p8 }
  0x24   : > { %s8146_s28 = smov [#allocation5]   ;;  %s8147_s23 = smov [#allocation8]  }
  0x25   : > { %s9359_s27 = scalar_select %p8328_p10, 1, 0 }
  0x26   : > { %s510_s29 = sshll.u32 %s8146_s28, 4  ;;  %p7169_p11 = pneg %p8328_p10  ;;  %s511_s29 = int_to_ptr.vmem [resolvable:$true] %s510_s29 }
  0x27   : > { %s536_s24 = sshll.u32 %s8147_s23, 4  ;;  %s9361_s5 = sld [smem:[#allocation44_spill]]  ;;  %s8340_s24 = int_to_ptr.vmem [resolvable:$true] %s536_s24 }
  0x28   : > { %p8336_p12 = pnand %p9320_p9, %p7169_p11 }
  0x2a   : > { %p8350_p0 = pneg %p8336_p12 }
  0x2d   : > { %s7690_s2 = scalar_lea.hbm %s9361_s5, 64 }
  0x2e   : > { %p7691_p13 = scmp.ne.s32.totalorder %s9361_s5, %s7690_s2  ;;  %p7697_p3 = scmp.lt.u32.totalorder %s7690_s2, %s9361_s5 }
  0x30   : > { %p7693_p1 = pnand %p8350_p0, %p7691_p13 }
  0x32   : > { %p7694_p2 = pneg %p7693_p1 }
  0x34   : > { %p7699_p4 = pnand %p7697_p3, %p7694_p2 }
  0x36   : > { %7702 = shalt.err (!%p7699_p4)
}
  0x37   : > { %s7703_s20 = scalar_lea.vmem %s511_s29, 64  ;;  %p7711_p9 = scmp.lt.s32.totalorder %s511_s29, %s511_s29 }
  0x38   : > { %p7704_p7 = scmp.ne.s32.totalorder %s511_s29, %s7703_s20  ;;  %p7712_p6 = scmp.lt.s32.totalorder %s7703_s20, %s7703_s20 }
  0x3a   : > { %p7706_p8 = pnand %p7704_p7, %p8350_p0  ;;  %p7713_p5 = por %p7712_p6, %p7711_p9 }
  0x3c   : > { %p7707_p11 = pneg %p7706_p8 }
  0x3e   : > { %p7714_p10 = pnand %p7713_p5, %p7707_p11 }
  0x40   : > { %7717 = shalt.err (!%p7714_p10)
}
  0x41   : > { %s9328_s0 = smov 32   ;;  %s9329_s25 = smov 2  }
  0x42   : > { %7175 = dma.hbm_to_vmem [thread:$0]  (!%p8336_p12), %s9361_s5, 64, %s511_s29, [#allocation6], %s9328_s0, %s9328_s0, %s9329_s25  }
  0x43   : > { %s9363_s7 = sld [smem:[#allocation45_spill]] }
  0x49   : > { %s7718_s19 = scalar_lea.hbm %s9363_s7, 32 }
  0x4a   : > { %p7719_p5 = scmp.ne.s32.totalorder %s9363_s7, %s7718_s19  ;;  %p7725_p10 = scmp.lt.u32.totalorder %s7718_s19, %s9363_s7 }
  0x4c   : > { %p7721_p6 = pnand %p7719_p5, %p8350_p0 }
  0x4e   : > { %p7722_p9 = pneg %p7721_p6 }
  0x50   : > { %p7727_p13 = pnand %p7725_p10, %p7722_p9 }
  0x52   : > { %7730 = shalt.err (!%p7727_p13)
}
  0x53   : > { %s7731_s29 = scalar_lea.vmem %s8340_s24, 32  ;;  %p7739_p4 = scmp.lt.s32.totalorder %s8340_s24, %s8340_s24 }
  0x54   : > { %p7732_p1 = scmp.ne.s32.totalorder %s8340_s24, %s7731_s29  ;;  %p7740_p7 = scmp.lt.s32.totalorder %s7731_s29, %s7731_s29 }
  0x56   : > { %p7734_p2 = pnand %p7732_p1, %p8350_p0  ;;  %p7741_p8 = por %p7740_p7, %p7739_p4 }
  0x58   : > { %p7735_p3 = pneg %p7734_p2 }
  0x5a   : > { %p7742_p11 = pnand %p7741_p8, %p7735_p3 }
  0x5c   : > { %7745 = shalt.err (!%p7742_p11)
}
  0x5d   : > { %s9330_s3 = smov 16   ;;  %s9332_s18 = smov 1  }
  0x5e   : > { %7181 = dma.hbm_to_vmem [thread:$0]  (!%p8336_p12), %s9363_s7, 32, %s8340_s24, [#allocation9], %s9330_s3, %s9330_s3, %s9332_s18  }
  0x5f   : > { %s8152_s21 = smov [#allocation11]   ;;  %s9364_s9 = sld [smem:[#allocation46_spill]] }
  0x60   : > { %s562_s2 = sshll.u32 %s8152_s21, 4  ;;  %s563_s2 = int_to_ptr.vmem [resolvable:$true] %s562_s2 }
  0x65   : > { %s7746_s20 = scalar_lea.hbm %s9364_s9, 96 }
  0x66   : > { %p7747_p5 = scmp.ne.s32.totalorder %s9364_s9, %s7746_s20  ;;  %p7753_p10 = scmp.lt.u32.totalorder %s7746_s20, %s9364_s9 }
  0x68   : > { %p7749_p6 = pnand %p7747_p5, %p8350_p0 }
  0x6a   : > { %p7750_p9 = pneg %p7749_p6 }
  0x6c   : > { %p7755_p13 = pnand %p7753_p10, %p7750_p9 }
  0x6e   : > { %7758 = shalt.err (!%p7755_p13)
}
  0x6f   : > { %s7759_s24 = scalar_lea.vmem %s563_s2, 96  ;;  %p7767_p4 = scmp.lt.s32.totalorder %s563_s2, %s563_s2 }
  0x70   : > { %p7760_p1 = scmp.ne.s32.totalorder %s563_s2, %s7759_s24  ;;  %p7768_p7 = scmp.lt.s32.totalorder %s7759_s24, %s7759_s24 }
  0x72   : > { %p7762_p2 = pnand %p7760_p1, %p8350_p0  ;;  %p7769_p8 = por %p7768_p7, %p7767_p4 }
  0x74   : > { %p7763_p3 = pneg %p7762_p2 }
  0x76   : > { %p7770_p11 = pnand %p7769_p8, %p7763_p3 }
  0x78   : > { %7773 = shalt.err (!%p7770_p11)
}
  0x79   : > { %s8153_s0 = smov 48   ;;  %s8154_s19 = smov 3  }
  0x7a   : > { %7187 = dma.hbm_to_vmem [thread:$0]  (!%p8336_p12), %s9364_s9, 96, %s563_s2, [#allocation12], %s8153_s0, %s8153_s0, %s8154_s19  }
  0x7b   : > { %s8155_s30 = smov [#allocation14]   ;;  %s8156_s26 = smov [#allocation17]  }
  0x7c   : > { %s588_s21 = sshll.u32 %s8155_s30, 4  ;;  %s614_s23 = sshll.u32 %s8156_s26, 4  ;;  %s589_s21 = int_to_ptr.vmem [resolvable:$true] %s588_s21  ;;  %s615_s23 = int_to_ptr.vmem [resolvable:$true] %s614_s23 }
  0x7d   : > { %s7774_s24 = scalar_lea.hbm %s9303_s11, 32 }
  0x7e   : > { %p7775_p5 = scmp.ne.s32.totalorder %s9303_s11, %s7774_s24  ;;  %p7781_p10 = scmp.lt.u32.totalorder %s7774_s24, %s9303_s11 }
  0x80   : > { %p7777_p6 = pnand %p7775_p5, %p8350_p0 }
  0x82   : > { %p7778_p9 = pneg %p7777_p6 }
  0x84   : > { %p7783_p13 = pnand %p7781_p10, %p7778_p9 }
  0x86   : > { %7786 = shalt.err (!%p7783_p13)
}
  0x87   : > { %s7787_s2 = scalar_lea.vmem %s589_s21, 32  ;;  %p7795_p4 = scmp.lt.s32.totalorder %s589_s21, %s589_s21 }
  0x88   : > { %p7788_p1 = scmp.ne.s32.totalorder %s589_s21, %s7787_s2  ;;  %p7796_p7 = scmp.lt.s32.totalorder %s7787_s2, %s7787_s2 }
  0x8a   : > { %p7790_p2 = pnand %p7788_p1, %p8350_p0  ;;  %p7797_p8 = por %p7796_p7, %p7795_p4 }
  0x8c   : > { %p7791_p3 = pneg %p7790_p2 }
  0x8e   : > { %p7798_p11 = pnand %p7797_p8, %p7791_p3 }
  0x90   : > { %7801 = shalt.err (!%p7798_p11)
}
  0x91   : > { %s9365_s3 = smov 1   ;;  %s9366_s18 = smov 16  }
  0x92   : > { %7193 = dma.hbm_to_vmem [thread:$0]  (!%p8336_p12), %s9303_s11, 32, %s589_s21, [#allocation15], %s9366_s18, %s9366_s18, %s9365_s3  }
  0x93   : > { %s7802_s5 = scalar_lea.hbm %s9305_s13, 64 }
  0x94   : > { %p7803_p5 = scmp.ne.s32.totalorder %s9305_s13, %s7802_s5  ;;  %p7809_p10 = scmp.lt.u32.totalorder %s7802_s5, %s9305_s13 }
  0x96   : > { %p7805_p6 = pnand %p7803_p5, %p8350_p0 }
  0x98   : > { %p7806_p9 = pneg %p7805_p6 }
  0x9a   : > { %p7811_p13 = pnand %p7809_p10, %p7806_p9 }
  0x9c   : > { %7814 = shalt.err (!%p7811_p13)
}
  0x9d   : > { %s7815_s29 = scalar_lea.vmem %s615_s23, 64  ;;  %p7823_p4 = scmp.lt.s32.totalorder %s615_s23, %s615_s23 }
  0x9e   : > { %p7816_p1 = scmp.ne.s32.totalorder %s615_s23, %s7815_s29  ;;  %p7824_p7 = scmp.lt.s32.totalorder %s7815_s29, %s7815_s29 }
  0xa0   : > { %p7818_p2 = pnand %p7816_p1, %p8350_p0  ;;  %p7825_p8 = por %p7824_p7, %p7823_p4 }
  0xa2   : > { %p7819_p3 = pneg %p7818_p2 }
  0xa4   : > { %p7826_p11 = pnand %p7825_p8, %p7819_p3 }
  0xa6   : > { %7829 = shalt.err (!%p7826_p11)
}
  0xa7   : > { %s9367_s21 = smov 2   ;;  %s9368_s24 = smov 32  }
  0xa8   : > { %7199 = dma.hbm_to_vmem [thread:$0]  (!%p8336_p12), %s9305_s13, 64, %s615_s23, [#allocation18], %s9368_s24, %s9368_s24, %s9367_s21  }
  0xa9   : > { %s8157_s16 = smov [#allocation20]   ;;  %s8158_s19 = smov [#allocation2]  }
  0xaa   : > { %s640_s0 = sshll.u32 %s8157_s16, 4  ;;  %s497_s5 = sshll.u32 %s8158_s19, 4  ;;  %s641_s0 = int_to_ptr.vmem [resolvable:$true] %s640_s0  ;;  %s498_s5 = int_to_ptr.vmem [resolvable:$true] %s497_s5 }
  0xab   : > { %s7830_s26 = scalar_lea.hbm %s9307_s15, 32 }
  0xac   : > { %p7831_p5 = scmp.ne.s32.totalorder %s9307_s15, %s7830_s26  ;;  %p7837_p10 = scmp.lt.u32.totalorder %s7830_s26, %s9307_s15 }
  0xae   : > { %p7833_p6 = pnand %p7831_p5, %p8350_p0 }
  0xb0   : > { %p7834_p9 = pneg %p7833_p6 }
  0xb2   : > { %p7839_p13 = pnand %p7837_p10, %p7834_p9 }
  0xb4   : > { %7842 = shalt.err (!%p7839_p13)
}
  0xb5   : > { %s7843_s23 = scalar_lea.vmem %s641_s0, 32  ;;  %p7851_p4 = scmp.lt.s32.totalorder %s641_s0, %s641_s0 }
  0xb6   : > { %p7844_p1 = scmp.ne.s32.totalorder %s641_s0, %s7843_s23  ;;  %p7852_p7 = scmp.lt.s32.totalorder %s7843_s23, %s7843_s23 }
  0xb8   : > { %p7846_p2 = pnand %p7844_p1, %p8350_p0  ;;  %p7853_p8 = por %p7852_p7, %p7851_p4 }
  0xba   : > { %p7847_p3 = pneg %p7846_p2 }
  0xbc   : > { %p7854_p11 = pnand %p7853_p8, %p7847_p3 }
  0xbe   : > { %7857 = shalt.err (!%p7854_p11)
}
  0xbf   : > { %7205 = dma.hbm_to_vmem [thread:$0]  (!%p8336_p12), %s9307_s15, 32, %s641_s0, [#allocation21], %s9366_s18, %s9366_s18, %s9365_s3  }
  0xc0   : > { %s7858_s16 = scalar_lea.hbm %s9296_s4, 4096 }
  0xc1   : > { %p7859_p5 = scmp.ne.s32.totalorder %s9296_s4, %s7858_s16  ;;  %p7865_p10 = scmp.lt.u32.totalorder %s7858_s16, %s9296_s4 }
  0xc3   : > { %p7861_p6 = pnand %p7859_p5, %p8350_p0 }
  0xc5   : > { %p7862_p9 = pneg %p7861_p6 }
  0xc7   : > { %p7867_p13 = pnand %p7865_p10, %p7862_p9 }
  0xc9   : > { %7870 = shalt.err (!%p7867_p13)
}
  0xca   : > { %s7871_s20 = scalar_lea.vmem %s498_s5, 4096  ;;  %p7879_p4 = scmp.lt.s32.totalorder %s498_s5, %s498_s5 }
  0xcb   : > { %p7872_p1 = scmp.ne.s32.totalorder %s498_s5, %s7871_s20  ;;  %p7880_p7 = scmp.lt.s32.totalorder %s7871_s20, %s7871_s20 }
  0xcd   : > { %p7874_p2 = pnand %p7872_p1, %p8350_p0  ;;  %p7881_p8 = por %p7880_p7, %p7879_p4 }
  0xcf   : > { %p7875_p3 = pneg %p7874_p2 }
  0xd1   : > { %p7882_p11 = pnand %p7881_p8, %p7875_p3 }
  0xd3   : > { %7885 = shalt.err (!%p7882_p11)
}
  0xd4   : > { %s9335_s3 = smov 128   ;;  %s9336_s18 = smov 8  }
  0xd5   : > { %7172 = dma.hbm_to_vmem [thread:$0]  (!%p8336_p12), %s9296_s4, 4096, %s498_s5, [#allocation3], %s9335_s3, %s9335_s3, %s9336_s18  }
  0xd6   : > { %s8161_s2 = smov [#allocation7]   ;;  %s7886_s24 = scalar_lea.hbm %s9298_s6, 2048 }
  0xd7   : > { %s523_s23 = sshll.u32 %s8161_s2, 4  ;;  %p7887_p5 = scmp.ne.s32.totalorder %s9298_s6, %s7886_s24  ;;  %s524_s23 = int_to_ptr.vmem [resolvable:$true] %s523_s23 }
  0xd8   : > { %p7893_p10 = scmp.lt.u32.totalorder %s7886_s24, %s9298_s6 }
  0xd9   : > { %p7889_p6 = pnand %p7887_p5, %p8350_p0 }
  0xdb   : > { %p7890_p9 = pneg %p7889_p6 }
  0xdd   : > { %p7895_p13 = pnand %p7893_p10, %p7890_p9 }
  0xdf   : > { %7898 = shalt.err (!%p7895_p13)
}
  0xe0   : > { %s7899_s5 = scalar_lea.vmem %s524_s23, 2048  ;;  %p7907_p4 = scmp.lt.s32.totalorder %s524_s23, %s524_s23 }
  0xe1   : > { %p7900_p1 = scmp.ne.s32.totalorder %s524_s23, %s7899_s5  ;;  %p7908_p7 = scmp.lt.s32.totalorder %s7899_s5, %s7899_s5 }
  0xe3   : > { %p7902_p2 = pnand %p7900_p1, %p8350_p0  ;;  %p7909_p8 = por %p7908_p7, %p7907_p4 }
  0xe5   : > { %p7903_p3 = pneg %p7902_p2 }
  0xe7   : > { %p7910_p11 = pnand %p7909_p8, %p7903_p3 }
  0xe9   : > { %7913 = shalt.err (!%p7910_p11)
}
  0xea   : > { %s9337_s30 = smov 64   ;;  %s8163_s26 = smov 4  }
  0xeb   : > { %7178 = dma.hbm_to_vmem [thread:$0]  (!%p8336_p12), %s9298_s6, 2048, %s524_s23, [#allocation6], %s9337_s30, %s9337_s30, %s8163_s26  }
  0xec   : > { %s8164_s29 = smov [#allocation10]   ;;  %s7914_s24 = scalar_lea.hbm %s9300_s8, 6144 }
  0xed   : > { %s549_s2 = sshll.u32 %s8164_s29, 4  ;;  %p7915_p5 = scmp.ne.s32.totalorder %s9300_s8, %s7914_s24  ;;  %s550_s2 = int_to_ptr.vmem [resolvable:$true] %s549_s2 }
  0xee   : > { %p7921_p10 = scmp.lt.u32.totalorder %s7914_s24, %s9300_s8 }
  0xef   : > { %p7917_p6 = pnand %p7915_p5, %p8350_p0 }
  0xf1   : > { %p7918_p9 = pneg %p7917_p6 }
  0xf3   : > { %p7923_p13 = pnand %p7921_p10, %p7918_p9 }
  0xf5   : > { %7926 = shalt.err (!%p7923_p13)
}
  0xf6   : > { %s7927_s23 = scalar_lea.vmem %s550_s2, 6144  ;;  %p7935_p4 = scmp.lt.s32.totalorder %s550_s2, %s550_s2 }
  0xf7   : > { %p7928_p1 = scmp.ne.s32.totalorder %s550_s2, %s7927_s23  ;;  %p7936_p7 = scmp.lt.s32.totalorder %s7927_s23, %s7927_s23 }
  0xf9   : > { %p7930_p2 = pnand %p7928_p1, %p8350_p0  ;;  %p7937_p8 = por %p7936_p7, %p7935_p4 }
  0xfb   : > { %p7931_p3 = pneg %p7930_p2 }
  0xfd   : > { %p7938_p11 = pnand %p7937_p8, %p7931_p3 }
  0xff   : > { %7941 = shalt.err (!%p7938_p11)
}
 0x100   : > { %s8165_s5 = smov 192   ;;  %s8166_s20 = smov 12  }
 0x101   : > { %7184 = dma.hbm_to_vmem [thread:$0]  (!%p8336_p12), %s9300_s8, 6144, %s550_s2, [#allocation9], %s8165_s5, %s8165_s5, %s8166_s20  }
 0x102   : > { %s8167_s9 = smov [#allocation13]   ;;  %s8168_s24 = smov [#allocation16]  }
 0x103   : > { %s575_s21 = sshll.u32 %s8167_s9, 4  ;;  %s601_s7 = sshll.u32 %s8168_s24, 4  ;;  %s576_s21 = int_to_ptr.vmem [resolvable:$true] %s575_s21  ;;  %s602_s7 = int_to_ptr.vmem [resolvable:$true] %s601_s7 }
 0x104   : > { %s7942_s25 = scalar_lea.hbm %s9302_s10, 2048 }
 0x105   : > { %p7943_p5 = scmp.ne.s32.totalorder %s9302_s10, %s7942_s25  ;;  %p7949_p10 = scmp.lt.u32.totalorder %s7942_s25, %s9302_s10 }
 0x107   : > { %p7945_p6 = pnand %p7943_p5, %p8350_p0 }
 0x109   : > { %p7946_p9 = pneg %p7945_p6 }
 0x10b   : > { %p7951_p13 = pnand %p7949_p10, %p7946_p9 }
 0x10d   : > { %7954 = shalt.err (!%p7951_p13)
}
 0x10e   : > { %s7955_s2 = scalar_lea.vmem %s576_s21, 2048  ;;  %p7963_p4 = scmp.lt.s32.totalorder %s576_s21, %s576_s21 }
 0x10f   : > { %p7956_p1 = scmp.ne.s32.totalorder %s576_s21, %s7955_s2  ;;  %p7964_p7 = scmp.lt.s32.totalorder %s7955_s2, %s7955_s2 }
 0x111   : > { %p7958_p2 = pnand %p7956_p1, %p8350_p0  ;;  %p7965_p8 = por %p7964_p7, %p7963_p4 }
 0x113   : > { %p7959_p3 = pneg %p7958_p2 }
 0x115   : > { %p7966_p11 = pnand %p7965_p8, %p7959_p3 }
 0x117   : > { %7969 = shalt.err (!%p7966_p11)
}
 0x118   : > { %s9369_s3 = smov 64   ;;  %s7970_s0 = scalar_lea.hbm %s9304_s12, 4096 }
 0x119   : > { %7190 = dma.hbm_to_vmem [thread:$0]  (!%p8336_p12), %s9302_s10, 2048, %s576_s21, [#allocation12], %s9369_s3, %s9369_s3, %s8163_s26  }
 0x11a   : > { %p7971_p5 = scmp.ne.s32.totalorder %s9304_s12, %s7970_s0  ;;  %p7977_p10 = scmp.lt.u32.totalorder %s7970_s0, %s9304_s12 }
 0x11c   : > { %p7973_p6 = pnand %p7971_p5, %p8350_p0 }
 0x11e   : > { %p7974_p9 = pneg %p7973_p6 }
 0x120   : > { %p7979_p13 = pnand %p7977_p10, %p7974_p9 }
 0x122   : > { %7982 = shalt.err (!%p7979_p13)
}
 0x123   : > { %s7983_s19 = scalar_lea.vmem %s602_s7, 4096  ;;  %p7991_p4 = scmp.lt.s32.totalorder %s602_s7, %s602_s7 }
 0x124   : > { %p7984_p1 = scmp.ne.s32.totalorder %s602_s7, %s7983_s19  ;;  %p7992_p7 = scmp.lt.s32.totalorder %s7983_s19, %s7983_s19 }
 0x126   : > { %p7986_p2 = pnand %p7984_p1, %p8350_p0  ;;  %p7993_p8 = por %p7992_p7, %p7991_p4 }
 0x128   : > { %p7987_p3 = pneg %p7986_p2 }
 0x12a   : > { %p7994_p11 = pnand %p7993_p8, %p7987_p3 }
 0x12c   : > { %7997 = shalt.err (!%p7994_p11)
}
 0x12d   : > { %s9370_s21 = smov 8   ;;  %s9371_s25 = smov 128  }
 0x12e   : > { %7196 = dma.hbm_to_vmem [thread:$0]  (!%p8336_p12), %s9304_s12, 4096, %s602_s7, [#allocation15], %s9371_s25, %s9371_s25, %s9370_s21  }
 0x12f   : > { %s8169_s18 = smov [#allocation19]   ;;  %s8170_s5 = smov [#allocation22]  }
 0x130   : > { %s627_s30 = sshll.u32 %s8169_s18, 4  ;;  %s657_s20 = sshll.u32 %s8170_s5, 4  ;;  %s628_s30 = int_to_ptr.vmem [resolvable:$true] %s627_s30  ;;  %s658_s20 = int_to_ptr.vmem [resolvable:$true] %s657_s20 }
 0x131   : > { %s7998_s9 = scalar_lea.hbm %s9306_s14, 4096 }
 0x132   : > { %p7999_p5 = scmp.ne.s32.totalorder %s9306_s14, %s7998_s9  ;;  %p8005_p10 = scmp.lt.u32.totalorder %s7998_s9, %s9306_s14 }
 0x134   : > { %p8001_p6 = pnand %p7999_p5, %p8350_p0 }
 0x136   : > { %p8002_p9 = pneg %p8001_p6 }
 0x138   : > { %p8007_p13 = pnand %p8005_p10, %p8002_p9 }
 0x13a   : > { %8010 = shalt.err (!%p8007_p13)
}
 0x13b   : > { %s8011_s7 = scalar_lea.vmem %s628_s30, 4096  ;;  %p8019_p4 = scmp.lt.s32.totalorder %s628_s30, %s628_s30 }
 0x13c   : > { %p8012_p1 = scmp.ne.s32.totalorder %s628_s30, %s8011_s7  ;;  %p8020_p7 = scmp.lt.s32.totalorder %s8011_s7, %s8011_s7 }
 0x13e   : > { %p8014_p2 = pnand %p8012_p1, %p8350_p0  ;;  %p8021_p8 = por %p8020_p7, %p8019_p4 }
 0x140   : > { %p8015_p3 = pneg %p8014_p2 }
 0x142   : > { %p8022_p11 = pnand %p8021_p8, %p8015_p3 }
 0x144   : > { %8025 = shalt.err (!%p8022_p11)
}
 0x145   : > { %7202 = dma.hbm_to_vmem [thread:$0]  (!%p8336_p12), %s9306_s14, 4096, %s628_s30, [#allocation18], %s9369_s3, %s9369_s3, %s8163_s26  }
 0x146   : > { %s8026_s5 = scalar_lea.hbm %s9309_s17, 16 }
 0x147   : > { %p8027_p5 = scmp.ne.s32.totalorder %s9309_s17, %s8026_s5  ;;  %p8033_p10 = scmp.lt.u32.totalorder %s8026_s5, %s9309_s17 }
 0x149   : > { %p8029_p6 = pnand %p8027_p5, %p8350_p0 }
 0x14b   : > { %p8030_p9 = pneg %p8029_p6 }
 0x14d   : > { %p8035_p13 = pnand %p8033_p10, %p8030_p9 }
 0x14f   : > { %8038 = shalt.err (!%p8035_p13)
}
 0x150   : > { %s8039_s16 = scalar_lea.vmem %s658_s20, 16  ;;  %s8046_s26 = scalar_lea.vmem %s658_s20, 32 }
 0x151   : > { %p8040_p1 = scmp.ne.s32.totalorder %s658_s20, %s8039_s16  ;;  %p8047_p4 = scmp.lt.s32.totalorder %s658_s20, %s658_s20 }
 0x152   : > { %p8048_p7 = scmp.lt.s32.totalorder %s8046_s26, %s8039_s16 }
 0x153   : > { %p8042_p2 = pnand %p8040_p1, %p8350_p0 }
 0x154   : > { %p8049_p8 = por %p8048_p7, %p8047_p4 }
 0x155   : > { %p8043_p3 = pneg %p8042_p2 }
 0x157   : > { %p8050_p11 = pnand %p8049_p8, %p8043_p3 }
 0x159   : > { %8053 = shalt.err (!%p8050_p11)
}
 0x15a   : > { %7208 = dma.hbm_to_vmem [thread:$0]  (!%p8336_p12), %s9309_s17, 16, %s658_s20, [#allocation21]  }
 0x15b   : > { %p9372_p5 = scmp.ne.s32.totalorder %s9359_s27, 0 }
 0x15c   : > { %p9373_p6 = scmp.eq.s32.totalorder (!%p9372_p5), %s8300_s1, 0 }
 0x15d   : > { %688 = sbr.rel (%p9372_p5) target bundleno = 14039 (0x36d7), region = 96 }
 0x164   : > { %8099 = dma.done.wait (%p9373_p6), [#allocation3], 4096   ;;  %p9374_p0 = pmov %p9373_p6 }
 0x166   : > { %8101 = vsyncadd (%p9374_p0), [#allocation3], 4294963200  ;;  %p9375_p9 = pmov %p9374_p0 }
 0x167   : > { %p9376_p10 = pmov %p9374_p0 }
 0x168   : > { %8103 = dma.done.wait (%p9375_p9), [#allocation6], 2112  }
 0x169   : > { %8105 = vsyncadd (%p9376_p10), [#allocation6], 4294965184  ;;  %p9377_p13 = pmov %p9374_p0 }
 0x16a   : > { %p9378_p12 = pmov %p9374_p0 }
 0x16b   : > { %8107 = dma.done.wait (%p9377_p13), [#allocation9], 6176  }
 0x16c   : > { %8109 = vsyncadd (%p9378_p12), [#allocation9], 4294961120  ;;  %p9379_p1 = pmov %p9374_p0 }
 0x16d   : > { %p9380_p2 = pmov %p9374_p0 }
 0x16e   : > { %8111 = dma.done.wait (%p9379_p1), [#allocation12], 2144  }
 0x16f   : > { %8113 = vsyncadd (%p9380_p2), [#allocation12], 4294965152  ;;  %p9381_p3 = pmov %p9374_p0 }
 0x170   : > { %p9382_p4 = pmov %p9374_p0 }
 0x171   : > { %8115 = dma.done.wait (%p9381_p3), [#allocation15], 4128  }
 0x172   : > { %8117 = vsyncadd (%p9382_p4), [#allocation15], 4294963168  ;;  %p9383_p7 = pmov %p9374_p0 }
 0x173   : > { %p9384_p8 = pmov %p9374_p0 }
 0x174   : > { %8119 = dma.done.wait (%p9383_p7), [#allocation18], 4160  }
 0x175   : > { %8121 = vsyncadd (%p9384_p8), [#allocation18], 4294963136  ;;  %p9385_p11 = pmov %p9374_p0 }
 0x176   : > { %p9386_p5 = pmov %p9374_p0 }
 0x177   : > { %8123 = dma.done.wait (%p9385_p11), [#allocation21], 48  }
 0x178   : > { %8125 = vsyncadd (%p9386_p5), [#allocation21], 4294967248  ;;  %v8171_v0 = vmov 0.0   ;;  %v8172_v1 = vmov 0   ;;  %vm8173_vm0 = vmmov 0   ;;  %s9387_s28 = sld [smem:[#allocation42_spill]]  ;;  %v812_v32 = vlaneseq }
 0x179   : > { %6687 = vmatprep.subr.bf16.mxu0 %v8171_v0  ;;  %1069 = vmatprep.mubr.bf16.mxu1 %v8172_v1  ;;  %v7364_v2 = vld [vmem:[#allocation2 + $0x4] ss:$8 sps:$4 sm:$0xff]   ;;  %v7366_v3 = vld [vmem:[#allocation2] ss:$8 sps:$4 sm:$0xff]   ;;  %v7367_v4 = vld [vmem:[#allocation2 + $0x14] ss:$8 sps:$4 sm:$0xff]  }
 0x17a   : > { %6703 = vmatprep.mubr.msk.bf16.mxu0 %vm8173_vm0, %v8171_v0  ;;  %1037 = vmatprep.subr.bf16.mxu1 %v7364_v2  ;;  %v7369_v5 = vld [vmem:[#allocation2 + $0x10] ss:$8 sps:$4 sm:$0xff]   ;;  %v7370_v6 = vld [vmem:[#allocation2 + $0x24] ss:$8 sps:$4 sm:$0xff]   ;;  %v7372_v8 = vld [vmem:[#allocation2 + $0x20] ss:$8 sps:$4 sm:$0xff]  }
 0x17b   : > { %1038 = vmatpush1.bf16.msra.mxu1 %v7366_v3  ;;  %v7374_v10 = vld [vmem:[#allocation2 + $0x34] ss:$8 sps:$4 sm:$0xff]   ;;  %p796_p6 = scmp.lt.s32.totalorder %s8300_s1, 1  ;;  %v7376_v12 = vld [vmem:[#allocation2 + $0x30] ss:$8 sps:$4 sm:$0xff]   ;;  %s9388_s3 = sld [smem:[#allocation41_spill]] }
 0x17c   : > { %1039 = vmatprep.subr.bf16.mxu1 %v7367_v4  ;;  %v7378_v13 = vld [vmem:[#allocation2 + $0x44] ss:$8 sps:$4 sm:$0xff]   ;;  %v7380_v15 = vld [vmem:[#allocation2 + $0x40] ss:$8 sps:$4 sm:$0xff]   ;;  %v7382_v16 = vld [vmem:[#allocation2 + $0x54] ss:$8 sps:$4 sm:$0xff]  }
 0x17d   : > { %s797_s2 = scalar_select %p796_p6, %s8300_s1, 1  ;;  %v7384_v18 = vld [vmem:[#allocation2 + $0x50] ss:$8 sps:$4 sm:$0xff]   ;;  %v7386_v19 = vld [vmem:[#allocation2 + $0x64] ss:$8 sps:$4 sm:$0xff]   ;;  %v8174_v31 = vmov 0.0|0.0  }
 0x17e   : > { %v7373_v7 = vld [vmem:[%s9387_s28] sm:$0xff]   ;;  %v7377_v9 = vld [vmem:[%s9387_s28 + $0x8] sm:$0xff]   ;;  %v7381_v11 = vld [vmem:[%s9387_s28 + $0x10] sm:$0xff]   ;;  %s9389_s23 = sld [smem:[#allocation40_spill]]  ;;  %v8704_v33 = vshrl.u32 %v812_v32, 7  ;;  %vm1080_vm1 = vcmask 261120  }
 0x17f   : > { %6688 = vmatpush3.bf16.msra.mxu0 %v7373_v7  ;;  %1040 = vmatpush1.bf16.msra.mxu1 %v7369_v5  ;;  %v7385_v14 = vld [vmem:[%s9387_s28 + $0x18] sm:$0xff]   ;;  %v7389_v17 = vld [vmem:[%s9387_s28 + $0x20] sm:$0xff]   ;;  %s6481_s0 = sshll.u32 %s797_s2, 4  ;;  %s6191_s29 = sshll.u32 %s797_s2, 3  ;;  %v7393_v20 = vld [vmem:[%s9387_s28 + $0x28] sm:$0xff]   ;;  %vm1161_vm3 = vcmask 130048  }
 0x180   : > { %6689 = vmatprep.subr.bf16.mxu0 %v8171_v0  ;;  %1041 = vmatprep.subr.bf16.mxu1 %v7370_v6  ;;  %v7388_v21 = vld [vmem:[#allocation2 + $0x60] ss:$8 sps:$4 sm:$0xff]   ;;  %v7390_v22 = vld [vmem:[#allocation2 + $0x74] ss:$8 sps:$4 sm:$0xff]   ;;  %v7392_v24 = vld [vmem:[#allocation2 + $0x70] ss:$8 sps:$4 sm:$0xff]  }
 0x181   : > { %s804_s30 = scalar_lea.vmem %s9388_s3, %s6481_s0  ;;  %v7394_v23 = vld [vmem:[%s9387_s28 + $0x30] sm:$0xff]   ;;  %v7395_v27 = vld [vmem:[%s9387_s28 + $0x38] sm:$0xff]   ;;  %v8707_v34 = vsub.s32 0, %v8704_v33  ;;  %v945_v35 = vld [vmem:[#allocation5] sm:$0x3]  ;;  %v8710_v36 = vsub.s32 1, %v8704_v33 }
 0x182   : > { %v807_v25 = vld [vmem:[%s804_s30] sm:$0xff]  ;;  %v808_v26 = vld [vmem:[%s804_s30 + $0x8] sm:$0xff]  ;;  %vm8716_vm2 = vmpackc.low %vm1080_vm1, %vm1080_vm1  ;;  %s9392_s5 = sld [smem:[#allocation43_spill]]  ;;  %s8175_s0 = smov 96   ;;  %vm1780_vm4 = vcmask 523264   ;;  %vm1782_vm5 = vcmask 785408  }
 0x183   : > { %6690 = vmatpush3.bf16.msra.mxu0 %v7377_v9  ;;  %1042 = vmatpush1.bf16.msra.mxu1 %v7372_v8  ;;  %v8691_v29 = vpack.c.bf16 %v808_v26, %v807_v25  ;;  %v950_v37 = vrot.slane %v945_v35, %v8707_v34  ;;  %v954_v39 = vrot.slane %v945_v35, %v8710_v36  ;;  %s8177_s9 = smov 32   ;;  %s9393_s26 = sld [smem:[#allocation47_spill]]  ;;  %vm2260_vm7 = vcmask 64512  }
 0x184   : > { %6691 = vmatprep.subr.bf16.mxu0 %v8171_v0  ;;  %1043 = vmatprep.subr.bf16.mxu1 %v7374_v10  ;;  %s799_s7 = scalar_lea.vmem %s9389_s23, %s6191_s29  ;;  %s8176_s29 = smov 64  }
 0x185   : > { %v8689_v28 = vld [vmem:[%s799_s7] sm:$0xff]  ;;  %s9397_s20 = sld [smem:[#allocation33_spill]]  ;;  %s6478_s2 = sshll.u32 %s8300_s1, 7 }
 0x186   : > { %v817_v30 = vpack.c.bf16 %v8689_v28, %v8689_v28  ;;  %s9399_s16 = sld [smem:[#allocation49_spill]]  ;;  %s8178_s1 = smov [#allocation23]  }
 0x187   : > { %6692 = vmatpush3.bf16.msra.mxu0 %v7381_v11  ;;  %1044 = vmatpush1.bf16.msra.mxu1 %v7376_v12  ;;  %s8058_s22 = sshll.u32 %s8178_s1, 4  ;;  %s8059_s22 = int_to_ptr.vmem [resolvable:$false] %s8058_s22 }
 0x188   : > { %6693 = vmatprep.subr.bf16.mxu0 %v8171_v0  ;;  %1045 = vmatprep.subr.bf16.mxu1 %v7378_v13  ;;  %v6194_v53 = vld [vmem:[%s9392_s5] ss:$0 sm:$0xff] }
 0x18b   : > { %6694 = vmatpush3.bf16.msra.mxu0 %v7385_v14  ;;  %1046 = vmatpush1.bf16.msra.mxu1 %v7380_v15  ;;  %s793_s23 = sand.u32 1, %s9397_s20   ;;  %s8060_s20 = scalar_lea.vmem %s8059_s22, 256 }
 0x18c   : > { %6695 = vmatprep.subr.bf16.mxu0 %v8171_v0  ;;  %1047 = vmatprep.subr.bf16.mxu1 %v7382_v16  ;;  %s6190_s7 = sshll.u32 %s793_s23, 3  ;;  %s9252_s3 = scalar_lea.hbm %s9399_s16, %s6478_s2 }
 0x18d   : > { %s795_s21 = scalar_lea.vmem [#allocation23], %s6190_s7  ;;  %s5950_s30 = scalar_lea.sflag [#allocation4], %s793_s23 }
 0x18e   : > { %s5963_s25 = sshll.u32 %s795_s21, 4  ;;  %s9247_s25 = int_to_ptr.vmem [resolvable:$true] %s5963_s25 }
 0x18f   : > { %6696 = vmatpush3.bf16.msra.mxu0 %v7389_v17  ;;  %1048 = vmatpush1.bf16.msra.mxu1 %v7384_v18  ;;  %s8054_s27 = scalar_lea.vmem %s9247_s25, 128  ;;  %p8061_p12 = scmp.lt.s32.totalorder %s9247_s25, %s8059_s22 }
 0x190   : > { %6697 = vmatprep.subr.bf16.mxu0 %v8171_v0  ;;  %1049 = vmatprep.subr.bf16.mxu1 %v7386_v19  ;;  %p8055_p0 = scmp.ne.s32.totalorder %s9247_s25, %s8054_s27  ;;  %p8062_p1 = scmp.lt.s32.totalorder %s8060_s20, %s8054_s27 }
 0x192   : > { %p8063_p2 = por %p8062_p1, %p8061_p12 }
 0x193   : > { %6698 = vmatpush3.bf16.msra.mxu0 %v7393_v20  ;;  %1050 = vmatpush1.bf16.msra.mxu1 %v7388_v21 }
 0x194   : > { %6699 = vmatprep.subr.bf16.mxu0 %v8171_v0  ;;  %1051 = vmatprep.subr.bf16.mxu1 %v7390_v22 }
 0x197   : > { %6700 = vmatpush3.bf16.msra.mxu0 %v7394_v23  ;;  %1052 = vmatpush1.bf16.msra.mxu1 %v7392_v24 }
 0x198   : > { %6701 = vmatprep.subr.bf16.mxu0 %v8171_v0  ;;  %7059 = vmatprep.subr.bf16.mxu1 %v8174_v31 }
 0x19a   : > { %1070 = vmatmul.mubr.bf16.vlgmr.msra.gmra.mrb[0].mxu1 %v8691_v29 }
 0x19b   : > { %6702 = vmatpush3.bf16.msra.mxu0 %v7395_v27  ;;  %6711 = vmatprep.mubr.msk.f32.mxu1 %vm8173_vm0, %v8171_v0 }
 0x19c   : > { %7066 = vmatprep.subr.bf16.mxu0 %v8174_v31 }
 0x19e   : > { %6704 = vmatmul.mubr.bf16.vlgmr.msra.gmra.mrb[0].mxu0 %v817_v30 }
 0x19f   : > { %6725 = vmatprep.mubr.msk.f32.mxu0 %vm8173_vm0, %v8171_v0 }
 0x26d   : > { %v1071_v38 = vpop.f32.mrb[0].mxu1 }
 0x26e   : > { %v1073_v40 = vpop.f32.mrb[1].mxu1  ;;  %v1072_v42 = vadd.f32 %v1071_v38, %v950_v37 }
 0x26f   : > { %v1075_v41 = vpop.f32.mrb[2].mxu1  ;;  %v1074_v46 = vadd.f32 %v1073_v40, %v954_v39 }
 0x270   : > { %v1076_v43 = vadd.f32 %v1075_v41, %v950_v37  ;;  %v1077_v44 = vpop.f32.mrb[3].mxu1 }
 0x271   : > { %v923_v45 = vpop.f32.mrb[0].mxu0  ;;  %v1078_v47 = vadd.f32 %v1077_v44, %v954_v39 }
 0x272   : > { %v6705_v49 = vpop.f32.mrb[1].mxu0  ;;  %v7060_v50 = vpack.c.bf16 %v1076_v43, %v1072_v42  ;;  %v8720_v51 = vpack.i.bf16 %v1076_v43, %v1072_v42  ;;  %v8732_v57 = vadd.f32 %v6194_v53, %v923_v45 }
 0x273   : > { %v926_v52 = vpop.f32.mrb[2].mxu0  ;;  %v7064_v55 = vpack.c.bf16 %v1078_v47, %v1074_v46  ;;  %v8725_v56 = vpack.i.bf16 %v1078_v47, %v1074_v46 }
 0x274   : > { %v6706_v54 = vpop.f32.mrb[3].mxu0  ;;  %7305 = vrot.lane.b32.xlu0 %v8720_v51, %s8175_s0  ;;  %7062 = vmatpush3.bf16.xpose.msk.msra.mxu1 %vm8716_vm2, %v7060_v50 }
 0x275   : > { %7063 = vmatprep.subr.bf16.mxu1 %v8174_v31 }
 0x278   : > { %1246 = vrot.lane.b32.xlu0 %v8732_v57, %s8175_s0 }
 0x27b   : > { %6712 = vmatmul.mubr.msk.f32.vlgmr.msra.gmra.mrb[4].mxu1 %vm1080_vm1, %v8732_v57 }
 0x27c   : > { %7065 = vmatpush3.bf16.msra.mxu1 %v7064_v55  ;;  %6718 = vmatprep.mubr.msk.f32.mxu1 %vm8173_vm0, %v8171_v0 }
 0x27d   : > { %7070 = vmatprep.subr.bf16.mxu1 %v8174_v31 }
 0x2e6   : > { %v7306_v58 = vpop.permute.xlu0 %7305 }
 0x2e7   : > { %v7308_v59 = vunpack.i.h.bf16 %v7306_v58  ;;  %v7307_v60 = vunpack.i.l.bf16 %v7306_v58 }
 0x2e9   : > { %v7067_v61 = vpack.c.bf16 %v7308_v59, %v7307_v60 }
 0x2ea   : > { %v1247_v62 = vpop.permute.xlu0 %1246 }
 0x2eb   : > { %7069 = vmatpush3.bf16.xpose.msk.msra.mxu0 %vm8716_vm2, %v7067_v61 }
 0x2ec   : > { %7077 = vmatprep.subr.bf16.mxu0 %v8174_v31 }
 0x2f2   : > { %6726 = vmatmul.mubr.msk.f32.vlgmr.msra.gmra.mrb[4].mxu0 %vm1080_vm1, %v1247_v62 }
 0x2f3   : > { %6746 = vmatprep.mubr.msk.f32.mxu0 %vm8173_vm0, %v8171_v0 }
 0x34e   : > { %v1156_v63 = vpop.f32.mrb[4].mxu1 }
 0x34f   : > { %v1160_v2 = vmul.f32 0.17677669, %v1156_v63  ;;  %v6713_v3 = vpop.f32.mrb[5].mxu1 }
 0x351   : > { %v1162_v4 = vsel %vm1161_vm3, %v1160_v2, -inf }
 0x352   : > { %1163 = vmax.xlane.f32.xlu1 %v1162_v4 }
 0x3c5   : > { %v1324_v5 = vpop.f32.mrb[4].mxu0 }
 0x3c6   : > { %v1328_v6 = vmul.f32 0.17677669, %v1324_v5  ;;  %v6727_v7 = vpop.f32.mrb[5].mxu0 }
 0x3c8   : > { %v1329_v8 = vsel %vm1161_vm3, %v1328_v6, -inf }
 0x3c9   : > { %1330 = vmax.xlane.f32.xlu1 %v1329_v8 }
 0x3da   : > { %7310 = vrot.lane.b32.xlu1 %v8725_v56, %s8175_s0 }
 0x3de   : > { %7315 = vrot.lane.b32.xlu1 %v8720_v51, %s8176_s29 }
 0x3df   : > { %v1164_v9 = vpop.xlane.xlu1 %1163 }
 0x3e0   : > { %v1165_v10 = vsub.f32 %v1160_v2, %v1164_v9 }
 0x3e2   : > { %v1166_v11 = vmul.f32 1.442695, %v1165_v10 }
 0x3e4   : > { %7612 = vpow2.f32 %v1166_v11 }
 0x3ee   : > { %v7613_v12 = vpop.eup %7612 }
 0x3ef   : > { %v1168_v13 = vsel %vm1161_vm3, %v7613_v12, 0.0 }
 0x3f0   : > { %1169 = vadd.xlane.f32.xlu0 %v1168_v13 }
 0x406   : > { %7320 = vrot.lane.b32.xlu0 %v8725_v56, %s8176_s29 }
 0x456   : > { %v1331_v14 = vpop.xlane.xlu1 %1330 }
 0x457   : > { %v1332_v15 = vsub.f32 %v1328_v6, %v1331_v14 }
 0x459   : > { %v1333_v16 = vmul.f32 1.442695, %v1332_v15 }
 0x45a   : > { %v7311_v23 = vpop.permute.xlu1 %7310 }
 0x45b   : > { %7614 = vpow2.f32 %v1333_v16  ;;  %v7313_v25 = vunpack.i.h.bf16 %v7311_v23  ;;  %v7312_v26 = vunpack.i.l.bf16 %v7311_v23 }
 0x45d   : > { %v7071_v35 = vpack.c.bf16 %v7313_v25, %v7312_v26  ;;  %v7398_v25 = vld [vmem:[#allocation7 + $0x10] sm:$0xff]   ;;  %v7399_v26 = vld [vmem:[#allocation7 + $0x18] sm:$0xff]  }
 0x45e   : > { %v7316_v37 = vpop.permute.xlu1 %7315 }
 0x45f   : > { %v7318_v39 = vunpack.i.h.bf16 %v7316_v37  ;;  %v7317_v40 = vunpack.i.l.bf16 %v7316_v37  ;;  %v7403_v37 = vld [vmem:[#allocation7 + $0x38] sm:$0xff]  }
 0x461   : > { %v7074_v43 = vpack.c.bf16 %v7318_v39, %v7317_v40 }
 0x465   : > { %v7615_v17 = vpop.eup %7614 }
 0x466   : > { %v1335_v18 = vsel %vm1161_vm3, %v7615_v17, 0.0 }
 0x467   : > { %1336 = vadd.xlane.f32.xlu1 %v1335_v18 }
 0x478   : > { %1421 = vrot.lane.b32.xlu1 %v8732_v57, %s8176_s29 }
 0x47d   : > { %v1170_v19 = vpop.xlane.xlu0 %1169 }
 0x47e   : > { %7616 = vrcp.f32 %v1170_v19 }
 0x481   : > { %v7321_v20 = vpop.permute.xlu0 %7320 }
 0x482   : > { %v7323_v21 = vunpack.i.h.bf16 %v7321_v20  ;;  %v7322_v22 = vunpack.i.l.bf16 %v7321_v20 }
 0x484   : > { %v7078_v24 = vpack.c.bf16 %v7323_v21, %v7322_v22 }
 0x486   : > { %7079 = vmatpush3.bf16.msra.mxu0 %v7078_v24  ;;  %v7397_v24 = vld [vmem:[#allocation7 + $0x8] sm:$0xff]  }
 0x487   : > { %7080 = vmatprep.subr.bf16.mxu0 %v8174_v31 }
 0x488   : > { %v7617_v27 = vpop.eup %7616 }
 0x489   : > { %v1172_v30 = vmul.f32 %v7617_v27, %v7613_v12  ;;  %v7400_v27 = vld [vmem:[#allocation7 + $0x20] sm:$0xff]  }
 0x48b   : > { %6719 = vmatmul.mubr.msk.f32.vlgmr.msra.gmra.mrb[6].mxu1 %vm1161_vm3, %v1172_v30  ;;  %v7401_v30 = vld [vmem:[#allocation7 + $0x28] sm:$0xff]  }
 0x48c   : > { %7072 = vmatpush3.bf16.msra.mxu1 %v7071_v35  ;;  %6732 = vmatprep.mubr.msk.f32.mxu1 %vm8173_vm0, %v8171_v0  ;;  %v7402_v35 = vld [vmem:[#allocation7 + $0x30] sm:$0xff]  }
 0x48d   : > { %7073 = vmatprep.subr.bf16.mxu1 %v8174_v31 }
 0x4f4   : > { %v1337_v38 = vpop.xlane.xlu1 %1336 }
 0x4f5   : > { %7618 = vrcp.f32 %v1337_v38 }
 0x4f8   : > { %v1422_v44 = vpop.permute.xlu1 %1421 }
 0x4ff   : > { %v7619_v41 = vpop.eup %7618 }
 0x500   : > { %v1339_v42 = vmul.f32 %v7619_v41, %v7615_v17 }
 0x502   : > { %6733 = vmatmul.mubr.msk.f32.vlgmr.msra.gmra.mrb[8].mxu1 %vm1161_vm3, %v1339_v42 }
 0x503   : > { %7076 = vmatpush3.bf16.xpose.msk.msra.mxu1 %vm8716_vm2, %v7074_v43  ;;  %6739 = vmatprep.mubr.msk.f32.mxu1 %vm8173_vm0, %v8171_v0 }
 0x504   : > { %7084 = vmatprep.subr.bf16.mxu1 %v8174_v31 }
 0x50a   : > { %6740 = vmatmul.mubr.msk.f32.vlgmr.msra.gmra.mrb[10].mxu1 %vm1080_vm1, %v1422_v44 }
 0x50b   : > { %6760 = vmatprep.mubr.msk.f32.mxu1 %vm8173_vm0, %v8171_v0 }
 0x55e   : > { %v8773_v45 = vpop.f32.mrb[6].mxu1 }
 0x55f   : > { %v6720_v46 = vpop.f32.mrb[7].mxu1 }
 0x5d5   : > { %v1417_v47 = vpop.f32.mrb[8].mxu1 }
 0x5d6   : > { %v6734_v49 = vpop.f32.mrb[9].mxu1 }
 0x5d7   : > { %v6235_v49 = vld [vmem:[#allocation8] ss:$0 sm:$0xff] }
 0x5dd   : > { %v1499_v50 = vpop.f32.mrb[10].mxu1 }
 0x5de   : > { %v1503_v52 = vmul.f32 0.17677669, %v1499_v50  ;;  %v6741_v53 = vpop.f32.mrb[11].mxu1 }
 0x5e0   : > { %v1504_v54 = vsel %vm1161_vm3, %v1503_v52, -inf }
 0x5e1   : > { %1505 = vmax.xlane.f32.xlu1 %v1504_v54 }
 0x66e   : > { %v1506_v55 = vpop.xlane.xlu1 %1505 }
 0x66f   : > { %v1507_v58 = vsub.f32 %v1503_v52, %v1506_v55 }
 0x671   : > { %v1508_v59 = vmul.f32 1.442695, %v1507_v58 }
 0x673   : > { %7620 = vpow2.f32 %v1508_v59  ;;  %v7406_v59 = vld [vmem:[#allocation10 + $0x4] ss:$12 sps:$4 sm:$0xff]  }
 0x67d   : > { %v7621_v60 = vpop.eup %7620 }
 0x67e   : > { %v1510_v61 = vsel %vm1161_vm3, %v7621_v60, 0.0 }
 0x67f   : > { %1511 = vadd.xlane.f32.xlu0 %v1510_v61  ;;  %v7410_v61 = vld [vmem:[#allocation10 + $0x1c] ss:$12 sps:$4 sm:$0xff]  }
 0x695   : > { %7325 = vrot.lane.b32.xlu0 %v8720_v51, %s8177_s9 }
 0x699   : > { %1594 = vrot.lane.b32.xlu0 %v8732_v57, %s8177_s9 }
 0x70c   : > { %v1512_v62 = vpop.xlane.xlu0 %1511 }
 0x70d   : > { %7622 = vrcp.f32 %v1512_v62  ;;  %v7411_v62 = vld [vmem:[#allocation10 + $0x20] ss:$12 sps:$4 sm:$0xff]  }
 0x710   : > { %v7326_v63 = vpop.permute.xlu0 %7325 }
 0x711   : > { %v7328_v2 = vunpack.i.h.bf16 %v7326_v63  ;;  %v7327_v3 = vunpack.i.l.bf16 %v7326_v63  ;;  %v7408_v63 = vld [vmem:[#allocation10 + $0x18] ss:$12 sps:$4 sm:$0xff]  }
 0x713   : > { %v7081_v6 = vpack.c.bf16 %v7328_v2, %v7327_v3  ;;  %v7414_v2 = vld [vmem:[#allocation10 + $0x34] ss:$12 sps:$4 sm:$0xff]   ;;  %v7412_v3 = vld [vmem:[#allocation10 + $0x30] ss:$12 sps:$4 sm:$0xff]  }
 0x714   : > { %v1595_v51 = vpop.permute.xlu0 %1594 }
 0x717   : > { %v7623_v4 = vpop.eup %7622 }
 0x718   : > { %v1514_v5 = vmul.f32 %v7623_v4, %v7621_v60  ;;  %v7407_v60 = vld [vmem:[#allocation10 + $0x8] ss:$12 sps:$4 sm:$0xff]  }
 0x71a   : > { %6747 = vmatmul.mubr.msk.f32.vlgmr.msra.gmra.mrb[6].mxu0 %vm1161_vm3, %v1514_v5 }
 0x71b   : > { %7083 = vmatpush3.bf16.xpose.msk.msra.mxu0 %vm8716_vm2, %v7081_v6  ;;  %6753 = vmatprep.mubr.msk.f32.mxu0 %vm8173_vm0, %v8171_v0 }
 0x71c   : > { %2101 = vmatprep.subr.bf16.mxu0 %v7406_v59 }
 0x722   : > { %6754 = vmatmul.mubr.msk.f32.vlgmr.msra.gmra.mrb[8].mxu0 %vm1080_vm1, %v1595_v51  ;;  %v7415_v51 = vld [vmem:[#allocation10 + $0x38] ss:$12 sps:$4 sm:$0xff]  }
 0x723   : > { %2133 = vmatprep.mubr.bf16.mxu0 %v8172_v1 }
 0x7ed   : > { %v1590_v57 = vpop.f32.mrb[6].mxu0 }
 0x7ee   : > { %v6748_v7 = vpop.f32.mrb[7].mxu0 }
 0x7ef   : > { %v7416_v7 = vld [vmem:[#allocation10 + $0x48] ss:$12 sps:$4 sm:$0xff]  }
 0x7f5   : > { %v1672_v8 = vpop.f32.mrb[8].mxu0 }
 0x7f6   : > { %v1676_v9 = vmul.f32 0.17677669, %v1672_v8  ;;  %v6755_v10 = vpop.f32.mrb[9].mxu0  ;;  %v7419_v8 = vld [vmem:[#allocation10 + $0x50] ss:$12 sps:$4 sm:$0xff]  }
 0x7f7   : > { %v7420_v10 = vld [vmem:[#allocation10 + $0x60] ss:$12 sps:$4 sm:$0xff]  }
 0x7f8   : > { %v1677_v11 = vsel %vm1161_vm3, %v1676_v9, -inf }
 0x7f9   : > { %1678 = vmax.xlane.f32.xlu0 %v1677_v11  ;;  %v7423_v11 = vld [vmem:[#allocation10 + $0x68] ss:$12 sps:$4 sm:$0xff]  }
 0x886   : > { %v1679_v12 = vpop.xlane.xlu0 %1678 }
 0x887   : > { %v1680_v13 = vsub.f32 %v1676_v9, %v1679_v12  ;;  %v7422_v9 = vld [vmem:[#allocation10 + $0x64] ss:$12 sps:$4 sm:$0xff]   ;;  %v7426_v12 = vld [vmem:[#allocation10 + $0x7c] ss:$12 sps:$4 sm:$0xff]  }
 0x889   : > { %v1681_v14 = vmul.f32 1.442695, %v1680_v13  ;;  %v7424_v13 = vld [vmem:[#allocation10 + $0x78] ss:$12 sps:$4 sm:$0xff]  }
 0x88b   : > { %7624 = vpow2.f32 %v1681_v14  ;;  %v7427_v14 = vld [vmem:[#allocation10 + $0x80] ss:$12 sps:$4 sm:$0xff]  }
 0x895   : > { %v7625_v15 = vpop.eup %7624 }
 0x896   : > { %v1683_v16 = vsel %vm1161_vm3, %v7625_v15, 0.0 }
 0x897   : > { %1684 = vadd.xlane.f32.xlu1 %v1683_v16  ;;  %v7428_v16 = vld [vmem:[#allocation10 + $0x90] ss:$12 sps:$4 sm:$0xff]  }
 0x8a8   : > { %7330 = vrot.lane.b32.xlu1 %v8725_v56, %s8177_s9  ;;  %v7396_v56 = vld [vmem:[#allocation7] sm:$0xff]  }
 0x8ac   : > { %1768 = vrot.lane.b32.xlu1 %v1417_v47, %s8177_s9 }
 0x8b0   : > { %1772 = vrot.lane.b32.xlu1 %v1590_v57, %s8176_s29  ;;  %v7418_v57 = vld [vmem:[#allocation10 + $0x4c] ss:$12 sps:$4 sm:$0xff]  }
 0x924   : > { %v1685_v17 = vpop.xlane.xlu1 %1684 }
 0x925   : > { %7626 = vrcp.f32 %v1685_v17  ;;  %v7431_v17 = vld [vmem:[#allocation10 + $0x98] ss:$12 sps:$4 sm:$0xff]  }
 0x928   : > { %v7331_v18 = vpop.permute.xlu1 %7330 }
 0x929   : > { %v7333_v19 = vunpack.i.h.bf16 %v7331_v18  ;;  %v7332_v20 = vunpack.i.l.bf16 %v7331_v18  ;;  %v7434_v18 = vld [vmem:[#allocation10 + $0xac] ss:$12 sps:$4 sm:$0xff]  }
 0x92b   : > { %v7085_v21 = vpack.c.bf16 %v7333_v19, %v7332_v20  ;;  %v7432_v19 = vld [vmem:[#allocation10 + $0xa8] ss:$12 sps:$4 sm:$0xff]   ;;  %v7435_v20 = vld [vmem:[#allocation10 + $0xb0] ss:$12 sps:$4 sm:$0xff]  }
 0x92c   : > { %v1769_v40 = vpop.permute.xlu1 %1768 }
 0x92d   : > { %7086 = vmatpush3.bf16.msra.mxu1 %v7085_v21  ;;  %v1779_v42 = vsel %vm1080_vm1, %v8773_v45, %v1769_v40  ;;  %v7404_v45 = vld [vmem:[#allocation10] ss:$12 sps:$4 sm:$0xff]  }
 0x92e   : > { %6763 = vmatprep.subr.bf16.mxu1 %v8171_v0  ;;  %2102 = vmatpush1.bf16.msra.mxu0 %v7404_v45 }
 0x92f   : > { %v7627_v22 = vpop.eup %7626  ;;  %2103 = vmatprep.subr.bf16.mxu0 %v7410_v61 }
 0x930   : > { %v1687_v23 = vmul.f32 %v7627_v22, %v7625_v15  ;;  %v1773_v41 = vpop.permute.xlu1 %1772  ;;  %v7430_v15 = vld [vmem:[#allocation10 + $0x94] ss:$12 sps:$4 sm:$0xff]  }
 0x931   : > { %v1781_v43 = vsel %vm1780_vm4, %v1779_v42, %v1773_v41 }
 0x932   : > { %6761 = vmatmul.mubr.msk.f32.vlgmr.msra.gmra.mrb[12].mxu1 %vm1161_vm3, %v1687_v23  ;;  %2104 = vmatpush1.bf16.msra.mxu0 %v7408_v63 }
 0x933   : > { %6779 = vmatprep.mubr.msk.bf16.mxu1 %vm8173_vm0, %v8171_v0  ;;  %6764 = vmatpush3.bf16.msra.mxu1 %v7396_v56 }
 0x934   : > { %6765 = vmatprep.subr.bf16.mxu1 %v8171_v0  ;;  %2105 = vmatprep.subr.bf16.mxu0 %v7414_v2 }
 0x936   : > { %2106 = vmatpush1.bf16.msra.mxu0 %v7412_v3 }
 0x937   : > { %6766 = vmatpush3.bf16.msra.mxu1 %v7397_v24  ;;  %2107 = vmatprep.subr.bf16.mxu0 %v7418_v57  ;;  %v8826_v24 = vld [vmem:[%s9393_s26] ss:$0 sm:$0xff] }
 0x938   : > { %6767 = vmatprep.subr.bf16.mxu1 %v8171_v0 }
 0x93a   : > { %2108 = vmatpush1.bf16.msra.mxu0 %v7416_v7 }
 0x93b   : > { %6768 = vmatpush3.bf16.msra.mxu1 %v7398_v25  ;;  %2109 = vmatprep.subr.bf16.mxu0 %v7422_v9 }
 0x93c   : > { %6769 = vmatprep.subr.bf16.mxu1 %v8171_v0 }
 0x93e   : > { %2110 = vmatpush1.bf16.msra.mxu0 %v7420_v10 }
 0x93f   : > { %6770 = vmatpush3.bf16.msra.mxu1 %v7399_v26  ;;  %2111 = vmatprep.subr.bf16.mxu0 %v7426_v12  ;;  %v8828_v26 = vld [vmem:[#allocation22] ss:$0 sm:$0xff] }
 0x940   : > { %6771 = vmatprep.subr.bf16.mxu1 %v8171_v0 }
 0x942   : > { %2112 = vmatpush1.bf16.msra.mxu0 %v7424_v13 }
 0x943   : > { %6772 = vmatpush3.bf16.msra.mxu1 %v7400_v27  ;;  %2113 = vmatprep.subr.bf16.mxu0 %v7430_v15 }
 0x944   : > { %6773 = vmatprep.subr.bf16.mxu1 %v8171_v0 }
 0x946   : > { %2114 = vmatpush1.bf16.msra.mxu0 %v7428_v16 }
 0x947   : > { %6774 = vmatpush3.bf16.msra.mxu1 %v7401_v30  ;;  %2115 = vmatprep.subr.bf16.mxu0 %v7434_v18 }
 0x948   : > { %6775 = vmatprep.subr.bf16.mxu1 %v8171_v0 }
 0x94a   : > { %2116 = vmatpush1.bf16.msra.mxu0 %v7432_v19 }
 0x94b   : > { %6776 = vmatpush3.bf16.msra.mxu1 %v7402_v35  ;;  %6803 = vmatprep.subr.mxu0 %v8171_v0 }
 0x94c   : > { %6777 = vmatprep.subr.bf16.mxu1 %v8171_v0 }
 0x94f   : > { %6778 = vmatpush3.bf16.msra.mxu1 %v7403_v37  ;;  %v1968_v37 = vsub.s32 2, %v8704_v33 }
 0x950   : > { %6783 = vmatprep.subr.bf16.mxu1 %v8171_v0 }
 0xa05   : > { %v1763_v38 = vpop.f32.mrb[12].mxu1 }
 0xa06   : > { %1776 = vrot.lane.b32.xlu1 %v1763_v38, %s8175_s0  ;;  %v6762_v39 = vpop.f32.mrb[13].mxu1  ;;  %v1956_v38 = vld [vmem:[#allocation11] sm:$0x7] }
 0xa07   : > { %v1969_v39 = vrot.slane %v1956_v38, %v1968_v37  ;;  %v1965_v40 = vrot.slane %v1956_v38, %v8710_v36 }
 0xa78   : > { %v1777_v44 = vpop.permute.xlu1 %1776 }
 0xa79   : > { %v1783_v46 = vsel %vm1782_vm5, %v1781_v43, %v1777_v44  ;;  %v1961_v43 = vrot.slane %v1956_v38, %v8707_v34 }
 0xa7a   : > { %v1784_v47 = vpack.c.bf16 %v1783_v46, %v1783_v46 }
 0xa7c   : > { %6780 = vmatmul.mubr.bf16.vlgmr.msra.gmra.mrb[16].mxu1 %v1784_v47 }
 0xa7d   : > { %6799 = vmatprep.mubr.msk.bf16.mxu1 %vm8173_vm0, %v8171_v0  ;;  %6784 = vmatpush3.bf16.msra.mxu1 %v7407_v60 }
 0xa7e   : > { %6785 = vmatprep.subr.bf16.mxu1 %v8171_v0 }
 0xa81   : > { %6786 = vmatpush3.bf16.msra.mxu1 %v7411_v62 }
 0xa82   : > { %6787 = vmatprep.subr.bf16.mxu1 %v8171_v0 }
 0xa85   : > { %6788 = vmatpush3.bf16.msra.mxu1 %v7415_v51 }
 0xa86   : > { %6789 = vmatprep.subr.bf16.mxu1 %v8171_v0 }
 0xa89   : > { %6790 = vmatpush3.bf16.msra.mxu1 %v7419_v8 }
 0xa8a   : > { %6791 = vmatprep.subr.bf16.mxu1 %v8171_v0 }
 0xa8d   : > { %6792 = vmatpush3.bf16.msra.mxu1 %v7423_v11 }
 0xa8e   : > { %6793 = vmatprep.subr.bf16.mxu1 %v8171_v0 }
 0xa91   : > { %6794 = vmatpush3.bf16.msra.mxu1 %v7427_v14 }
 0xa92   : > { %6795 = vmatprep.subr.bf16.mxu1 %v8171_v0 }
 0xa95   : > { %6796 = vmatpush3.bf16.msra.mxu1 %v7431_v17 }
 0xa96   : > { %6797 = vmatprep.subr.bf16.mxu1 %v8171_v0 }
 0xa99   : > { %6798 = vmatpush3.bf16.msra.mxu1 %v7435_v20 }
 0xa9a   : > { %6843 = vmatprep.subr.bf16.mxu1 %v8171_v0 }
 0xb4f   : > { %v1890_v50 = vpop.f32.mrb[16].mxu1 }
 0xb50   : > { %v1891_v52 = vadd.f32 %v6235_v49, %v1890_v50  ;;  %v6781_v53 = vpop.f32.mrb[17].mxu1 }
 0xb51   : > { %v1893_v54 = vpop.f32.mrb[18].mxu1 }
 0xb52   : > { %v6782_v55 = vpop.f32.mrb[19].mxu1  ;;  %v1896_v58 = vadd.f32 %v1891_v52, %v8689_v28 }
 0xb54   : > { %1897 = vadd.xlane.f32.xlu0 %v1896_v58 }
 0xbe1   : > { %v1898_v28 = vpop.xlane.xlu0 %1897 }
 0xbe2   : > { %v1900_v4 = vmul.f32 0.0078125, %v1898_v28 }
 0xbe4   : > { %v1901_v5 = vsub.f32 %v1896_v58, %v1900_v4  ;;  %v815_v58 = vand.u32 127, %v812_v32 }
 0xbe6   : > { %v1902_v6 = vmul.f32 %v1901_v5, %v1901_v5  ;;  %vm8862_vm6 = vcmp.gt.s32.totalorder %v815_v58, %v8704_v33 }
 0xbe8   : > { %1903 = vadd.xlane.f32.xlu1 %v1902_v6 }
 0xc75   : > { %v1904_v21 = vpop.xlane.xlu1 %1903 }
 0xc76   : > { %v1905_v22 = vmul.f32 0.0078125, %v1904_v21 }
 0xc78   : > { %v1906_v23 = vadd.f32 1e-05, %v1905_v22 }
 0xc7a   : > { %7628 = vrsqrt.f32 %v1906_v23 }
 0xc84   : > { %v7629_v56 = vpop.eup %7628 }
 0xc85   : > { %v1908_v25 = vmul.f32 %v7629_v56, %v1901_v5 }
 0xc87   : > { %v1915_v27 = vmul.f32 %v8826_v24, %v1908_v25 }
 0xc89   : > { %v8832_v30 = vadd.f32 %v8828_v26, %v1915_v27 }
 0xc8b   : > { %v1923_v35 = vpack.c.bf16 %v8832_v30, %v8832_v30 }
 0xc8d   : > { %2134 = vmatmul.mubr.bf16.vlgmr.msra.gmra.mrb[12].mxu0 %v1923_v35  ;;  %6800 = vmatmul.mubr.bf16.vlgmr.msra.gmra.mrb[20].mxu1 %v1923_v35 }
 0xc8e   : > { %6805 = vmatprep.mubr.msk.f32.mxu0 %vm8173_vm0, %v8171_v0  ;;  %6859 = vmatprep.mubr.msk.bf16.mxu1 %vm8173_vm0, %v8171_v0 }
 0xd60   : > { %v2135_v41 = vpop.f32.mrb[12].mxu0  ;;  %v2176_v42 = vpop.f32.mrb[20].mxu1 }
 0xd61   : > { %v8845_v44 = vadd.f32 %v2176_v42, %v1969_v39  ;;  %v2137_v46 = vpop.f32.mrb[13].mxu0  ;;  %v6801_v47 = vpop.f32.mrb[21].mxu1  ;;  %v8850_v55 = vadd.f32 %v2135_v41, %v1961_v43 }
 0xd62   : > { %v2138_v49 = vadd.f32 %v2137_v46, %v1965_v40  ;;  %v2139_v50 = vpop.f32.mrb[14].mxu0  ;;  %v2179_v52 = vpop.f32.mrb[22].mxu1 }
 0xd63   : > { %2437 = vrot.lane.b32.xlu1 %v8845_v44, %s8175_s0  ;;  %v2140_v53 = vpop.f32.mrb[15].mxu0  ;;  %v6802_v54 = vpop.f32.mrb[23].mxu1 }
 0xd64   : > { %6804 = vmatpush3.xpose.msk.msra.mxu0 %vm1080_vm1, %v2138_v49 }
 0xd65   : > { %6808 = vmatprep.subr.mxu0 %v8171_v0 }
 0xd67   : > { %2515 = vrot.lane.b32.xlu1 %v2138_v49, %s8176_s29  ;;  %6806 = vmatmul.mubr.msk.f32.vlgmr.msra.gmra.mrb[10].mxu0 %vm1080_vm1, %v8850_v55 }
 0xd68   : > { %6809 = vmatpush3.msra.mxu0 %v8845_v44  ;;  %6810 = vmatprep.mubr.msk.f32.mxu0 %vm8173_vm0, %v8171_v0 }
 0xd69   : > { %6813 = vmatprep.subr.mxu0 %v8171_v0 }
 0xdd5   : > { %v2438_v8 = vpop.permute.xlu1 %2437 }
 0xdd9   : > { %v2516_v21 = vpop.permute.xlu1 %2515 }
 0xe3a   : > { %v2254_v45 = vpop.f32.mrb[10].mxu0 }
 0xe3b   : > { %v2258_v60 = vmul.f32 0.17677669, %v2254_v45  ;;  %v6807_v61 = vpop.f32.mrb[11].mxu0 }
 0xe3d   : > { %v2259_v62 = vsel %vm8862_vm6, -1e+30, %v2258_v60 }
 0xe3e   : > { %v2261_v63 = vsel %vm2260_vm7, %v2259_v62, -inf }
 0xe3f   : > { %2262 = vmax.xlane.f32.xlu0 %v2261_v63 }
 0xe55   : > { %2347 = vrot.lane.b32.xlu0 %v2138_v49, %s8175_s0 }
 0xecc   : > { %v2263_v2 = vpop.xlane.xlu0 %2262 }
 0xecd   : > { %v2264_v3 = vsub.f32 %v2259_v62, %v2263_v2 }
 0xecf   : > { %v2265_v32 = vmul.f32 1.442695, %v2264_v3 }
 0xed0   : > { %v2348_v5 = vpop.permute.xlu0 %2347 }
 0xed1   : > { %7630 = vpow2.f32 %v2265_v32 }
 0xedb   : > { %v7631_v28 = vpop.eup %7630 }
 0xedc   : > { %v2267_v4 = vsel %vm2260_vm7, %v7631_v28, 0.0 }
 0xedd   : > { %2268 = vadd.xlane.f32.xlu0 %v2267_v4 }
 0xef3   : > { %2345 = vrot.lane.b32.xlu0 %v8850_v55, %s8175_s0 }
 0xf6a   : > { %v2269_v6 = vpop.xlane.xlu0 %2268 }
 0xf6b   : > { %7632 = vrcp.f32 %v2269_v6 }
 0xf6e   : > { %v2346_v7 = vpop.permute.xlu0 %2345 }
 0xf75   : > { %v7633_v51 = vpop.eup %7632 }
 0xf76   : > { %v2271_v57 = vmul.f32 %v7633_v51, %v7631_v28 }
 0xf78   : > { %6811 = vmatmul.mubr.msk.f32.vlgmr.msra.gmra.mrb[16].mxu0 %vm2260_vm7, %v2271_v57 }
 0xf79   : > { %6814 = vmatpush3.xpose.msk.msra.mxu0 %vm1080_vm1, %v2348_v5  ;;  %6815 = vmatprep.mubr.msk.f32.mxu0 %vm8173_vm0, %v8171_v0 }
 0xf7a   : > { %6818 = vmatprep.subr.mxu0 %v8171_v0 }
 0xf7c   : > { %6816 = vmatmul.mubr.msk.f32.vlgmr.msra.gmra.mrb[18].mxu0 %vm1080_vm1, %v2346_v7 }
 0xf7d   : > { %6819 = vmatpush3.msra.mxu0 %v2438_v8  ;;  %6820 = vmatprep.mubr.msk.f32.mxu0 %vm8173_vm0, %v8171_v0 }
 0xf7e   : > { %6823 = vmatprep.subr.mxu0 %v8171_v0 }
0x104b   : > { %v8882_v9 = vpop.f32.mrb[16].mxu0 }
0x104c   : > { %v6812_v10 = vpop.f32.mrb[17].mxu0 }
0x104f   : > { %v2419_v11 = vpop.f32.mrb[18].mxu0 }
0x1050   : > { %v2423_v12 = vmul.f32 0.17677669, %v2419_v11  ;;  %v6817_v13 = vpop.f32.mrb[19].mxu0  ;;  %v7436_v11 = vld [vmem:[#allocation13] sm:$0xff]  }
0x1051   : > { %6844 = vmatpush3.bf16.msra.mxu1 %v7436_v11  ;;  %v7439_v13 = vld [vmem:[#allocation13 + $0x18] sm:$0xff]   ;;  %v7476_v11 = vld [vmem:[#allocation19 + $0x60] sm:$0xff]  }
0x1052   : > { %v2424_v14 = vsel %vm8862_vm6, -1e+30, %v2423_v12  ;;  %v7437_v12 = vld [vmem:[#allocation13 + $0x8] sm:$0xff]   ;;  %6845 = vmatprep.subr.bf16.mxu1 %v8171_v0 }
0x1053   : > { %v2425_v15 = vsel %vm2260_vm7, %v2424_v14, -inf }
0x1054   : > { %2426 = vmax.xlane.f32.xlu0 %v2425_v15  ;;  %v7441_v15 = vld [vmem:[#allocation13 + $0x28] sm:$0xff]  }
0x1055   : > { %6846 = vmatpush3.bf16.msra.mxu1 %v7437_v12  ;;  %v7477_v12 = vld [vmem:[#allocation19 + $0x20] sm:$0xff]  }
0x1056   : > { %6847 = vmatprep.subr.bf16.mxu1 %v8171_v0 }
0x106a   : > { %2604 = vrot.lane.b32.xlu0 %v8845_v44, %s8176_s29 }
0x106e   : > { %2682 = vrot.lane.b32.xlu0 %v2138_v49, %s8177_s9 }
0x10e1   : > { %v2427_v16 = vpop.xlane.xlu0 %2426 }
0x10e2   : > { %v2428_v17 = vsub.f32 %v2424_v14, %v2427_v16  ;;  %v7440_v14 = vld [vmem:[#allocation13 + $0x20] sm:$0xff]   ;;  %v7442_v16 = vld [vmem:[#allocation13 + $0x30] sm:$0xff]  }
0x10e4   : > { %v2429_v18 = vmul.f32 1.442695, %v2428_v17  ;;  %v7443_v17 = vld [vmem:[#allocation13 + $0x38] sm:$0xff]  }
0x10e5   : > { %v2605_v27 = vpop.permute.xlu0 %2604 }
0x10e6   : > { %7634 = vpow2.f32 %v2429_v18 }
0x10e9   : > { %v2683_v53 = vpop.permute.xlu0 %2682 }
0x10f0   : > { %v7635_v19 = vpop.eup %7634 }
0x10f1   : > { %v2431_v20 = vsel %vm2260_vm7, %v7635_v19, 0.0 }
0x10f2   : > { %2432 = vadd.xlane.f32.xlu1 %v2431_v20 }
0x1103   : > { %2513 = vrot.lane.b32.xlu1 %v8850_v55, %s8176_s29 }
0x117f   : > { %v2433_v22 = vpop.xlane.xlu1 %2432 }
0x1180   : > { %7636 = vrcp.f32 %v2433_v22 }
0x1183   : > { %v2514_v25 = vpop.permute.xlu1 %2513 }
0x118a   : > { %v7637_v23 = vpop.eup %7636 }
0x118b   : > { %v2435_v56 = vmul.f32 %v7637_v23, %v7635_v19 }
0x118d   : > { %6821 = vmatmul.mubr.msk.f32.vlgmr.msra.gmra.mrb[20].mxu0 %vm2260_vm7, %v2435_v56 }
0x118e   : > { %6824 = vmatpush3.xpose.msk.msra.mxu0 %vm1080_vm1, %v2516_v21  ;;  %6825 = vmatprep.mubr.msk.f32.mxu0 %vm8173_vm0, %v8171_v0 }
0x118f   : > { %6828 = vmatprep.subr.mxu0 %v8171_v0 }
0x1191   : > { %6826 = vmatmul.mubr.msk.f32.vlgmr.msra.gmra.mrb[22].mxu0 %vm1080_vm1, %v2514_v25 }
0x1192   : > { %6829 = vmatpush3.msra.mxu0 %v2605_v27  ;;  %6830 = vmatprep.mubr.msk.f32.mxu0 %vm8173_vm0, %v8171_v0 }
0x1193   : > { %6833 = vmatprep.subr.mxu0 %v8171_v0 }
0x1260   : > { %v2509_v35 = vpop.f32.mrb[20].mxu0 }
0x1261   : > { %v6822_v38 = vpop.f32.mrb[21].mxu0 }
0x1264   : > { %v2587_v39 = vpop.f32.mrb[22].mxu0 }
0x1265   : > { %v2591_v40 = vmul.f32 0.17677669, %v2587_v39  ;;  %v6827_v41 = vpop.f32.mrb[23].mxu0 }
0x1267   : > { %v2592_v42 = vsel %vm8862_vm6, -1e+30, %v2591_v40 }
0x1268   : > { %v2593_v43 = vsel %vm2260_vm7, %v2592_v42, -inf }
0x1269   : > { %2594 = vmax.xlane.f32.xlu1 %v2593_v43 }
0x12f6   : > { %v2595_v46 = vpop.xlane.xlu1 %2594 }
0x12f7   : > { %v2596_v47 = vsub.f32 %v2592_v42, %v2595_v46  ;;  %v7444_v46 = vld [vmem:[#allocation16] ss:$8 sps:$4 sm:$0xff]  }
0x12f9   : > { %v2597_v49 = vmul.f32 1.442695, %v2596_v47  ;;  %v7446_v47 = vld [vmem:[#allocation16 + $0x4] ss:$8 sps:$4 sm:$0xff]  }
0x12fb   : > { %7638 = vpow2.f32 %v2597_v49  ;;  %v7449_v49 = vld [vmem:[#allocation16 + $0x14] ss:$8 sps:$4 sm:$0xff]  }
0x1305   : > { %v7639_v50 = vpop.eup %7638 }
0x1306   : > { %v2599_v52 = vsel %vm2260_vm7, %v7639_v50, 0.0 }
0x1307   : > { %2600 = vadd.xlane.f32.xlu0 %v2599_v52  ;;  %v7450_v52 = vld [vmem:[#allocation16 + $0x20] ss:$8 sps:$4 sm:$0xff]  }
0x131d   : > { %2680 = vrot.lane.b32.xlu0 %v8850_v55, %s8177_s9 }
0x1394   : > { %v2601_v54 = vpop.xlane.xlu0 %2600 }
0x1395   : > { %7640 = vrcp.f32 %v2601_v54 }
0x1398   : > { %v2681_v60 = vpop.permute.xlu0 %2680 }
0x139f   : > { %v7641_v58 = vpop.eup %7640 }
0x13a0   : > { %v2603_v45 = vmul.f32 %v7641_v58, %v7639_v50  ;;  %v7452_v50 = vld [vmem:[#allocation16 + $0x24] ss:$8 sps:$4 sm:$0xff]  }
0x13a2   : > { %6831 = vmatmul.mubr.msk.f32.vlgmr.msra.gmra.mrb[24].mxu0 %vm2260_vm7, %v2603_v45 }
0x13a3   : > { %6834 = vmatpush3.xpose.msk.msra.mxu0 %vm1080_vm1, %v2683_v53  ;;  %6835 = vmatprep.mubr.msk.f32.mxu0 %vm8173_vm0, %v8171_v0 }
0x13a4   : > { %6838 = vmatprep.subr.mxu0 %v8171_v0 }
0x13a6   : > { %6836 = vmatmul.mubr.msk.f32.vlgmr.msra.gmra.mrb[26].mxu0 %vm1080_vm1, %v2681_v60  ;;  %v7455_v60 = vld [vmem:[#allocation16 + $0x34] ss:$8 sps:$4 sm:$0xff]  }
0x13a7   : > { %6840 = vmatprep.mubr.msk.f32.mxu0 %vm8173_vm0, %v8171_v0 }
0x1475   : > { %v2676_v55 = vpop.f32.mrb[24].mxu0 }
0x1476   : > { %v6832_v61 = vpop.f32.mrb[25].mxu0 }
0x1477   : > { %v7456_v61 = vld [vmem:[#allocation16 + $0x40] ss:$8 sps:$4 sm:$0xff]  }
0x1479   : > { %v2754_v62 = vpop.f32.mrb[26].mxu0 }
0x147a   : > { %v2758_v63 = vmul.f32 0.17677669, %v2754_v62  ;;  %v6837_v2 = vpop.f32.mrb[27].mxu0  ;;  %v7461_v62 = vld [vmem:[#allocation16 + $0x54] ss:$8 sps:$4 sm:$0xff]  }
0x147b   : > { %v7464_v2 = vld [vmem:[#allocation16 + $0x64] ss:$8 sps:$4 sm:$0xff]  }
0x147c   : > { %v2759_v3 = vsel %vm8862_vm6, -1e+30, %v2758_v63  ;;  %v7459_v63 = vld [vmem:[#allocation16 + $0x50] ss:$8 sps:$4 sm:$0xff]  }
0x147d   : > { %v2760_v32 = vsel %vm2260_vm7, %v2759_v3, -inf }
0x147e   : > { %2761 = vmax.xlane.f32.xlu0 %v2760_v32  ;;  %v7467_v32 = vld [vmem:[#allocation16 + $0x74] ss:$8 sps:$4 sm:$0xff]  }
0x150b   : > { %v2762_v28 = vpop.xlane.xlu0 %2761 }
0x150c   : > { %v2763_v4 = vsub.f32 %v2759_v3, %v2762_v28  ;;  %v7462_v3 = vld [vmem:[#allocation16 + $0x60] ss:$8 sps:$4 sm:$0xff]   ;;  %v7465_v28 = vld [vmem:[#allocation16 + $0x70] ss:$8 sps:$4 sm:$0xff]  }
0x150e   : > { %v2764_v5 = vmul.f32 1.442695, %v2763_v4  ;;  %v7468_v4 = vld [vmem:[#allocation19 + $0x40] sm:$0xff]  }
0x1510   : > { %7642 = vpow2.f32 %v2764_v5  ;;  %v7469_v5 = vld [vmem:[#allocation19] sm:$0xff]  }
0x151a   : > { %v7643_v6 = vpop.eup %7642 }
0x151b   : > { %v2766_v51 = vsel %vm2260_vm7, %v7643_v6, 0.0 }
0x151c   : > { %2767 = vadd.xlane.f32.xlu1 %v2766_v51  ;;  %v7471_v51 = vld [vmem:[#allocation19 + $0x8] sm:$0xff]  }
0x152d   : > { %2771 = vrot.lane.b32.xlu1 %v8845_v44, %s8177_s9  ;;  %v7438_v44 = vld [vmem:[#allocation13 + $0x10] sm:$0xff]  }
0x152e   : > { %6848 = vmatpush3.bf16.msra.mxu1 %v7438_v44  ;;  %v7478_v44 = vld [vmem:[#allocation19 + $0x68] sm:$0xff]  }
0x152f   : > { %6849 = vmatprep.subr.bf16.mxu1 %v8171_v0 }
0x1531   : > { %2848 = vrot.lane.b32.xlu1 %v2509_v35, %s8177_s9  ;;  %v6282_v35 = vld [vmem:[#allocation14] ss:$0 sm:$0xff] }
0x1532   : > { %6850 = vmatpush3.bf16.msra.mxu1 %v7439_v13  ;;  %v7479_v13 = vld [vmem:[#allocation19 + $0x28] sm:$0xff]  }
0x1533   : > { %6851 = vmatprep.subr.bf16.mxu1 %v8171_v0 }
0x1535   : > { %2852 = vrot.lane.b32.xlu1 %v2676_v55, %s8176_s29  ;;  %v7458_v55 = vld [vmem:[#allocation16 + $0x44] ss:$8 sps:$4 sm:$0xff]  }
0x1536   : > { %6852 = vmatpush3.bf16.msra.mxu1 %v7440_v14 }
0x1537   : > { %6853 = vmatprep.subr.bf16.mxu1 %v8171_v0 }
0x153a   : > { %6854 = vmatpush3.bf16.msra.mxu1 %v7441_v15 }
0x153b   : > { %6855 = vmatprep.subr.bf16.mxu1 %v8171_v0 }
0x153e   : > { %6856 = vmatpush3.bf16.msra.mxu1 %v7442_v16 }
0x153f   : > { %6857 = vmatprep.subr.bf16.mxu1 %v8171_v0 }
0x1542   : > { %6858 = vmatpush3.bf16.msra.mxu1 %v7443_v17 }
0x1543   : > { %6558 = vmatprep.subr.bf16.mxu1 %v7468_v4  ;;  %v7500_v4 = vld [vmem:[%s9387_s28 + $0x48] sm:$0xff]  }
0x15a9   : > { %v2768_v57 = vpop.xlane.xlu1 %2767 }
0x15aa   : > { %7644 = vrcp.f32 %v2768_v57  ;;  %v7472_v57 = vld [vmem:[#allocation19 + $0x50] sm:$0xff]  }
0x15ad   : > { %v2772_v7 = vpop.permute.xlu1 %2771 }
0x15ae   : > { %6839 = vmatpush3.msra.mxu0 %v2772_v7  ;;  %v7473_v7 = vld [vmem:[#allocation19 + $0x10] sm:$0xff]  }
0x15af   : > { %3097 = vmatprep.subr.bf16.mxu0 %v7446_v47 }
0x15b1   : > { %v2849_v20 = vpop.permute.xlu1 %2848 }
0x15b2   : > { %v2859_v22 = vsel %vm1080_vm1, %v8882_v9, %v2849_v20  ;;  %v7447_v9 = vld [vmem:[#allocation16 + $0x10] ss:$8 sps:$4 sm:$0xff]  }
0x15b4   : > { %v7645_v8 = vpop.eup %7644 }
0x15b5   : > { %v2770_v10 = vmul.f32 %v7645_v8, %v7643_v6  ;;  %v2853_v21 = vpop.permute.xlu1 %2852  ;;  %v7470_v6 = vld [vmem:[#allocation19 + $0x48] sm:$0xff]   ;;  %v7474_v8 = vld [vmem:[#allocation19 + $0x58] sm:$0xff]  }
0x15b6   : > { %v2860_v23 = vsel %vm1780_vm4, %v2859_v22, %v2853_v21  ;;  %v7480_v22 = vld [vmem:[#allocation19 + $0x70] sm:$0xff]  }
0x15b7   : > { %6841 = vmatmul.mubr.msk.f32.vlgmr.msra.gmra.mrb[28].mxu0 %vm2260_vm7, %v2770_v10  ;;  %v7475_v10 = vld [vmem:[#allocation19 + $0x18] sm:$0xff]  }
0x15b8   : > { %3129 = vmatprep.mubr.bf16.mxu0 %v8172_v1  ;;  %3098 = vmatpush1.bf16.msra.mxu0 %v7444_v46 }
0x15b9   : > { %3099 = vmatprep.subr.bf16.mxu0 %v7449_v49 }
0x15bc   : > { %3100 = vmatpush1.bf16.msra.mxu0 %v7447_v9 }
0x15bd   : > { %3101 = vmatprep.subr.bf16.mxu0 %v7452_v50 }
0x15c0   : > { %3102 = vmatpush1.bf16.msra.mxu0 %v7450_v52 }
0x15c1   : > { %3103 = vmatprep.subr.bf16.mxu0 %v7455_v60 }
0x168a   : > { %v2843_v18 = vpop.f32.mrb[28].mxu0 }
0x168b   : > { %2856 = vrot.lane.b32.xlu1 %v2843_v18, %s8175_s0  ;;  %v6842_v19 = vpop.f32.mrb[29].mxu0 }
0x16fd   : > { %v2857_v56 = vpop.permute.xlu1 %2856 }
0x16fe   : > { %v2861_v25 = vsel %vm1782_vm5, %v2860_v23, %v2857_v56  ;;  %v7481_v23 = vld [vmem:[#allocation19 + $0x30] sm:$0xff]   ;;  %v7482_v56 = vld [vmem:[#allocation19 + $0x78] sm:$0xff]  }
0x16ff   : > { %v2862_v27 = vpack.c.bf16 %v2861_v25, %v2861_v25  ;;  %v7483_v25 = vld [vmem:[#allocation19 + $0x38] sm:$0xff]  }
0x1701   : > { %6860 = vmatmul.mubr.bf16.vlgmr.msra.gmra.mrb[24].mxu1 %v2862_v27  ;;  %v3005_v27 = vld [vmem:[#allocation17] sm:$0x3] }
0x1702   : > { %6559 = vmatpush3.bf16.msra.mxu1 %v7469_v5  ;;  %v7490_v5 = vld [vmem:[#allocation2 + $0xa0] ss:$8 sps:$4 sm:$0xff]  }
0x1703   : > { %6560 = vmatprep.subr.bf16.mxu1 %v7470_v6  ;;  %v7495_v6 = vld [vmem:[#allocation2 + $0xb4] ss:$8 sps:$4 sm:$0xff]  }
0x1706   : > { %6561 = vmatpush3.bf16.msra.mxu1 %v7471_v51  ;;  %v7493_v51 = vld [vmem:[#allocation2 + $0xb0] ss:$8 sps:$4 sm:$0xff]  }
0x1707   : > { %6562 = vmatprep.subr.bf16.mxu1 %v7472_v57  ;;  %v7499_v57 = vld [vmem:[#allocation2 + $0xc4] ss:$8 sps:$4 sm:$0xff]  }
0x170a   : > { %6563 = vmatpush3.bf16.msra.mxu1 %v7473_v7  ;;  %v7497_v7 = vld [vmem:[#allocation2 + $0xc0] ss:$8 sps:$4 sm:$0xff]  }
0x170b   : > { %6564 = vmatprep.subr.bf16.mxu1 %v7474_v8  ;;  %v7503_v8 = vld [vmem:[#allocation2 + $0xd4] ss:$8 sps:$4 sm:$0xff]  }
0x170e   : > { %6565 = vmatpush3.bf16.msra.mxu1 %v7475_v10  ;;  %v7501_v10 = vld [vmem:[#allocation2 + $0xd0] ss:$8 sps:$4 sm:$0xff]  }
0x170f   : > { %6566 = vmatprep.subr.bf16.mxu1 %v7476_v11 }
0x1712   : > { %6567 = vmatpush3.bf16.msra.mxu1 %v7477_v12 }
0x1713   : > { %6568 = vmatprep.subr.bf16.mxu1 %v7478_v44 }
0x1716   : > { %6569 = vmatpush3.bf16.msra.mxu1 %v7479_v13 }
0x1717   : > { %6570 = vmatprep.subr.bf16.mxu1 %v7480_v22  ;;  %v7514_v22 = vld [vmem:[%s9387_s28 + $0x70] sm:$0xff]  }
0x171a   : > { %6571 = vmatpush3.bf16.msra.mxu1 %v7481_v23 }
0x171b   : > { %6572 = vmatprep.subr.bf16.mxu1 %v7482_v56 }
0x171e   : > { %6573 = vmatpush3.bf16.msra.mxu1 %v7483_v25 }
0x17d4   : > { %v2968_v38 = vpop.f32.mrb[24].mxu1 }
0x17d5   : > { %v2969_v39 = vadd.f32 %v6282_v35, %v2968_v38  ;;  %v6861_v40 = vpop.f32.mrb[25].mxu1  ;;  %v3010_v35 = vrot.slane %v3005_v27, %v8707_v34  ;;  %v3014_v38 = vrot.slane %v3005_v27, %v8710_v36 }
0x17d6   : > { %v2971_v41 = vpop.f32.mrb[26].mxu1 }
0x17d7   : > { %v6862_v42 = vpop.f32.mrb[27].mxu1  ;;  %v2974_v43 = vadd.f32 %v2969_v39, %v8832_v30  ;;  %v7453_v30 = vld [vmem:[#allocation16 + $0x30] ss:$8 sps:$4 sm:$0xff]  }
0x17d8   : > { %3104 = vmatpush1.bf16.msra.mxu0 %v7453_v30 }
0x17d9   : > { %2975 = vadd.xlane.f32.xlu0 %v2974_v43  ;;  %3105 = vmatprep.subr.bf16.mxu0 %v7458_v55 }
0x17dc   : > { %3106 = vmatpush1.bf16.msra.mxu0 %v7456_v61 }
0x17dd   : > { %3107 = vmatprep.subr.bf16.mxu0 %v7461_v62  ;;  %v7484_v62 = vld [vmem:[#allocation2 + $0x80] ss:$8 sps:$4 sm:$0xff]  }
0x17e0   : > { %3108 = vmatpush1.bf16.msra.mxu0 %v7459_v63  ;;  %v7486_v63 = vld [vmem:[#allocation2 + $0x84] ss:$8 sps:$4 sm:$0xff]  }
0x17e1   : > { %3109 = vmatprep.subr.bf16.mxu0 %v7464_v2  ;;  %v7489_v2 = vld [vmem:[#allocation2 + $0x94] ss:$8 sps:$4 sm:$0xff]   ;;  %3556 = vmatprep.subr.bf16.mxu1 %v7486_v63 }
0x17e4   : > { %3110 = vmatpush1.bf16.msra.mxu0 %v7462_v3  ;;  %v7496_v3 = vld [vmem:[%s9387_s28 + $0x40] sm:$0xff]  }
0x17e5   : > { %3111 = vmatprep.subr.bf16.mxu0 %v7467_v32  ;;  %v7487_v32 = vld [vmem:[#allocation2 + $0x90] ss:$8 sps:$4 sm:$0xff]  }
0x17e8   : > { %3112 = vmatpush1.bf16.msra.mxu0 %v7465_v28  ;;  %v7492_v28 = vld [vmem:[#allocation2 + $0xa4] ss:$8 sps:$4 sm:$0xff]  }
0x17e9   : > { %6863 = vmatprep.subr.bf16.mxu0 %v8171_v0 }
0x1866   : > { %v2976_v53 = vpop.xlane.xlu0 %2975 }
0x1867   : > { %v2977_v54 = vmul.f32 0.0078125, %v2976_v53  ;;  %v6307_v53 = vld [vmem:[#allocation20] ss:$0 sm:$0xff] }
0x1869   : > { %v2978_v58 = vsub.f32 %v2974_v43, %v2977_v54 }
0x186b   : > { %v2979_v45 = vmul.f32 %v2978_v58, %v2978_v58 }
0x186d   : > { %2980 = vadd.xlane.f32.xlu1 %v2979_v45 }
0x18fa   : > { %v2981_v14 = vpop.xlane.xlu1 %2980 }
0x18fb   : > { %v2982_v15 = vmul.f32 0.0078125, %v2981_v14  ;;  %v7504_v14 = vld [vmem:[%s9387_s28 + $0x50] sm:$0xff]  }
0x18fd   : > { %v2983_v16 = vadd.f32 1e-05, %v2982_v15  ;;  %v7507_v15 = vld [vmem:[#allocation2 + $0xe4] ss:$8 sps:$4 sm:$0xff]  }
0x18ff   : > { %7646 = vrsqrt.f32 %v2983_v16  ;;  %v7505_v16 = vld [vmem:[#allocation2 + $0xe0] ss:$8 sps:$4 sm:$0xff]  }
0x1909   : > { %v7647_v17 = vpop.eup %7646 }
0x190a   : > { %v2985_v18 = vmul.f32 %v7647_v17, %v2978_v58  ;;  %v7508_v17 = vld [vmem:[%s9387_s28 + $0x58] sm:$0xff]  }
0x190c   : > { %v2986_v19 = vmul.f32 %v8826_v24, %v2985_v18  ;;  %v7511_v18 = vld [vmem:[#allocation2 + $0xf4] ss:$8 sps:$4 sm:$0xff]  }
0x190e   : > { %v2987_v20 = vadd.f32 %v8828_v26, %v2986_v19  ;;  %v7509_v19 = vld [vmem:[#allocation2 + $0xf0] ss:$8 sps:$4 sm:$0xff]  }
0x1910   : > { %v2988_v21 = vpack.c.bf16 %v2987_v20, %v2987_v20 }
0x1912   : > { %3130 = vmatmul.mubr.bf16.vlgmr.msra.gmra.mrb[32].mxu0 %v2988_v21  ;;  %v7513_v21 = vld [vmem:[%s9387_s28 + $0x68] sm:$0xff]  }
0x1913   : > { %6879 = vmatprep.mubr.msk.bf16.mxu0 %vm8173_vm0, %v8171_v0  ;;  %6864 = vmatpush3.bf16.msra.mxu0 %v7496_v3 }
0x1914   : > { %6865 = vmatprep.subr.bf16.mxu0 %v8171_v0 }
0x1917   : > { %6866 = vmatpush3.bf16.msra.mxu0 %v7500_v4 }
0x1918   : > { %6867 = vmatprep.subr.bf16.mxu0 %v8171_v0 }
0x191b   : > { %6868 = vmatpush3.bf16.msra.mxu0 %v7504_v14 }
0x191c   : > { %6869 = vmatprep.subr.bf16.mxu0 %v8171_v0 }
0x191f   : > { %6870 = vmatpush3.bf16.msra.mxu0 %v7508_v17 }
0x1920   : > { %6871 = vmatprep.subr.bf16.mxu0 %v8171_v0 }
0x19e5   : > { %v3131_v39 = vpop.f32.mrb[32].mxu0 }
0x19e6   : > { %v3132_v40 = vadd.f32 %v3131_v39, %v3010_v35  ;;  %v3133_v41 = vpop.f32.mrb[33].mxu0 }
0x19e7   : > { %v3134_v42 = vadd.f32 %v3133_v41, %v3014_v38  ;;  %v3135_v43 = vpop.f32.mrb[34].mxu0  ;;  %v3464_v41 = vld [vmem:[#allocation5 + $0x2] sm:$0x3] }
0x19e8   : > { %v3138_v46 = vmax.f32 %v3132_v40, 0.0  ;;  %v3136_v47 = vpop.f32.mrb[35].mxu0  ;;  %v3473_v43 = vrot.slane %v3464_v41, %v8710_v36 }
0x19e9   : > { %v3139_v49 = vmax.f32 %v3134_v42, 0.0  ;;  %v3469_v42 = vrot.slane %v3464_v41, %v8707_v34 }
0x19ea   : > { %v3140_v50 = vpack.c.bf16 %v3138_v46, %v3138_v46 }
0x19eb   : > { %v3141_v9 = vpack.c.bf16 %v3139_v49, %v3139_v49 }
0x19ed   : > { %3309 = vmatprep.mubr.bf16.mxu1 %v3141_v9 }
0x19ee   : > { %3310 = vmatmul.mubr.bf16.vlgmr.msra.gmra.mrb[28].mxu1 %v3140_v50 }
0x19ef   : > { %3588 = vmatprep.mubr.bf16.mxu1 %v8172_v1  ;;  %3557 = vmatpush1.bf16.msra.mxu1 %v7484_v62 }
0x19f0   : > { %3558 = vmatprep.subr.bf16.mxu1 %v7489_v2 }
0x19f3   : > { %3559 = vmatpush1.bf16.msra.mxu1 %v7487_v32 }
0x19f4   : > { %3560 = vmatprep.subr.bf16.mxu1 %v7492_v28 }
0x19f7   : > { %3561 = vmatpush1.bf16.msra.mxu1 %v7490_v5 }
0x19f8   : > { %3562 = vmatprep.subr.bf16.mxu1 %v7495_v6 }
0x19fb   : > { %3563 = vmatpush1.bf16.msra.mxu1 %v7493_v51 }
0x19fc   : > { %3564 = vmatprep.subr.bf16.mxu1 %v7499_v57 }
0x19ff   : > { %3565 = vmatpush1.bf16.msra.mxu1 %v7497_v7 }
0x1a00   : > { %3566 = vmatprep.subr.bf16.mxu1 %v7503_v8 }
0x1a03   : > { %3567 = vmatpush1.bf16.msra.mxu1 %v7501_v10 }
0x1a04   : > { %3568 = vmatprep.subr.bf16.mxu1 %v7507_v15 }
0x1a07   : > { %3569 = vmatpush1.bf16.msra.mxu1 %v7505_v16 }
0x1a08   : > { %3570 = vmatprep.subr.bf16.mxu1 %v7511_v18 }
0x1a0b   : > { %3571 = vmatpush1.bf16.msra.mxu1 %v7509_v19 }
0x1a0c   : > { %7105 = vmatprep.subr.bf16.mxu1 %v8174_v31 }
0x1a0e   : > { %3589 = vmatmul.mubr.bf16.vlgmr.msra.gmra.mrb[32].mxu1 %v8691_v29  ;;  %v7515_v29 = vld [vmem:[%s9387_s28 + $0x78] sm:$0xff]  }
0x1a0f   : > { %6922 = vmatprep.mubr.msk.f32.mxu1 %vm8173_vm0, %v8171_v0 }
0x1ac1   : > { %v6574_v52 = vpop.f32.mrb[28].mxu1 }
0x1ac2   : > { %v6575_v54 = vpop.f32.mrb[29].mxu1 }
0x1ac3   : > { %v6576_v58 = vadd.f32 %v6575_v54, %v6574_v52  ;;  %v6577_v45 = vpop.f32.mrb[30].mxu1 }
0x1ac4   : > { %v6578_v60 = vpop.f32.mrb[31].mxu1 }
0x1ac5   : > { %v3312_v30 = vadd.f32 %v6576_v58, %v6307_v53  ;;  %v6341_v60 = vld [vmem:[%s9392_s5 + $0x1] ss:$0 sm:$0xff] }
0x1ac7   : > { %v3317_v55 = vmax.f32 %v3312_v30, 0.0 }
0x1ac9   : > { %v3318_v61 = vadd.f32 %v3317_v55, %v2987_v20  ;;  %v7512_v20 = vld [vmem:[%s9387_s28 + $0x60] sm:$0xff]  }
0x1aca   : > { %6872 = vmatpush3.bf16.msra.mxu0 %v7512_v20 }
0x1acb   : > { %3319 = vadd.xlane.f32.xlu0 %v3318_v61  ;;  %6873 = vmatprep.subr.bf16.mxu0 %v8171_v0 }
0x1ace   : > { %6874 = vmatpush3.bf16.msra.mxu0 %v7513_v21 }
0x1acf   : > { %6875 = vmatprep.subr.bf16.mxu0 %v8171_v0 }
0x1ad2   : > { %6876 = vmatpush3.bf16.msra.mxu0 %v7514_v22 }
0x1ad3   : > { %6877 = vmatprep.subr.bf16.mxu0 %v8171_v0 }
0x1ad6   : > { %6878 = vmatpush3.bf16.msra.mxu0 %v7515_v29 }
0x1ad7   : > { %7087 = vmatprep.subr.bf16.mxu0 %v8174_v31 }
0x1ae1   : > { %v3590_v46 = vpop.f32.mrb[32].mxu1 }
0x1ae2   : > { %v3591_v47 = vadd.f32 %v3590_v46, %v3469_v42  ;;  %v3592_v49 = vpop.f32.mrb[33].mxu1 }
0x1ae3   : > { %v3593_v9 = vadd.f32 %v3592_v49, %v3473_v43 }
0x1b58   : > { %v3320_v11 = vpop.xlane.xlu0 %3319 }
0x1b59   : > { %v3321_v12 = vmul.f32 0.0078125, %v3320_v11 }
0x1b5b   : > { %v3322_v44 = vsub.f32 %v3318_v61, %v3321_v12 }
0x1b5d   : > { %v3323_v13 = vmul.f32 %v3322_v44, %v3322_v44 }
0x1b5f   : > { %3324 = vadd.xlane.f32.xlu0 %v3323_v13 }
0x1bec   : > { %v3325_v23 = vpop.xlane.xlu0 %3324 }
0x1bed   : > { %v3326_v56 = vmul.f32 0.0078125, %v3325_v23 }
0x1bef   : > { %v3327_v25 = vadd.f32 1e-05, %v3326_v56 }
0x1bf1   : > { %7648 = vrsqrt.f32 %v3327_v25 }
0x1bfb   : > { %v7649_v27 = vpop.eup %7648 }
0x1bfc   : > { %v3329_v35 = vmul.f32 %v7649_v27, %v3322_v44 }
0x1bfe   : > { %v3330_v38 = vmul.f32 %v8826_v24, %v3329_v35  ;;  %v3594_v24 = vpop.f32.mrb[34].mxu1 }
0x1bff   : > { %v3595_v50 = vadd.f32 %v3594_v24, %v3469_v42 }
0x1c00   : > { %v8985_v39 = vadd.f32 %v8828_v26, %v3330_v38  ;;  %v3596_v26 = vpop.f32.mrb[35].mxu1 }
0x1c01   : > { %v3597_v52 = vadd.f32 %v3596_v26, %v3473_v43  ;;  %v7088_v53 = vpack.c.bf16 %v3595_v50, %v3591_v47  ;;  %v8993_v58 = vpack.i.bf16 %v3595_v50, %v3591_v47 }
0x1c02   : > { %v3332_v40 = vpack.c.bf16 %v8985_v39, %v8985_v39 }
0x1c03   : > { %v7092_v54 = vpack.c.bf16 %v3597_v52, %v3593_v9  ;;  %v8995_v45 = vpack.i.bf16 %v3597_v52, %v3593_v9 }
0x1c04   : > { %6880 = vmatmul.mubr.bf16.vlgmr.msra.gmra.mrb[36].mxu0 %v3332_v40 }
0x1c05   : > { %6887 = vmatprep.mubr.msk.f32.mxu0 %vm8173_vm0, %v8171_v0  ;;  %7090 = vmatpush3.bf16.xpose.msk.msra.mxu0 %vm8716_vm2, %v7088_v53 }
0x1c06   : > { %7091 = vmatprep.subr.bf16.mxu0 %v8174_v31 }
0x1cd7   : > { %v3440_v30 = vpop.f32.mrb[36].mxu0 }
0x1cd8   : > { %v3441_v55 = vadd.f32 %v6341_v60, %v3440_v30  ;;  %v6881_v61 = vpop.f32.mrb[37].mxu0 }
0x1cd9   : > { %v3443_v62 = vpop.f32.mrb[38].mxu0 }
0x1cda   : > { %3763 = vrot.lane.b32.xlu1 %v3441_v55, %s8175_s0  ;;  %v6882_v63 = vpop.f32.mrb[39].mxu0  ;;  %6888 = vmatmul.mubr.msk.f32.vlgmr.msra.gmra.mrb[30].mxu0 %vm1080_vm1, %v3441_v55 }
0x1cdb   : > { %7093 = vmatpush3.bf16.msra.mxu0 %v7092_v54  ;;  %6894 = vmatprep.mubr.msk.f32.mxu0 %vm8173_vm0, %v8171_v0 }
0x1cdc   : > { %7094 = vmatprep.subr.bf16.mxu0 %v8174_v31 }
0x1d4c   : > { %v3764_v14 = vpop.permute.xlu1 %3763 }
0x1dad   : > { %v3674_v2 = vpop.f32.mrb[30].mxu0 }
0x1dae   : > { %v3678_v3 = vmul.f32 0.17677669, %v3674_v2  ;;  %v6889_v32 = vpop.f32.mrb[31].mxu0 }
0x1db0   : > { %v3679_v28 = vsel %vm1161_vm3, %v3678_v3, -inf }
0x1db1   : > { %3680 = vmax.xlane.f32.xlu0 %v3679_v28 }
0x1e3e   : > { %v3681_v4 = vpop.xlane.xlu0 %3680 }
0x1e3f   : > { %v3682_v5 = vsub.f32 %v3678_v3, %v3681_v4 }
0x1e41   : > { %v3683_v6 = vmul.f32 1.442695, %v3682_v5 }
0x1e43   : > { %7650 = vpow2.f32 %v3683_v6 }
0x1e4d   : > { %v7651_v51 = vpop.eup %7650 }
0x1e4e   : > { %v3685_v57 = vsel %vm1161_vm3, %v7651_v51, 0.0 }
0x1e4f   : > { %3686 = vadd.xlane.f32.xlu0 %v3685_v57 }
0x1e65   : > { %7335 = vrot.lane.b32.xlu0 %v8993_v58, %s8175_s0 }
0x1edc   : > { %v3687_v7 = vpop.xlane.xlu0 %3686 }
0x1edd   : > { %7652 = vrcp.f32 %v3687_v7 }
0x1ee0   : > { %v7336_v8 = vpop.permute.xlu0 %7335 }
0x1ee1   : > { %v7338_v10 = vunpack.i.h.bf16 %v7336_v8  ;;  %v7337_v11 = vunpack.i.l.bf16 %v7336_v8 }
0x1ee3   : > { %v7095_v13 = vpack.c.bf16 %v7338_v10, %v7337_v11 }
0x1ee7   : > { %v7653_v12 = vpop.eup %7652 }
0x1ee8   : > { %v3689_v44 = vmul.f32 %v7653_v12, %v7651_v51 }
0x1eea   : > { %6895 = vmatmul.mubr.msk.f32.vlgmr.msra.gmra.mrb[40].mxu0 %vm1161_vm3, %v3689_v44 }
0x1eeb   : > { %7097 = vmatpush3.bf16.xpose.msk.msra.mxu0 %vm8716_vm2, %v7095_v13  ;;  %6901 = vmatprep.mubr.msk.f32.mxu0 %vm8173_vm0, %v8171_v0 }
0x1eec   : > { %7098 = vmatprep.subr.bf16.mxu0 %v8174_v31 }
0x1ef2   : > { %6902 = vmatmul.mubr.msk.f32.vlgmr.msra.gmra.mrb[42].mxu0 %vm1080_vm1, %v3764_v14 }
0x1ef3   : > { %6908 = vmatprep.mubr.msk.f32.mxu0 %vm8173_vm0, %v8171_v0 }
0x1fbd   : > { %v9021_v15 = vpop.f32.mrb[40].mxu0 }
0x1fbe   : > { %v6896_v16 = vpop.f32.mrb[41].mxu0 }
0x1fc5   : > { %v3841_v17 = vpop.f32.mrb[42].mxu0 }
0x1fc6   : > { %v3845_v18 = vmul.f32 0.17677669, %v3841_v17  ;;  %v6903_v19 = vpop.f32.mrb[43].mxu0 }
0x1fc8   : > { %v3846_v20 = vsel %vm1161_vm3, %v3845_v18, -inf }
0x1fc9   : > { %3847 = vmax.xlane.f32.xlu0 %v3846_v20 }
0x1fdf   : > { %7340 = vrot.lane.b32.xlu0 %v8995_v45, %s8175_s0 }
0x1fe3   : > { %7350 = vrot.lane.b32.xlu0 %v8993_v58, %s8177_s9 }
0x1fe7   : > { %3938 = vrot.lane.b32.xlu0 %v3441_v55, %s8176_s29 }
0x1feb   : > { %4111 = vrot.lane.b32.xlu0 %v3441_v55, %s8177_s9 }
0x2056   : > { %v3848_v21 = vpop.xlane.xlu0 %3847 }
0x2057   : > { %v3849_v22 = vsub.f32 %v3845_v18, %v3848_v21 }
0x2059   : > { %v3850_v29 = vmul.f32 1.442695, %v3849_v22  ;;  %v7516_v22 = vld [vmem:[#allocation7 + $0x40] sm:$0xff]  }
0x205a   : > { %v7341_v23 = vpop.permute.xlu0 %7340 }
0x205b   : > { %7654 = vpow2.f32 %v3850_v29  ;;  %v7343_v56 = vunpack.i.h.bf16 %v7341_v23  ;;  %v7342_v25 = vunpack.i.l.bf16 %v7341_v23  ;;  %v7517_v29 = vld [vmem:[#allocation7 + $0x48] sm:$0xff]   ;;  %v7518_v23 = vld [vmem:[#allocation7 + $0x50] sm:$0xff]  }
0x205d   : > { %v7099_v27 = vpack.c.bf16 %v7343_v56, %v7342_v25  ;;  %v7519_v56 = vld [vmem:[#allocation7 + $0x58] sm:$0xff]   ;;  %v7520_v25 = vld [vmem:[#allocation7 + $0x60] sm:$0xff]  }
0x205e   : > { %v7351_v9 = vpop.permute.xlu0 %7350 }
0x205f   : > { %7100 = vmatpush3.bf16.msra.mxu0 %v7099_v27  ;;  %v7353_v24 = vunpack.i.h.bf16 %v7351_v9  ;;  %v7352_v50 = vunpack.i.l.bf16 %v7351_v9  ;;  %v7521_v27 = vld [vmem:[#allocation7 + $0x68] sm:$0xff]  }
0x2060   : > { %7101 = vmatprep.subr.bf16.mxu0 %v8174_v31 }
0x2061   : > { %v7109_v26 = vpack.c.bf16 %v7353_v24, %v7352_v50 }
0x2062   : > { %v3939_v52 = vpop.permute.xlu0 %3938 }
0x2065   : > { %v7655_v35 = vpop.eup %7654 }
0x2066   : > { %v3852_v38 = vsel %vm1161_vm3, %v7655_v35, 0.0  ;;  %v4112_v53 = vpop.permute.xlu0 %4111 }
0x2067   : > { %3853 = vadd.xlane.f32.xlu1 %v3852_v38  ;;  %v7523_v38 = vld [vmem:[#allocation7 + $0x78] sm:$0xff]  }
0x2078   : > { %7345 = vrot.lane.b32.xlu1 %v8993_v58, %s8176_s29 }
0x20f4   : > { %v3854_v40 = vpop.xlane.xlu1 %3853 }
0x20f5   : > { %7656 = vrcp.f32 %v3854_v40 }
0x20f8   : > { %v7346_v41 = vpop.permute.xlu1 %7345 }
0x20f9   : > { %v7348_v42 = vunpack.i.h.bf16 %v7346_v41  ;;  %v7347_v43 = vunpack.i.l.bf16 %v7346_v41 }
0x20fb   : > { %v7102_v49 = vpack.c.bf16 %v7348_v42, %v7347_v43 }
0x20ff   : > { %v7657_v46 = vpop.eup %7656 }
0x2100   : > { %v3856_v47 = vmul.f32 %v7657_v46, %v7655_v35  ;;  %v7522_v35 = vld [vmem:[#allocation7 + $0x70] sm:$0xff]  }
0x2102   : > { %6909 = vmatmul.mubr.msk.f32.vlgmr.msra.gmra.mrb[44].mxu0 %vm1161_vm3, %v3856_v47 }
0x2103   : > { %7104 = vmatpush3.bf16.xpose.msk.msra.mxu0 %vm8716_vm2, %v7102_v49  ;;  %6915 = vmatprep.mubr.msk.f32.mxu0 %vm8173_vm0, %v8171_v0 }
0x2104   : > { %7108 = vmatprep.subr.bf16.mxu0 %v8174_v31 }
0x210a   : > { %6916 = vmatmul.mubr.msk.f32.vlgmr.msra.gmra.mrb[46].mxu0 %vm1080_vm1, %v3939_v52  ;;  %v6382_v52 = vld [vmem:[#allocation8 + $0x1] ss:$0 sm:$0xff] }
0x210b   : > { %7111 = vmatpush3.bf16.xpose.msk.msra.mxu0 %vm8716_vm2, %v7109_v26  ;;  %6929 = vmatprep.mubr.msk.f32.mxu0 %vm8173_vm0, %v8171_v0 }
0x2112   : > { %6930 = vmatmul.mubr.msk.f32.vlgmr.msra.gmra.mrb[48].mxu0 %vm1080_vm1, %v4112_v53 }
0x2113   : > { %4639 = vmatprep.mubr.bf16.mxu0 %v8172_v1 }
0x21d5   : > { %v3934_v54 = vpop.f32.mrb[44].mxu0 }
0x21d6   : > { %v6910_v58 = vpop.f32.mrb[45].mxu0 }
0x21dd   : > { %v4016_v60 = vpop.f32.mrb[46].mxu0 }
0x21de   : > { %v4020_v30 = vmul.f32 0.17677669, %v4016_v60  ;;  %v6917_v55 = vpop.f32.mrb[47].mxu0 }
0x21e0   : > { %v4021_v61 = vsel %vm1161_vm3, %v4020_v30, -inf }
0x21e1   : > { %4022 = vmax.xlane.f32.xlu0 %v4021_v61  ;;  %v7526_v61 = vld [vmem:[#allocation10 + $0xc4] ss:$12 sps:$4 sm:$0xff]  }
0x21e2   : > { %4607 = vmatprep.subr.bf16.mxu0 %v7526_v61 }
0x21e5   : > { %v4189_v62 = vpop.f32.mrb[48].mxu0 }
0x21e6   : > { %v4193_v63 = vmul.f32 0.17677669, %v4189_v62  ;;  %v6931_v48 = vpop.f32.mrb[49].mxu0  ;;  %v7527_v62 = vld [vmem:[#allocation10 + $0xc8] ss:$12 sps:$4 sm:$0xff]  }
0x21e7   : > { %v7531_v48 = vld [vmem:[#allocation10 + $0xe0] ss:$12 sps:$4 sm:$0xff]  }
0x21e8   : > { %v4194_v2 = vsel %vm1161_vm3, %v4193_v63, -inf }
0x21e9   : > { %4195 = vmax.xlane.f32.xlu1 %v4194_v2  ;;  %v7528_v2 = vld [vmem:[#allocation10 + $0xd8] ss:$12 sps:$4 sm:$0xff]  }
0x21fa   : > { %7355 = vrot.lane.b32.xlu1 %v8995_v45, %s8176_s29 }
0x21fe   : > { %4285 = vrot.lane.b32.xlu1 %v3934_v54, %s8177_s9 }
0x226e   : > { %v4023_v3 = vpop.xlane.xlu0 %4022 }
0x226f   : > { %v4024_v32 = vsub.f32 %v4020_v30, %v4023_v3  ;;  %v7534_v3 = vld [vmem:[#allocation10 + $0xf4] ss:$12 sps:$4 sm:$0xff]  }
0x2271   : > { %v4025_v28 = vmul.f32 1.442695, %v4024_v32  ;;  %v7532_v32 = vld [vmem:[#allocation10 + $0xf0] ss:$12 sps:$4 sm:$0xff]  }
0x2273   : > { %7658 = vpow2.f32 %v4025_v28 }
0x2276   : > { %v4196_v4 = vpop.xlane.xlu1 %4195 }
0x2277   : > { %v4197_v5 = vsub.f32 %v4193_v63, %v4196_v4  ;;  %v7530_v63 = vld [vmem:[#allocation10 + $0xdc] ss:$12 sps:$4 sm:$0xff]  }
0x2279   : > { %v4198_v6 = vmul.f32 1.442695, %v4197_v5 }
0x227a   : > { %v7356_v51 = vpop.permute.xlu1 %7355 }
0x227b   : > { %7660 = vpow2.f32 %v4198_v6  ;;  %v7358_v57 = vunpack.i.h.bf16 %v7356_v51  ;;  %v7357_v7 = vunpack.i.l.bf16 %v7356_v51  ;;  %v7535_v6 = vld [vmem:[#allocation10 + $0xf8] ss:$12 sps:$4 sm:$0xff]  }
0x227c   : > { %v7538_v51 = vld [vmem:[#allocation10 + $0x10c] ss:$12 sps:$4 sm:$0xff]  }
0x227d   : > { %v7659_v8 = vpop.eup %7658  ;;  %v7106_v10 = vpack.c.bf16 %v7358_v57, %v7357_v7  ;;  %v7536_v57 = vld [vmem:[#allocation10 + $0x108] ss:$12 sps:$4 sm:$0xff]   ;;  %v7539_v7 = vld [vmem:[#allocation10 + $0x110] ss:$12 sps:$4 sm:$0xff]  }
0x227e   : > { %v4027_v11 = vsel %vm1161_vm3, %v7659_v8, 0.0  ;;  %v4286_v46 = vpop.permute.xlu1 %4285 }
0x227f   : > { %4028 = vadd.xlane.f32.xlu0 %v4027_v11  ;;  %7107 = vmatpush3.bf16.msra.mxu1 %v7106_v10  ;;  %v4296_v49 = vsel %vm1080_vm1, %v9021_v15, %v4286_v46  ;;  %v7524_v15 = vld [vmem:[#allocation10 + $0xc0] ss:$12 sps:$4 sm:$0xff]   ;;  %v7543_v11 = vld [vmem:[#allocation10 + $0x128] ss:$12 sps:$4 sm:$0xff]  }
0x2280   : > { %7112 = vmatprep.subr.bf16.mxu1 %v8174_v31  ;;  %4608 = vmatpush1.bf16.msra.mxu0 %v7524_v15  ;;  %v7540_v10 = vld [vmem:[#allocation10 + $0x120] ss:$12 sps:$4 sm:$0xff]  }
0x2281   : > { %4609 = vmatprep.subr.bf16.mxu0 %v7530_v63 }
0x2284   : > { %4610 = vmatpush1.bf16.msra.mxu0 %v7528_v2 }
0x2285   : > { %v7661_v12 = vpop.eup %7660  ;;  %4611 = vmatprep.subr.bf16.mxu0 %v7534_v3 }
0x2286   : > { %v4200_v44 = vsel %vm1161_vm3, %v7661_v12, 0.0 }
0x2287   : > { %4201 = vadd.xlane.f32.xlu0 %v4200_v44  ;;  %v7544_v44 = vld [vmem:[#allocation10 + $0x138] ss:$12 sps:$4 sm:$0xff]  }
0x2288   : > { %4612 = vmatpush1.bf16.msra.mxu0 %v7532_v32 }
0x2289   : > { %4613 = vmatprep.subr.bf16.mxu0 %v7538_v51 }
0x228c   : > { %4614 = vmatpush1.bf16.msra.mxu0 %v7536_v57 }
0x229d   : > { %7360 = vrot.lane.b32.xlu0 %v8995_v45, %s8177_s9 }
0x230c   : > { %v4029_v13 = vpop.xlane.xlu0 %4028 }
0x230d   : > { %7662 = vrcp.f32 %v4029_v13  ;;  %v7547_v13 = vld [vmem:[#allocation10 + $0x140] ss:$12 sps:$4 sm:$0xff]  }
0x2314   : > { %v4202_v14 = vpop.xlane.xlu0 %4201 }
0x2315   : > { %7664 = vrcp.f32 %v4202_v14  ;;  %v7550_v14 = vld [vmem:[#allocation10 + $0x154] ss:$12 sps:$4 sm:$0xff]  }
0x2317   : > { %v7663_v16 = vpop.eup %7662 }
0x2318   : > { %v4031_v17 = vmul.f32 %v7663_v16, %v7659_v8  ;;  %v7361_v18 = vpop.permute.xlu0 %7360  ;;  %v7542_v8 = vld [vmem:[#allocation10 + $0x124] ss:$12 sps:$4 sm:$0xff]  }
0x2319   : > { %v7363_v19 = vunpack.i.h.bf16 %v7361_v18  ;;  %v7362_v20 = vunpack.i.l.bf16 %v7361_v18  ;;  %4615 = vmatprep.subr.bf16.mxu0 %v7542_v8  ;;  %v7548_v16 = vld [vmem:[#allocation10 + $0x150] ss:$12 sps:$4 sm:$0xff]   ;;  %v7554_v18 = vld [vmem:[#allocation10 + $0x16c] ss:$12 sps:$4 sm:$0xff]  }
0x231a   : > { %6923 = vmatmul.mubr.msk.f32.vlgmr.msra.gmra.mrb[14].mxu1 %vm1161_vm3, %v4031_v17  ;;  %4616 = vmatpush1.bf16.msra.mxu0 %v7540_v10  ;;  %v7551_v17 = vld [vmem:[#allocation10 + $0x158] ss:$12 sps:$4 sm:$0xff]  }
0x231b   : > { %v7113_v21 = vpack.c.bf16 %v7363_v19, %v7362_v20  ;;  %6936 = vmatprep.mubr.msk.f32.mxu1 %vm8173_vm0, %v8171_v0  ;;  %v7552_v19 = vld [vmem:[#allocation10 + $0x168] ss:$12 sps:$4 sm:$0xff]   ;;  %v7555_v20 = vld [vmem:[#allocation10 + $0x170] ss:$12 sps:$4 sm:$0xff]  }
0x231d   : > { %7114 = vmatpush3.bf16.msra.mxu1 %v7113_v21 }
0x231e   : > { %6939 = vmatprep.subr.bf16.mxu1 %v8171_v0 }
0x231f   : > { %v7665_v31 = vpop.eup %7664 }
0x2320   : > { %v4204_v45 = vmul.f32 %v7665_v31, %v7661_v12  ;;  %v7546_v12 = vld [vmem:[#allocation10 + $0x13c] ss:$12 sps:$4 sm:$0xff]  }
0x2321   : > { %4617 = vmatprep.subr.bf16.mxu0 %v7546_v12 }
0x2322   : > { %6937 = vmatmul.mubr.msk.f32.vlgmr.msra.gmra.mrb[36].mxu1 %vm1161_vm3, %v4204_v45  ;;  %4618 = vmatpush1.bf16.msra.mxu0 %v7544_v44 }
0x2323   : > { %6955 = vmatprep.mubr.msk.bf16.mxu1 %vm8173_vm0, %v8171_v0  ;;  %6940 = vmatpush3.bf16.msra.mxu1 %v7516_v22 }
0x2324   : > { %6941 = vmatprep.subr.bf16.mxu1 %v8171_v0  ;;  %4619 = vmatprep.subr.bf16.mxu0 %v7550_v14 }
0x2326   : > { %4620 = vmatpush1.bf16.msra.mxu0 %v7548_v16 }
0x2327   : > { %6942 = vmatpush3.bf16.msra.mxu1 %v7517_v29  ;;  %4621 = vmatprep.subr.bf16.mxu0 %v7554_v18 }
0x2328   : > { %6943 = vmatprep.subr.bf16.mxu1 %v8171_v0 }
0x232a   : > { %4622 = vmatpush1.bf16.msra.mxu0 %v7552_v19 }
0x232b   : > { %6944 = vmatpush3.bf16.msra.mxu1 %v7518_v23  ;;  %6979 = vmatprep.subr.mxu0 %v8171_v0  ;;  %v9093_v23 = vld [vmem:[%s9393_s26] ss:$0 sm:$0xff] }
0x232c   : > { %6945 = vmatprep.subr.bf16.mxu1 %v8171_v0 }
0x232f   : > { %6946 = vmatpush3.bf16.msra.mxu1 %v7519_v56 }
0x2330   : > { %6947 = vmatprep.subr.bf16.mxu1 %v8171_v0 }
0x2333   : > { %6948 = vmatpush3.bf16.msra.mxu1 %v7520_v25  ;;  %v9096_v25 = vld [vmem:[#allocation22] ss:$0 sm:$0xff] }
0x2334   : > { %6949 = vmatprep.subr.bf16.mxu1 %v8171_v0 }
0x2337   : > { %6950 = vmatpush3.bf16.msra.mxu1 %v7521_v27 }
0x2338   : > { %6951 = vmatprep.subr.bf16.mxu1 %v8171_v0 }
0x233b   : > { %6952 = vmatpush3.bf16.msra.mxu1 %v7522_v35 }
0x233c   : > { %6953 = vmatprep.subr.bf16.mxu1 %v8171_v0 }
0x233f   : > { %6954 = vmatpush3.bf16.msra.mxu1 %v7523_v38  ;;  %v4462_v38 = vld [vmem:[#allocation11 + $0x3] sm:$0x7] }
0x2340   : > { %6959 = vmatprep.subr.bf16.mxu1 %v8171_v0 }
0x23ed   : > { %v4107_v40 = vpop.f32.mrb[14].mxu1 }
0x23ee   : > { %4289 = vrot.lane.b32.xlu1 %v4107_v40, %s8176_s29  ;;  %v6924_v41 = vpop.f32.mrb[15].mxu1  ;;  %v4471_v40 = vrot.slane %v4462_v38, %v8710_v36 }
0x23f5   : > { %v4280_v42 = vpop.f32.mrb[36].mxu1 }
0x23f6   : > { %4293 = vrot.lane.b32.xlu0 %v4280_v42, %s8175_s0  ;;  %v6938_v43 = vpop.f32.mrb[37].mxu1 }
0x23f7   : > { %v4467_v43 = vrot.slane %v4462_v38, %v8707_v34 }
0x2460   : > { %v4290_v47 = vpop.permute.xlu1 %4289 }
0x2461   : > { %v4297_v9 = vsel %vm1780_vm4, %v4296_v49, %v4290_v47  ;;  %v4475_v49 = vrot.slane %v4462_v38, %v1968_v37 }
0x2468   : > { %v4294_v24 = vpop.permute.xlu0 %4293 }
0x2469   : > { %v4298_v50 = vsel %vm1782_vm5, %v4297_v9, %v4294_v24 }
0x246a   : > { %v4299_v26 = vpack.c.bf16 %v4298_v50, %v4298_v50 }
0x246c   : > { %6956 = vmatmul.mubr.bf16.vlgmr.msra.gmra.mrb[40].mxu1 %v4299_v26 }
0x246d   : > { %6975 = vmatprep.mubr.msk.bf16.mxu1 %vm8173_vm0, %v8171_v0  ;;  %6960 = vmatpush3.bf16.msra.mxu1 %v7527_v62 }
0x246e   : > { %6961 = vmatprep.subr.bf16.mxu1 %v8171_v0 }
0x2471   : > { %6962 = vmatpush3.bf16.msra.mxu1 %v7531_v48 }
0x2472   : > { %6963 = vmatprep.subr.bf16.mxu1 %v8171_v0 }
0x2475   : > { %6964 = vmatpush3.bf16.msra.mxu1 %v7535_v6 }
0x2476   : > { %6965 = vmatprep.subr.bf16.mxu1 %v8171_v0 }
0x2479   : > { %6966 = vmatpush3.bf16.msra.mxu1 %v7539_v7 }
0x247a   : > { %6967 = vmatprep.subr.bf16.mxu1 %v8171_v0 }
0x247d   : > { %6968 = vmatpush3.bf16.msra.mxu1 %v7543_v11 }
0x247e   : > { %6969 = vmatprep.subr.bf16.mxu1 %v8171_v0 }
0x2481   : > { %6970 = vmatpush3.bf16.msra.mxu1 %v7547_v13 }
0x2482   : > { %6971 = vmatprep.subr.bf16.mxu1 %v8171_v0 }
0x2485   : > { %6972 = vmatpush3.bf16.msra.mxu1 %v7551_v17 }
0x2486   : > { %6973 = vmatprep.subr.bf16.mxu1 %v8171_v0 }
0x2489   : > { %6974 = vmatpush3.bf16.msra.mxu1 %v7555_v20 }
0x248a   : > { %7019 = vmatprep.subr.bf16.mxu1 %v8171_v0 }
0x253f   : > { %v4407_v53 = vpop.f32.mrb[40].mxu1 }
0x2540   : > { %v4408_v54 = vadd.f32 %v6382_v52, %v4407_v53  ;;  %v6957_v58 = vpop.f32.mrb[41].mxu1 }
0x2541   : > { %v4410_v60 = vpop.f32.mrb[42].mxu1 }
0x2542   : > { %v6958_v30 = vpop.f32.mrb[43].mxu1  ;;  %v4413_v55 = vadd.f32 %v4408_v54, %v8985_v39 }
0x2544   : > { %4414 = vadd.xlane.f32.xlu1 %v4413_v55 }
0x25d1   : > { %v4415_v39 = vpop.xlane.xlu1 %4414 }
0x25d2   : > { %v4416_v28 = vmul.f32 0.0078125, %v4415_v39 }
0x25d4   : > { %v4417_v4 = vsub.f32 %v4413_v55, %v4416_v28 }
0x25d6   : > { %v4418_v5 = vmul.f32 %v4417_v4, %v4417_v4 }
0x25d8   : > { %4419 = vadd.xlane.f32.xlu0 %v4418_v5 }
0x2665   : > { %v4420_v21 = vpop.xlane.xlu0 %4419 }
0x2666   : > { %v4421_v31 = vmul.f32 0.0078125, %v4420_v21 }
0x2668   : > { %v4422_v45 = vadd.f32 1e-05, %v4421_v31 }
0x266a   : > { %7666 = vrsqrt.f32 %v4422_v45 }
0x2674   : > { %v7667_v22 = vpop.eup %7666 }
0x2675   : > { %v4424_v29 = vmul.f32 %v7667_v22, %v4417_v4 }
0x2677   : > { %v4425_v56 = vmul.f32 %v9093_v23, %v4424_v29 }
0x2679   : > { %v9099_v27 = vadd.f32 %v9096_v25, %v4425_v56 }
0x267b   : > { %v4427_v35 = vpack.c.bf16 %v9099_v27, %v9099_v27 }
0x267d   : > { %4640 = vmatmul.mubr.bf16.vlgmr.msra.gmra.mrb[52].mxu0 %v4427_v35  ;;  %6976 = vmatmul.mubr.bf16.vlgmr.msra.gmra.mrb[44].mxu1 %v4427_v35 }
0x267e   : > { %6981 = vmatprep.mubr.msk.f32.mxu0 %vm8173_vm0, %v8171_v0  ;;  %7035 = vmatprep.mubr.msk.bf16.mxu1 %vm8173_vm0, %v8171_v0 }
0x2750   : > { %v4641_v41 = vpop.f32.mrb[52].mxu0  ;;  %v4682_v42 = vpop.f32.mrb[44].mxu1 }
0x2751   : > { %v4643_v46 = vpop.f32.mrb[53].mxu0  ;;  %v6977_v47 = vpop.f32.mrb[45].mxu1  ;;  %v9115_v53 = vadd.f32 %v4641_v41, %v4467_v43  ;;  %v9118_v54 = vadd.f32 %v4682_v42, %v4475_v49 }
0x2752   : > { %v9111_v9 = vadd.f32 %v4643_v46, %v4471_v40  ;;  %v4645_v24 = vpop.f32.mrb[54].mxu0  ;;  %v4685_v50 = vpop.f32.mrb[46].mxu1 }
0x2753   : > { %v4646_v26 = vpop.f32.mrb[55].mxu0  ;;  %v6978_v52 = vpop.f32.mrb[47].mxu1 }
0x2754   : > { %6980 = vmatpush3.xpose.msk.msra.mxu0 %vm1080_vm1, %v9111_v9 }
0x2755   : > { %6984 = vmatprep.subr.mxu0 %v8171_v0 }
0x2757   : > { %6982 = vmatmul.mubr.msk.f32.vlgmr.msra.gmra.mrb[50].mxu0 %vm1080_vm1, %v9115_v53 }
0x2758   : > { %6985 = vmatpush3.msra.mxu0 %v9118_v54  ;;  %6986 = vmatprep.mubr.msk.f32.mxu0 %vm8173_vm0, %v8171_v0 }
0x2759   : > { %6989 = vmatprep.subr.mxu0 %v8171_v0 }
0x282a   : > { %v4760_v33 = vpop.f32.mrb[50].mxu0 }
0x282b   : > { %v4764_v37 = vmul.f32 0.17677669, %v4760_v33  ;;  %v6983_v58 = vpop.f32.mrb[51].mxu0 }
0x282d   : > { %v4765_v60 = vsel %vm8862_vm6, -1e+30, %v4764_v37 }
0x282e   : > { %v4766_v30 = vsel %vm2260_vm7, %v4765_v60, -inf }
0x282f   : > { %4767 = vmax.xlane.f32.xlu0 %v4766_v30 }
0x2845   : > { %4852 = vrot.lane.b32.xlu0 %v9111_v9, %s8175_s0 }
0x28bc   : > { %v4768_v55 = vpop.xlane.xlu0 %4767 }
0x28bd   : > { %v4769_v15 = vsub.f32 %v4765_v60, %v4768_v55 }
0x28bf   : > { %v4770_v61 = vmul.f32 1.442695, %v4769_v15 }
0x28c0   : > { %v4853_v32 = vpop.permute.xlu0 %4852 }
0x28c1   : > { %7668 = vpow2.f32 %v4770_v61 }
0x28cb   : > { %v7669_v62 = vpop.eup %7668 }
0x28cc   : > { %v4772_v63 = vsel %vm2260_vm7, %v7669_v62, 0.0 }
0x28cd   : > { %4773 = vadd.xlane.f32.xlu1 %v4772_v63 }
0x28de   : > { %4850 = vrot.lane.b32.xlu1 %v9115_v53, %s8175_s0 }
0x295a   : > { %v4774_v48 = vpop.xlane.xlu1 %4773 }
0x295b   : > { %7670 = vrcp.f32 %v4774_v48 }
0x295e   : > { %v4851_v39 = vpop.permute.xlu1 %4850 }
0x2965   : > { %v7671_v2 = vpop.eup %7670 }
0x2966   : > { %v4776_v3 = vmul.f32 %v7671_v2, %v7669_v62  ;;  %v7556_v2 = vld [vmem:[#allocation13 + $0x40] sm:$0xff]  }
0x2967   : > { %7020 = vmatpush3.bf16.msra.mxu1 %v7556_v2 }
0x2968   : > { %6987 = vmatmul.mubr.msk.f32.vlgmr.msra.gmra.mrb[56].mxu0 %vm2260_vm7, %v4776_v3  ;;  %v7557_v3 = vld [vmem:[#allocation13 + $0x48] sm:$0xff]   ;;  %7021 = vmatprep.subr.bf16.mxu1 %v8171_v0 }
0x2969   : > { %6990 = vmatpush3.xpose.msk.msra.mxu0 %vm1080_vm1, %v4853_v32  ;;  %6991 = vmatprep.mubr.msk.f32.mxu0 %vm8173_vm0, %v8171_v0  ;;  %v7558_v32 = vld [vmem:[#allocation13 + $0x50] sm:$0xff]  }
0x296a   : > { %6994 = vmatprep.subr.mxu0 %v8171_v0 }
0x296b   : > { %7022 = vmatpush3.bf16.msra.mxu1 %v7557_v3 }
0x296c   : > { %6992 = vmatmul.mubr.msk.f32.vlgmr.msra.gmra.mrb[58].mxu0 %vm1080_vm1, %v4851_v39  ;;  %7023 = vmatprep.subr.bf16.mxu1 %v8171_v0  ;;  %v7560_v39 = vld [vmem:[#allocation13 + $0x60] sm:$0xff]  }
0x296d   : > { %6996 = vmatprep.mubr.msk.f32.mxu0 %vm8173_vm0, %v8171_v0 }
0x296f   : > { %7024 = vmatpush3.bf16.msra.mxu1 %v7558_v32 }
0x2970   : > { %7025 = vmatprep.subr.bf16.mxu1 %v8171_v0 }
0x2a3b   : > { %v9142_v28 = vpop.f32.mrb[56].mxu0 }
0x2a3c   : > { %v6988_v4 = vpop.f32.mrb[57].mxu0 }
0x2a3d   : > { %v7561_v4 = vld [vmem:[#allocation13 + $0x68] sm:$0xff]  }
0x2a3f   : > { %v4924_v5 = vpop.f32.mrb[58].mxu0 }
0x2a40   : > { %v4928_v6 = vmul.f32 0.17677669, %v4924_v5  ;;  %v6993_v51 = vpop.f32.mrb[59].mxu0  ;;  %v7563_v5 = vld [vmem:[#allocation13 + $0x78] sm:$0xff]  }
0x2a42   : > { %v4929_v57 = vsel %vm8862_vm6, -1e+30, %v4928_v6 }
0x2a43   : > { %v4930_v7 = vsel %vm2260_vm7, %v4929_v57, -inf }
0x2a44   : > { %4931 = vmax.xlane.f32.xlu1 %v4930_v7 }
0x2a55   : > { %5020 = vrot.lane.b32.xlu1 %v9111_v9, %s8176_s29 }
0x2a59   : > { %5018 = vrot.lane.b32.xlu1 %v9115_v53, %s8176_s29 }
0x2ad1   : > { %v4932_v8 = vpop.xlane.xlu1 %4931 }
0x2ad2   : > { %v4933_v10 = vsub.f32 %v4929_v57, %v4932_v8 }
0x2ad4   : > { %v4934_v11 = vmul.f32 1.442695, %v4933_v10 }
0x2ad5   : > { %v5021_v17 = vpop.permute.xlu1 %5020 }
0x2ad6   : > { %7672 = vpow2.f32 %v4934_v11 }
0x2ad9   : > { %v5019_v19 = vpop.permute.xlu1 %5018 }
0x2ae0   : > { %v7673_v12 = vpop.eup %7672 }
0x2ae1   : > { %v4936_v44 = vsel %vm2260_vm7, %v7673_v12, 0.0 }
0x2ae2   : > { %4937 = vadd.xlane.f32.xlu0 %v4936_v44 }
0x2af8   : > { %4942 = vrot.lane.b32.xlu0 %v9118_v54, %s8175_s0 }
0x2b6f   : > { %v4938_v13 = vpop.xlane.xlu0 %4937 }
0x2b70   : > { %7674 = vrcp.f32 %v4938_v13  ;;  %v6427_v13 = vld [vmem:[#allocation14 + $0x1] ss:$0 sm:$0xff] }
0x2b73   : > { %v4943_v14 = vpop.permute.xlu0 %4942 }
0x2b74   : > { %6995 = vmatpush3.msra.mxu0 %v4943_v14 }
0x2b75   : > { %6999 = vmatprep.subr.mxu0 %v8171_v0 }
0x2b7a   : > { %v7675_v16 = vpop.eup %7674 }
0x2b7b   : > { %v4940_v18 = vmul.f32 %v7675_v16, %v7673_v12 }
0x2b7d   : > { %6997 = vmatmul.mubr.msk.f32.vlgmr.msra.gmra.mrb[60].mxu0 %vm2260_vm7, %v4940_v18 }
0x2b7e   : > { %7000 = vmatpush3.xpose.msk.msra.mxu0 %vm1080_vm1, %v5021_v17  ;;  %7001 = vmatprep.mubr.msk.f32.mxu0 %vm8173_vm0, %v8171_v0 }
0x2b7f   : > { %7004 = vmatprep.subr.mxu0 %v8171_v0 }
0x2b81   : > { %7002 = vmatmul.mubr.msk.f32.vlgmr.msra.gmra.mrb[62].mxu0 %vm1080_vm1, %v5019_v19 }
0x2b82   : > { %7006 = vmatprep.mubr.msk.f32.mxu0 %vm8173_vm0, %v8171_v0 }
0x2c50   : > { %v5014_v20 = vpop.f32.mrb[60].mxu0 }
0x2c51   : > { %v6998_v21 = vpop.f32.mrb[61].mxu0 }
0x2c52   : > { %v7564_v21 = vld [vmem:[#allocation16 + $0x80] ss:$8 sps:$4 sm:$0xff]  }
0x2c54   : > { %v5092_v31 = vpop.f32.mrb[62].mxu0 }
0x2c55   : > { %v5096_v45 = vmul.f32 0.17677669, %v5092_v31  ;;  %v7003_v22 = vpop.f32.mrb[63].mxu0  ;;  %v7566_v31 = vld [vmem:[#allocation16 + $0x84] ss:$8 sps:$4 sm:$0xff]  }
0x2c56   : > { %v7572_v22 = vld [vmem:[#allocation16 + $0xa4] ss:$8 sps:$4 sm:$0xff]  }
0x2c57   : > { %v5097_v29 = vsel %vm8862_vm6, -1e+30, %v5096_v45  ;;  %v7569_v45 = vld [vmem:[#allocation16 + $0x94] ss:$8 sps:$4 sm:$0xff]  }
0x2c58   : > { %v5098_v56 = vsel %vm2260_vm7, %v5097_v29, -inf }
0x2c59   : > { %5099 = vmax.xlane.f32.xlu0 %v5098_v56 }
0x2c6f   : > { %5109 = vrot.lane.b32.xlu0 %v9118_v54, %s8176_s29 }
0x2c73   : > { %5185 = vrot.lane.b32.xlu0 %v9115_v53, %s8177_s9 }
0x2ce6   : > { %v5100_v35 = vpop.xlane.xlu0 %5099 }
0x2ce7   : > { %v5101_v38 = vsub.f32 %v5097_v29, %v5100_v35  ;;  %v7570_v29 = vld [vmem:[#allocation16 + $0xa0] ss:$8 sps:$4 sm:$0xff]  }
0x2ce9   : > { %v5102_v40 = vmul.f32 1.442695, %v5101_v38 }
0x2cea   : > { %v5110_v41 = vpop.permute.xlu0 %5109 }
0x2ceb   : > { %7676 = vpow2.f32 %v5102_v40  ;;  %7005 = vmatpush3.msra.mxu0 %v5110_v41  ;;  %v7575_v41 = vld [vmem:[#allocation16 + $0xb4] ss:$8 sps:$4 sm:$0xff]  }
0x2cec   : > { %7009 = vmatprep.subr.mxu0 %v8171_v0 }
0x2cee   : > { %v5186_v50 = vpop.permute.xlu0 %5185 }
0x2cf5   : > { %v7677_v42 = vpop.eup %7676 }
0x2cf6   : > { %v5104_v43 = vsel %vm2260_vm7, %v7677_v42, 0.0 }
0x2cf7   : > { %5105 = vadd.xlane.f32.xlu1 %v5104_v43  ;;  %v7576_v43 = vld [vmem:[#allocation16 + $0xc0] ss:$8 sps:$4 sm:$0xff]  }
0x2d08   : > { %5187 = vrot.lane.b32.xlu1 %v9111_v9, %s8177_s9 }
0x2d84   : > { %v5106_v46 = vpop.xlane.xlu1 %5105 }
0x2d85   : > { %7678 = vrcp.f32 %v5106_v46  ;;  %v7581_v46 = vld [vmem:[#allocation16 + $0xd4] ss:$8 sps:$4 sm:$0xff]  }
0x2d88   : > { %v5188_v24 = vpop.permute.xlu1 %5187 }
0x2d8f   : > { %v7679_v47 = vpop.eup %7678 }
0x2d90   : > { %v5108_v49 = vmul.f32 %v7679_v47, %v7677_v42  ;;  %v7578_v42 = vld [vmem:[#allocation16 + $0xc4] ss:$8 sps:$4 sm:$0xff]   ;;  %v7579_v47 = vld [vmem:[#allocation16 + $0xd0] ss:$8 sps:$4 sm:$0xff]  }
0x2d92   : > { %7007 = vmatmul.mubr.msk.f32.vlgmr.msra.gmra.mrb[64].mxu0 %vm2260_vm7, %v5108_v49  ;;  %v7584_v49 = vld [vmem:[#allocation16 + $0xe4] ss:$8 sps:$4 sm:$0xff]  }
0x2d93   : > { %7010 = vmatpush3.xpose.msk.msra.mxu0 %vm1080_vm1, %v5188_v24  ;;  %7011 = vmatprep.mubr.msk.f32.mxu0 %vm8173_vm0, %v8171_v0  ;;  %v7582_v24 = vld [vmem:[#allocation16 + $0xe0] ss:$8 sps:$4 sm:$0xff]  }
0x2d94   : > { %7014 = vmatprep.subr.mxu0 %v8171_v0 }
0x2d96   : > { %7012 = vmatmul.mubr.msk.f32.vlgmr.msra.gmra.mrb[66].mxu0 %vm1080_vm1, %v5186_v50  ;;  %v7587_v50 = vld [vmem:[#allocation16 + $0xf4] ss:$8 sps:$4 sm:$0xff]  }
0x2d97   : > { %7016 = vmatprep.mubr.msk.f32.mxu0 %vm8173_vm0, %v8171_v0 }
0x2e65   : > { %v5181_v9 = vpop.f32.mrb[64].mxu0 }
0x2e66   : > { %v7008_v26 = vpop.f32.mrb[65].mxu0 }
0x2e67   : > { %v7588_v26 = vld [vmem:[#allocation19 + $0xc0] sm:$0xff]  }
0x2e69   : > { %v5259_v52 = vpop.f32.mrb[66].mxu0 }
0x2e6a   : > { %v5263_v53 = vmul.f32 0.17677669, %v5259_v52  ;;  %v7013_v33 = vpop.f32.mrb[67].mxu0  ;;  %v7589_v52 = vld [vmem:[#allocation19 + $0x80] sm:$0xff]  }
0x2e6b   : > { %v7591_v33 = vld [vmem:[#allocation19 + $0x88] sm:$0xff]  }
0x2e6c   : > { %v5264_v37 = vsel %vm8862_vm6, -1e+30, %v5263_v53  ;;  %v7590_v53 = vld [vmem:[#allocation19 + $0xc8] sm:$0xff]  }
0x2e6d   : > { %v5265_v58 = vsel %vm2260_vm7, %v5264_v37, -inf }
0x2e6e   : > { %5266 = vmax.xlane.f32.xlu1 %v5265_v58  ;;  %v7593_v58 = vld [vmem:[#allocation19 + $0x90] sm:$0xff]  }
0x2e7f   : > { %5353 = vrot.lane.b32.xlu1 %v5014_v20, %s8177_s9 }
0x2e83   : > { %5357 = vrot.lane.b32.xlu1 %v5181_v9, %s8176_s29  ;;  %v7585_v9 = vld [vmem:[#allocation16 + $0xf0] ss:$8 sps:$4 sm:$0xff]   ;;  %s9398_s29 = sld [smem:[#allocation38_spill]] }
0x2e89   : > { %p9400_p9 = scmp.ne.s32.totalorder %s9398_s29, 0 }
0x2e8b   : > { %p8056_p10 = pnand %p8055_p0, %p9400_p9 }
0x2e8d   : > { %p8057_p13 = pneg %p8056_p10 }
0x2e8f   : > { %p8064_p3 = pnand %p8063_p2, %p8057_p13 }
0x2efb   : > { %v5267_v60 = vpop.xlane.xlu1 %5266 }
0x2efc   : > { %v5268_v30 = vsub.f32 %v5264_v37, %v5267_v60  ;;  %v7592_v37 = vld [vmem:[#allocation19 + $0xd0] sm:$0xff]   ;;  %v7594_v60 = vld [vmem:[#allocation19 + $0xd8] sm:$0xff]  }
0x2efe   : > { %v5269_v55 = vmul.f32 1.442695, %v5268_v30  ;;  %v7595_v30 = vld [vmem:[#allocation19 + $0x98] sm:$0xff]  }
0x2eff   : > { %v5354_v57 = vpop.permute.xlu1 %5353 }
0x2f00   : > { %7680 = vpow2.f32 %v5269_v55  ;;  %v5364_v8 = vsel %vm1080_vm1, %v9142_v28, %v5354_v57  ;;  %v7567_v28 = vld [vmem:[#allocation16 + $0x90] ss:$8 sps:$4 sm:$0xff]   ;;  %v7596_v55 = vld [vmem:[#allocation19 + $0xe0] sm:$0xff]  }
0x2f03   : > { %v5358_v7 = vpop.permute.xlu1 %5357 }
0x2f04   : > { %v5365_v10 = vsel %vm1780_vm4, %v5364_v8, %v5358_v7 }
0x2f0a   : > { %v7681_v15 = vpop.eup %7680 }
0x2f0b   : > { %v5271_v61 = vsel %vm2260_vm7, %v7681_v15, 0.0 }
0x2f0c   : > { %5272 = vadd.xlane.f32.xlu0 %v5271_v61  ;;  %v7598_v61 = vld [vmem:[#allocation19 + $0xe8] sm:$0xff]  }
0x2f22   : > { %5276 = vrot.lane.b32.xlu0 %v9118_v54, %s8177_s9  ;;  %v7559_v54 = vld [vmem:[#allocation13 + $0x58] sm:$0xff]   ;;  %s9396_s9 = sld [smem:[#allocation48_spill]] }
0x2f23   : > { %7026 = vmatpush3.bf16.msra.mxu1 %v7559_v54 }
0x2f24   : > { %7027 = vmatprep.subr.bf16.mxu1 %v8171_v0 }
0x2f27   : > { %7028 = vmatpush3.bf16.msra.mxu1 %v7560_v39 }
0x2f28   : > { %7029 = vmatprep.subr.bf16.mxu1 %v8171_v0 }
0x2f2b   : > { %7030 = vmatpush3.bf16.msra.mxu1 %v7561_v4  ;;  %v7600_v4 = vld [vmem:[#allocation19 + $0xf0] sm:$0xff]  }
0x2f2c   : > { %7031 = vmatprep.subr.bf16.mxu1 %v8171_v0 }
0x2f99   : > { %v5273_v59 = vpop.xlane.xlu0 %5272 }
0x2f9a   : > { %7682 = vrcp.f32 %v5273_v59  ;;  %v7599_v59 = vld [vmem:[#allocation19 + $0xa8] sm:$0xff]  }
0x2f9d   : > { %v5277_v62 = vpop.permute.xlu0 %5276 }
0x2f9e   : > { %7015 = vmatpush3.msra.mxu0 %v5277_v62 }
0x2f9f   : > { %5606 = vmatprep.subr.bf16.mxu0 %v7566_v31 }
0x2fa4   : > { %v7683_v63 = vpop.eup %7682 }
0x2fa5   : > { %v5275_v48 = vmul.f32 %v7683_v63, %v7681_v15  ;;  %v7597_v15 = vld [vmem:[#allocation19 + $0xa0] sm:$0xff]  }
0x2fa7   : > { %7017 = vmatmul.mubr.msk.f32.vlgmr.msra.gmra.mrb[68].mxu0 %vm2260_vm7, %v5275_v48 }
0x2fa8   : > { %5638 = vmatprep.mubr.bf16.mxu0 %v8172_v1  ;;  %v7562_v1 = vld [vmem:[#allocation13 + $0x70] sm:$0xff]   ;;  %5607 = vmatpush1.bf16.msra.mxu0 %v7564_v21 }
0x2fa9   : > { %7032 = vmatpush3.bf16.msra.mxu1 %v7562_v1  ;;  %5608 = vmatprep.subr.bf16.mxu0 %v7569_v45  ;;  %v7601_v1 = vld [vmem:[#allocation19 + $0xb0] sm:$0xff]  }
0x2faa   : > { %7033 = vmatprep.subr.bf16.mxu1 %v8171_v0 }
0x2fac   : > { %5609 = vmatpush1.bf16.msra.mxu0 %v7567_v28 }
0x2fad   : > { %7034 = vmatpush3.bf16.msra.mxu1 %v7563_v5  ;;  %5610 = vmatprep.subr.bf16.mxu0 %v7572_v22  ;;  %v7602_v5 = vld [vmem:[#allocation19 + $0xf8] sm:$0xff]  }
0x2fae   : > { %6656 = vmatprep.subr.bf16.mxu1 %v7588_v26 }
0x2fb0   : > { %5611 = vmatpush1.bf16.msra.mxu0 %v7570_v29  ;;  %v7604_v29 = vld [vmem:[%s9396_s9] sm:$0xff]  }
0x2fb1   : > { %5612 = vmatprep.subr.bf16.mxu0 %v7575_v41 }
0x307a   : > { %v5348_v6 = vpop.f32.mrb[68].mxu0 }
0x307b   : > { %5361 = vrot.lane.b32.xlu0 %v5348_v6, %s8175_s0  ;;  %v7018_v51 = vpop.f32.mrb[69].mxu0  ;;  %v7603_v6 = vld [vmem:[#allocation19 + $0xb8] sm:$0xff]  }
0x307c   : > { %v5514_v51 = vld [vmem:[#allocation17 + $0x2] sm:$0x3] }
0x307d   : > { %v5519_v57 = vrot.slane %v5514_v51, %v8707_v34  ;;  %v5523_v7 = vrot.slane %v5514_v51, %v8710_v36 }
0x30ed   : > { %v5362_v11 = vpop.permute.xlu0 %5361 }
0x30ee   : > { %v5366_v12 = vsel %vm1782_vm5, %v5365_v10, %v5362_v11 }
0x30ef   : > { %v5367_v44 = vpack.c.bf16 %v5366_v12, %v5366_v12 }
0x30f1   : > { %7036 = vmatmul.mubr.bf16.vlgmr.msra.gmra.mrb[48].mxu1 %v5367_v44 }
0x30f2   : > { %6657 = vmatpush3.bf16.msra.mxu1 %v7589_v52 }
0x30f3   : > { %6658 = vmatprep.subr.bf16.mxu1 %v7590_v53 }
0x30f6   : > { %6659 = vmatpush3.bf16.msra.mxu1 %v7591_v33 }
0x30f7   : > { %6660 = vmatprep.subr.bf16.mxu1 %v7592_v37 }
0x30fa   : > { %6661 = vmatpush3.bf16.msra.mxu1 %v7593_v58 }
0x30fb   : > { %6662 = vmatprep.subr.bf16.mxu1 %v7594_v60 }
0x30fe   : > { %6663 = vmatpush3.bf16.msra.mxu1 %v7595_v30 }
0x30ff   : > { %6664 = vmatprep.subr.bf16.mxu1 %v7596_v55 }
0x3102   : > { %6665 = vmatpush3.bf16.msra.mxu1 %v7597_v15 }
0x3103   : > { %6666 = vmatprep.subr.bf16.mxu1 %v7598_v61 }
0x3106   : > { %6667 = vmatpush3.bf16.msra.mxu1 %v7599_v59 }
0x3107   : > { %6668 = vmatprep.subr.bf16.mxu1 %v7600_v4 }
0x310a   : > { %6669 = vmatpush3.bf16.msra.mxu1 %v7601_v1 }
0x310b   : > { %6670 = vmatprep.subr.bf16.mxu1 %v7602_v5 }
0x310e   : > { %6671 = vmatpush3.bf16.msra.mxu1 %v7603_v6 }
0x31c4   : > { %v5475_v14 = vpop.f32.mrb[48].mxu1 }
0x31c5   : > { %v5476_v16 = vadd.f32 %v6427_v13, %v5475_v14  ;;  %v7037_v17 = vpop.f32.mrb[49].mxu1 }
0x31c6   : > { %v5478_v18 = vpop.f32.mrb[50].mxu1 }
0x31c7   : > { %v7038_v19 = vpop.f32.mrb[51].mxu1  ;;  %v5481_v20 = vadd.f32 %v5476_v16, %v9099_v27  ;;  %v7573_v27 = vld [vmem:[#allocation16 + $0xb0] ss:$8 sps:$4 sm:$0xff]  }
0x31c8   : > { %5613 = vmatpush1.bf16.msra.mxu0 %v7573_v27  ;;  %v7606_v27 = vld [vmem:[%s9396_s9 + $0x10] sm:$0xff]  }
0x31c9   : > { %5482 = vadd.xlane.f32.xlu1 %v5481_v20  ;;  %5614 = vmatprep.subr.bf16.mxu0 %v7578_v42  ;;  %v7607_v42 = vld [vmem:[%s9396_s9 + $0x18] sm:$0xff]  }
0x31cc   : > { %5615 = vmatpush1.bf16.msra.mxu0 %v7576_v43  ;;  %v7608_v43 = vld [vmem:[%s9396_s9 + $0x20] sm:$0xff]  }
0x31cd   : > { %5616 = vmatprep.subr.bf16.mxu0 %v7581_v46  ;;  %v7609_v46 = vld [vmem:[%s9396_s9 + $0x28] sm:$0xff]  }
0x31d0   : > { %5617 = vmatpush1.bf16.msra.mxu0 %v7579_v47  ;;  %v7610_v47 = vld [vmem:[%s9396_s9 + $0x30] sm:$0xff]  }
0x31d1   : > { %5618 = vmatprep.subr.bf16.mxu0 %v7584_v49  ;;  %v7611_v49 = vld [vmem:[%s9396_s9 + $0x38] sm:$0xff]  }
0x31d4   : > { %5619 = vmatpush1.bf16.msra.mxu0 %v7582_v24 }
0x31d5   : > { %5620 = vmatprep.subr.bf16.mxu0 %v7587_v50 }
0x31d8   : > { %5621 = vmatpush1.bf16.msra.mxu0 %v7585_v9 }
0x31d9   : > { %7039 = vmatprep.subr.bf16.mxu0 %v8171_v0 }
0x3256   : > { %v5483_v56 = vpop.xlane.xlu1 %5482 }
0x3257   : > { %v5484_v35 = vmul.f32 0.0078125, %v5483_v56  ;;  %v7605_v56 = vld [vmem:[%s9396_s9 + $0x8] sm:$0xff]  }
0x3259   : > { %v5485_v38 = vsub.f32 %v5481_v20, %v5484_v35  ;;  %v6452_v20 = vld [vmem:[#allocation20 + $0x1] ss:$0 sm:$0xff] }
0x325b   : > { %v5486_v40 = vmul.f32 %v5485_v38, %v5485_v38 }
0x325d   : > { %5487 = vadd.xlane.f32.xlu0 %v5486_v40 }
0x32ea   : > { %v5488_v62 = vpop.xlane.xlu0 %5487 }
0x32eb   : > { %v5489_v63 = vmul.f32 0.0078125, %v5488_v62 }
0x32ed   : > { %v5490_v48 = vadd.f32 1e-05, %v5489_v63 }
0x32ef   : > { %7684 = vrsqrt.f32 %v5490_v48 }
0x32f9   : > { %v7685_v2 = vpop.eup %7684 }
0x32fa   : > { %v5492_v3 = vmul.f32 %v7685_v2, %v5485_v38 }
0x32fc   : > { %v5493_v32 = vmul.f32 %v9093_v23, %v5492_v3 }
0x32fe   : > { %v5494_v54 = vadd.f32 %v9096_v25, %v5493_v32 }
0x3300   : > { %v5495_v39 = vpack.c.bf16 %v5494_v54, %v5494_v54 }
0x3302   : > { %5639 = vmatmul.mubr.bf16.vlgmr.msra.gmra.mrb[72].mxu0 %v5495_v39 }
0x3303   : > { %7055 = vmatprep.mubr.msk.bf16.mxu0 %vm8173_vm0, %v8171_v0  ;;  %7040 = vmatpush3.bf16.msra.mxu0 %v7604_v29 }
0x3304   : > { %7041 = vmatprep.subr.bf16.mxu0 %v8171_v0 }
0x3307   : > { %7042 = vmatpush3.bf16.msra.mxu0 %v7605_v56 }
0x3308   : > { %7043 = vmatprep.subr.bf16.mxu0 %v8171_v0 }
0x330b   : > { %7044 = vmatpush3.bf16.msra.mxu0 %v7606_v27 }
0x330c   : > { %7045 = vmatprep.subr.bf16.mxu0 %v8171_v0 }
0x330f   : > { %7046 = vmatpush3.bf16.msra.mxu0 %v7607_v42 }
0x3310   : > { %7047 = vmatprep.subr.bf16.mxu0 %v8171_v0 }
0x3313   : > { %7048 = vmatpush3.bf16.msra.mxu0 %v7608_v43 }
0x3314   : > { %7049 = vmatprep.subr.bf16.mxu0 %v8171_v0 }
0x3317   : > { %7050 = vmatpush3.bf16.msra.mxu0 %v7609_v46 }
0x3318   : > { %7051 = vmatprep.subr.bf16.mxu0 %v8171_v0 }
0x331b   : > { %7052 = vmatpush3.bf16.msra.mxu0 %v7610_v47 }
0x331c   : > { %7053 = vmatprep.subr.bf16.mxu0 %v8171_v0 }
0x331f   : > { %7054 = vmatpush3.bf16.msra.mxu0 %v7611_v49 }
0x33d5   : > { %v5640_v8 = vpop.f32.mrb[72].mxu0 }
0x33d6   : > { %v5641_v10 = vadd.f32 %v5640_v8, %v5519_v57  ;;  %v5642_v11 = vpop.f32.mrb[73].mxu0 }
0x33d7   : > { %v5643_v12 = vadd.f32 %v5642_v11, %v5523_v7  ;;  %v5644_v44 = vpop.f32.mrb[74].mxu0 }
0x33d8   : > { %v5647_v13 = vmax.f32 %v5641_v10, 0.0  ;;  %v5645_v14 = vpop.f32.mrb[75].mxu0 }
0x33d9   : > { %v5648_v16 = vmax.f32 %v5643_v12, 0.0 }
0x33da   : > { %v5649_v18 = vpack.c.bf16 %v5647_v13, %v5647_v13 }
0x33db   : > { %v5650_v17 = vpack.c.bf16 %v5648_v16, %v5648_v16 }
0x33dd   : > { %5820 = vmatprep.mubr.bf16.mxu1 %v5650_v17 }
0x33de   : > { %5821 = vmatmul.mubr.bf16.vlgmr.msra.gmra.mrb[52].mxu1 %v5649_v18 }
0x34b1   : > { %v6672_v19 = vpop.f32.mrb[52].mxu1 }
0x34b2   : > { %v6673_v21 = vpop.f32.mrb[53].mxu1 }
0x34b3   : > { %v6674_v31 = vadd.f32 %v6673_v21, %v6672_v19  ;;  %v6675_v45 = vpop.f32.mrb[54].mxu1 }
0x34b4   : > { %v6676_v34 = vpop.f32.mrb[55].mxu1 }
0x34b5   : > { %v5823_v28 = vadd.f32 %v6674_v31, %v6452_v20 }
0x34b7   : > { %v5828_v36 = vmax.f32 %v5823_v28, 0.0 }
0x34b9   : > { %v5829_v22 = vadd.f32 %v5828_v36, %v5494_v54 }
0x34bb   : > { %5830 = vadd.xlane.f32.xlu0 %v5829_v22 }
0x3548   : > { %v5831_v35 = vpop.xlane.xlu0 %5830 }
0x3549   : > { %v5832_v38 = vmul.f32 0.0078125, %v5831_v35 }
0x354b   : > { %v5833_v40 = vsub.f32 %v5829_v22, %v5832_v38 }
0x354d   : > { %v5834_v41 = vmul.f32 %v5833_v40, %v5833_v40 }
0x354f   : > { %5835 = vadd.xlane.f32.xlu1 %v5834_v41 }
0x35dc   : > { %v5836_v24 = vpop.xlane.xlu1 %5835 }
0x35dd   : > { %v5837_v50 = vmul.f32 0.0078125, %v5836_v24 }
0x35df   : > { %v5838_v9 = vadd.f32 1e-05, %v5837_v50 }
0x35e1   : > { %7686 = vrsqrt.f32 %v5838_v9 }
0x35eb   : > { %v7687_v26 = vpop.eup %7686 }
0x35ec   : > { %v5840_v52 = vmul.f32 %v7687_v26, %v5833_v40 }
0x35ee   : > { %v5841_v53 = vmul.f32 %v9093_v23, %v5840_v52 }
0x35f0   : > { %v5842_v33 = vadd.f32 %v9096_v25, %v5841_v53 }
0x35f2   : > { %v5843_v37 = vpack.c.bf16 %v5842_v33, %v5842_v33 }
0x35f4   : > { %7056 = vmatmul.mubr.bf16.vlgmr.msra.gmra.mrb[76].mxu0 %v5843_v37 }
0x36c7   : > { %v5942_v0 = vpop.f32.mrb[76].mxu0 }
0x36c8   : > { %5948 = vst [vmem:[%s795_s21] sm:$0xff] %v5942_v0  ;;  %v7057_v23 = vpop.f32.mrb[77].mxu0 }
0x36c9   : > { %v5945_v25 = vpop.f32.mrb[78].mxu0 }
0x36ca   : > { %8067 = shalt.err (!%p8064_p3)
}
0x36cb   : > { %s8068_s19 = scalar_lea.hbm %s9252_s3, 128  ;;  %s8072_s7 = scalar_lea.hbm %s9399_s16, 256 }
0x36cc   : > { %p8069_p4 = scmp.ne.s32.totalorder %s9252_s3, %s8068_s19  ;;  %p8073_p11 = scmp.lt.u32.totalorder %s9252_s3, %s9399_s16 }
0x36cd   : > { %p8074_p5 = scmp.lt.u32.totalorder %s8072_s7, %s8068_s19  ;;  %p8076_p0 = scmp.lt.u32.totalorder %s8068_s19, %s9252_s3 }
0x36ce   : > { %p8070_p7 = pnand %p8069_p4, %p9400_p9 }
0x36cf   : > { %p8075_p6 = por %p8074_p5, %p8073_p11 }
0x36d0   : > { %p8071_p8 = pneg %p8070_p7 }
0x36d1   : > { %p8077_p10 = por %p8076_p0, %p8075_p6 }
0x36d3   : > { %p8078_p13 = pnand %p8077_p10, %p8071_p8 }
0x36d5   : > { %8081 = shalt.err (!%p8078_p13)
}
0x36d6   : > { %7167 = dma.vmem_to_hbm [thread:$0]  (%p9400_p9), %s9247_s25, 128, %s9252_s3, %s5950_s30   ;;  %v7058_v58 = vpop.f32.mrb[79].mxu0 }
0x36d7 PF: > { %s9401_s18 = sld [smem:[#allocation35_spill]]  ;;  %s9402_s24 = sld [smem:[#allocation32_spill]] }
0x36d8   : > { %s9403_s27 = sld [smem:[#allocation39_spill]] }
0x36dd   : > { %p7239_p12 = scmp.ge.s32.totalorder %s9401_s18, 2  ;;  %s5975_s1 = sand.u32 1, %s9402_s24  }
0x36de   : > { %p9404_p1 = scmp.ne.s32.totalorder %s9403_s27, 0  ;;  %s5976_s22 = scalar_lea.sflag [#allocation4], %s5975_s1 }
0x36e0   : > { %p7210_p2 = pnand %p7239_p12, %p9404_p1 }
0x36e2   : > { %8127 = dma.done.wait (!%p7210_p2), %s5976_s22, 128  }
0x36e3   : > { %8129 = vsyncadd (!%p7210_p2), %s5976_s22, 4294967168  ;;  %s9405_s21 = sld [smem:[#allocation36_spill]]  ;;  %s9406_s0 = sld [smem:[#allocation33_spill]] }
0x36e4   : > { %s9407_s30 = sld [smem:[#allocation34_spill]]  ;;  %s9408_s20 = sld [smem:[#allocation37_spill]] }
0x36e9   : > { %p36_p3 = scmp.ge.s32.totalorder %s9405_s21, 4  }
0x36eb   :  { %38 = sbr.rel (!%p36_p3) target bundleno = 21 (0x15), region = 201 }
0x36f2   :  { %5981 = vsyncpa [#allocation3], 1 }
0x36f3   :  { %5983 = vsyncpa [#allocation3 + $0x1], 1 }
0x36f4   :  { %5984 = vsyncpa [#allocation6], 1 }
0x36f5   :  { %5985 = vsyncpa [#allocation9], 1 }
0x36f6   :  { %5986 = vsyncpa [#allocation12], 1 }
0x36f7   :  { %5987 = vsyncpa [#allocation15], 1 }
0x36f8   :  { %5988 = vsyncpa [#allocation18], 1 }
0x36f9   :  { %5989 = vsyncpa [#allocation21], 1 }
0x36fa   :  { %5990 = vsyncpa [#allocation4], 1 }
0x36fb   :  { %5992 = vsyncpa [#allocation4 + $0x1], 1 }

</bundles_post_ra>
